<compile_context>
chip_gen: v6e
topology: v6e:2x2x1
jax: 0.10.0
libtpu: 0.0.40
codegen_flags: <defaults>
</compile_context>

<pallas_src>
from types import SimpleNamespace

import jax
import jax.numpy as jnp
from jax.experimental import pallas as pl
from jax.experimental.pallas import tpu as pltpu


# ----------------------------------------------------------------------------
# Pallas kernel: one (batch block, point tile) per grid step.
# ----------------------------------------------------------------------------
def pointnet_kernel(
    x_ref,                                   # (tile_n*block_b, 8) bf16, rows=(point, batch)
    w1_ref, b1_ref,                          # conv1 (scale-folded) / bn1 shift
    w2_ref, b2_ref,
    w3_ref, b3_ref,
    w4_ref, b4_ref,
    w5_ref, b5_ref,
    wl1_ref, b6_ref,                         # linear1 (scale-folded) / bn6 shift
    wl2_ref, bl2_ref,                        # linear2 weight/bias (lane-padded)
    out_ref,                                 # (block_b, c_pad) f32
    acc_ref,                                 # (block_b, emb) bf16 running max
):
    j = pl.program_id(1)
    tile_rows = x_ref.shape[0]
    block_b, emb = acc_ref.shape
    tile_n = tile_rows // block_b

    def conv_bn_relu(h, w_ref, b_ref):
        # bf16 x bf16 -> MXU with f32 accumulate; bf16 shift + ReLU epilogue.
        y = jnp.dot(h, w_ref[...], preferred_element_type=jnp.float32)
        return jnp.maximum(y.astype(jnp.bfloat16) + b_ref[...], 0)

    h = x_ref[...]                                   # (tile_rows, 8) bf16
    h = conv_bn_relu(h, w1_ref, b1_ref)              # (tile_rows, 64)
    h = conv_bn_relu(h, w2_ref, b2_ref)              # (tile_rows, 64)
    h = conv_bn_relu(h, w3_ref, b3_ref)              # (tile_rows, 64)
    h = conv_bn_relu(h, w4_ref, b4_ref)              # (tile_rows, 128)
    h = conv_bn_relu(h, w5_ref, b5_ref)              # (tile_rows, emb)

    # Per-element partial max over this point tile.  Rows are (point-major,
    # batch-minor) and block_b % 16 == 0, so this view is layout-free for bf16
    # and the reduction is an elementwise max across slabs (pure VPU).
    partial = jnp.max(h.reshape(tile_n, block_b, emb), axis=0)   # (block_b, emb)

    @pl.when(j == 0)
    def _():
        acc_ref[...] = partial

    @pl.when(j > 0)
    def _():
        acc_ref[...] = jnp.maximum(acc_ref[...], partial)

    @pl.when(j == pl.num_programs(1) - 1)
    def _():
        g = acc_ref[...]                                         # (block_b, emb) bf16
        # linear1 (no bias, BN6 scale folded) -> shift -> relu
        t = jnp.dot(g, wl1_ref[...], preferred_element_type=jnp.float32)
        t = jnp.maximum(t.astype(jnp.bfloat16) + b6_ref[...], 0)  # (block_b, 512)
        # TODO(synk): nn.Dropout() is eval-mode identity; training-mode dropout
        # is not reproduced here.
        o = jnp.dot(t, wl2_ref[...], preferred_element_type=jnp.float32) + bl2_ref[...]
        out_ref[...] = o                                          # (block_b, c_pad) f32


# ----------------------------------------------------------------------------
# Wrapper
# ----------------------------------------------------------------------------
def pointnet_forward(x_ncw, params, *, block_b=16, tile_n=None):
    """x_ncw: (B, 3, N) float32 (PyTorch NCW). Returns (B, C_out) float32.

    For v7x, pick block_b so that ceil(B/block_b) is a multiple of 2 (the
    "parallel" batch axis is what shards across the two TensorCores).
    """
    B, cin, N = x_ncw.shape
    assert cin == 3
    (w1, s1, b1, w2, s2, b2, w3, s3, b3, w4, s4, b4, w5, s5, b5,
     wl1, s6, b6, wl2, bl2) = params
    emb = w5.shape[1]
    c_out = wl2.shape[1]
    c_pad = ((c_out + 127) // 128) * 128             # lane-dense output width

    # bf16 sublane packing is 16 rows: keeps the in-kernel pooling view
    # layout-free.
    assert block_b % 16 == 0
    if tile_n is None:
        tile_n = N if N <= 512 else 512
    assert N % tile_n == 0, "point count must be divisible by the point tile"
    n_pt = N // tile_n

    n_bb = pl.cdiv(B, block_b)
    b_pad = n_bb * block_b

    # --- fold BN scale into weights (f32) then cast matmul operands to bf16 --
    bf = lambda a: a.astype(jnp.bfloat16)
    w1f = bf(jnp.pad(w1 * s1, ((0, 5), (0, 0))))     # cin 3 -> 8 (aligned MXU K)
    w2f = bf(w2 * s2)
    w3f = bf(w3 * s3)
    w4f = bf(w4 * s4)
    w5f = bf(w5 * s5)
    wl1f = bf(wl1 * s6)
    wl2p = jnp.pad(bf(wl2), ((0, 0), (0, c_pad - c_out)))
    b1f, b2f, b3f, b4f, b5f, b6f = map(bf, (b1, b2, b3, b4, b5, b6))
    bl2p = jnp.pad(bl2, ((0, 0), (0, c_pad - c_out)))                # f32 bias

    # --- host-side layout: (n_bb, n_pt, tile_n*block_b, 8) bf16 --------------
    # Row order inside a block is (point-major, batch-minor), matching the
    # kernel's (tile_n, block_b, emb) pooling view.
    x = jnp.transpose(x_ncw, (0, 2, 1))                              # (B, N, 3)
    x = jnp.pad(x, ((0, b_pad - B), (0, 0), (0, 5)))                 # pad B, cin->8
    x = x.astype(jnp.bfloat16)
    x = x.reshape(n_bb, block_b, n_pt, tile_n, 8)
    x = jnp.transpose(x, (0, 2, 3, 1, 4))                            # (nbb,npt,tn,bb,8)
    x = x.reshape(n_bb, n_pt, tile_n * block_b, 8)

    weight_args = (w1f, b1f, w2f, b2f, w3f, b3f, w4f, b4f, w5f, b5f,
                   wl1f, b6f, wl2p, bl2p)
    full = lambda a: pl.BlockSpec(a.shape, lambda i, j: (0,) * a.ndim)
    in_specs = [pl.BlockSpec((None, None, tile_n * block_b, 8),
                             lambda i, j: (i, j, 0, 0))]
    in_specs += [full(a) for a in weight_args]

    out = pl.pallas_call(
        pointnet_kernel,
        out_shape=jax.ShapeDtypeStruct((b_pad, c_pad), jnp.float32),
        grid_spec=pltpu.PrefetchScalarGridSpec(
            num_scalar_prefetch=0,
            grid=(n_bb, n_pt),                       # batch blocks x point tiles
            in_specs=in_specs,
            out_specs=pl.BlockSpec((block_b, c_pad), lambda i, j: (i, 0)),
            scratch_shapes=[pltpu.VMEM((block_b, emb), jnp.bfloat16)],
        ),
        compiler_params=pltpu.CompilerParams(
            dimension_semantics=("parallel", "arbitrary"),
            # Safe under v7x's 64 MiB/core; raise toward ~96-112 MiB on
            # v5e/v6e if larger point tiles / block_b are wanted there.
            vmem_limit_bytes=48 * 1024 * 1024,
        ),
    )(x, *weight_args)

    return out[:B, :c_out]                           # (B, C_out)


# ----------------------------------------------------------------------------
# Deterministic parameter construction (synthetic, eval-mode BN as scale/shift)
# ----------------------------------------------------------------------------
def make_params(key, emb_dims, output_channels):
    def bn_fold(k, c):
        k1, k2, k3, k4 = jax.random.split(k, 4)
        gamma = 1.0 + 0.1 * jax.random.normal(k1, (1, c), jnp.float32)
        beta = 0.1 * jax.random.normal(k2, (1, c), jnp.float32)
        mean = 0.1 * jax.random.normal(k3, (1, c), jnp.float32)
        var = jnp.abs(jax.random.normal(k4, (1, c), jnp.float32)) + 0.5
        scale = gamma / jnp.sqrt(var + 1e-5)
        shift = beta - mean * scale
        return scale, shift

    ks = jax.random.split(key, 16)

    def w(k, ci, co):
        return jax.random.normal(k, (ci, co), jnp.float32) / jnp.sqrt(ci)

    w1 = w(ks[0], 3, 64);            s1, b1 = bn_fold(ks[1], 64)
    w2 = w(ks[2], 64, 64);           s2, b2 = bn_fold(ks[3], 64)
    w3 = w(ks[4], 64, 64);           s3, b3 = bn_fold(ks[5], 64)
    w4 = w(ks[6], 64, 128);          s4, b4 = bn_fold(ks[7], 128)
    w5 = w(ks[8], 128, emb_dims);    s5, b5 = bn_fold(ks[9], emb_dims)
    wl1 = w(ks[10], emb_dims, 512);  s6, b6 = bn_fold(ks[11], 512)
    wl2 = w(ks[12], 512, output_channels)
    bl2 = 0.1 * jax.random.normal(ks[13], (1, output_channels), jnp.float32)
    return (w1, s1, b1, w2, s2, b2, w3, s3, b3, w4, s4, b4, w5, s5, b5,
            wl1, s6, b6, wl2, bl2)


# ----------------------------------------------------------------------------
# Pure-JAX reference mirroring the kernel's folded-scale / bf16 semantics.
# ----------------------------------------------------------------------------
def pointnet_ref(x_ncw, params):
    (w1, s1, b1, w2, s2, b2, w3, s3, b3, w4, s4, b4, w5, s5, b5,
     wl1, s6, b6, wl2, bl2) = params
    B, _, N = x_ncw.shape
    emb = w5.shape[1]
    bf = lambda a: a.astype(jnp.bfloat16)

    h = bf(jnp.transpose(x_ncw, (0, 2, 1)).reshape(B * N, 3))
    for wmat, s, sh in ((w1, s1, b1), (w2, s2, b2), (w3, s3, b3),
                        (w4, s4, b4), (w5, s5, b5)):
        y = jnp.dot(h, bf(wmat * s), preferred_element_type=jnp.float32)
        h = jnp.maximum(bf(y) + bf(sh), 0)
    g = jnp.max(h.reshape(B, N, emb), axis=1)                      # (B, emb) bf16
    t = jnp.dot(g, bf(wl1 * s6), preferred_element_type=jnp.float32)
    t = jnp.maximum(bf(t) + bf(b6), 0)
    return jnp.dot(t, bf(wl2), preferred_element_type=jnp.float32) + bl2


if __name__ == "__main__":
    args = SimpleNamespace(emb_dims=128)             # small synthetic config
    B, N, C_OUT = 32, 128, 40
    BLOCK_B, TILE_N = 16, 64                         # grid = (2, 2): even batch
                                                     # blocks (v7x 2-TC) and an
                                                     # exercised point-tile loop

    key = jax.random.PRNGKey(0)
    kx, kp = jax.random.split(key)
    x = jax.random.normal(kx, (B, 3, N), jnp.float32)   # PyTorch NCW input
    params = make_params(kp, args.emb_dims, C_OUT)

    out = jax.block_until_ready(
        pointnet_forward(x, params, block_b=BLOCK_B, tile_n=TILE_N))
    ref = jax.block_until_ready(pointnet_ref(x, params))

    assert out.shape == (B, C_OUT), out.shape
    max_err = float(jnp.max(jnp.abs(out - ref)))
    assert jnp.allclose(out, ref, atol=1e-2, rtol=1e-2), max_err
    print("KERNEL_OK")
</pallas_src>

<mosaic_0001>
module attributes {stable_mosaic.version = 11 : i64} {
  func.func @pointnet_kernel(%arg0: i32, %arg1: i32, %arg2: memref<1x1x1024x8xbf16, #tpu.memory_space<vmem>>, %arg3: memref<8x64xbf16, #tpu.memory_space<vmem>>, %arg4: memref<1x64xbf16, #tpu.memory_space<vmem>>, %arg5: memref<64x64xbf16, #tpu.memory_space<vmem>>, %arg6: memref<1x64xbf16, #tpu.memory_space<vmem>>, %arg7: memref<64x64xbf16, #tpu.memory_space<vmem>>, %arg8: memref<1x64xbf16, #tpu.memory_space<vmem>>, %arg9: memref<64x128xbf16, #tpu.memory_space<vmem>>, %arg10: memref<1x128xbf16, #tpu.memory_space<vmem>>, %arg11: memref<128x128xbf16, #tpu.memory_space<vmem>>, %arg12: memref<1x128xbf16, #tpu.memory_space<vmem>>, %arg13: memref<128x512xbf16, #tpu.memory_space<vmem>>, %arg14: memref<1x512xbf16, #tpu.memory_space<vmem>>, %arg15: memref<512x128xbf16, #tpu.memory_space<vmem>>, %arg16: memref<1x128xf32, #tpu.memory_space<vmem>>, %arg17: memref<16x128xf32, #tpu.memory_space<vmem>>, %arg18: memref<16x128xbf16, #tpu.memory_space<vmem>>) attributes {dimension_semantics = [#tpu.dimension_semantics<parallel>, #tpu.dimension_semantics<arbitrary>], iteration_bounds = array<i64: 2, 2>, scalar_prefetch = 0 : i64, scratch_operands = 1 : i64, tpu.core_type = #tpu.core_type<tc>, window_params = [{transform_indices = @transform_0, window_bounds = array<i64: 1, 1, 1024, 8>}, {pipeline_mode = #tpu.pipeline_mode<synchronous>, transform_indices = @transform_1, window_bounds = array<i64: 8, 64>}, {pipeline_mode = #tpu.pipeline_mode<synchronous>, transform_indices = @transform_2, window_bounds = array<i64: 1, 64>}, {pipeline_mode = #tpu.pipeline_mode<synchronous>, transform_indices = @transform_3, window_bounds = array<i64: 64, 64>}, {pipeline_mode = #tpu.pipeline_mode<synchronous>, transform_indices = @transform_4, window_bounds = array<i64: 1, 64>}, {pipeline_mode = #tpu.pipeline_mode<synchronous>, transform_indices = @transform_5, window_bounds = array<i64: 64, 64>}, {pipeline_mode = #tpu.pipeline_mode<synchronous>, transform_indices = @transform_6, window_bounds = array<i64: 1, 64>}, {pipeline_mode = #tpu.pipeline_mode<synchronous>, transform_indices = @transform_7, window_bounds = array<i64: 64, 128>}, {pipeline_mode = #tpu.pipeline_mode<synchronous>, transform_indices = @transform_8, window_bounds = array<i64: 1, 128>}, {pipeline_mode = #tpu.pipeline_mode<synchronous>, transform_indices = @transform_9, window_bounds = array<i64: 128, 128>}, {pipeline_mode = #tpu.pipeline_mode<synchronous>, transform_indices = @transform_10, window_bounds = array<i64: 1, 128>}, {pipeline_mode = #tpu.pipeline_mode<synchronous>, transform_indices = @transform_11, window_bounds = array<i64: 128, 512>}, {pipeline_mode = #tpu.pipeline_mode<synchronous>, transform_indices = @transform_12, window_bounds = array<i64: 1, 512>}, {pipeline_mode = #tpu.pipeline_mode<synchronous>, transform_indices = @transform_13, window_bounds = array<i64: 512, 128>}, {pipeline_mode = #tpu.pipeline_mode<synchronous>, transform_indices = @transform_14, window_bounds = array<i64: 1, 128>}, {transform_indices = @transform_15, window_bounds = array<i64: 16, 128>}]} {
    %c0 = arith.constant 0 : index
    %c0_0 = arith.constant 0 : index
    %c0_1 = arith.constant 0 : index
    %c0_2 = arith.constant 0 : index
    %0 = vector.load %arg2[%c0, %c0_0, %c0_1, %c0_2] : memref<1x1x1024x8xbf16, #tpu.memory_space<vmem>>, vector<1x1x1024x8xbf16>
    %1 = vector.shape_cast %0 : vector<1x1x1024x8xbf16> to vector<1024x8xbf16>
    %c0_3 = arith.constant 0 : index
    %c0_4 = arith.constant 0 : index
    %2 = vector.load %arg3[%c0_3, %c0_4] : memref<8x64xbf16, #tpu.memory_space<vmem>>, vector<8x64xbf16>
    %cst = arith.constant dense<0.000000e+00> : vector<1024x64xf32>
    %3 = tpu.matmul %1, %2, %cst {dimension_numbers = #tpu.dot_dimension_numbers<[1], [0], [0], [1], [0, 0, 1, 1], [], []>} : vector<1024x8xbf16>, vector<8x64xbf16>, vector<1024x64xf32> -> vector<1024x64xf32>
    %4 = arith.truncf %3 : vector<1024x64xf32> to vector<1024x64xbf16>
    %c0_5 = arith.constant 0 : index
    %c0_6 = arith.constant 0 : index
    %5 = vector.load %arg4[%c0_5, %c0_6] : memref<1x64xbf16, #tpu.memory_space<vmem>>, vector<1x64xbf16>
    %6 = vector.broadcast %5 : vector<1x64xbf16> to vector<1024x64xbf16>
    %7 = arith.addf %4, %6 : vector<1024x64xbf16>
    %cst_7 = arith.constant 0.000000e+00 : bf16
    %8 = vector.broadcast %cst_7 : bf16 to vector<1024x64xbf16>
    %9 = arith.maximumf %7, %8 : vector<1024x64xbf16>
    %c0_8 = arith.constant 0 : index
    %c0_9 = arith.constant 0 : index
    %10 = vector.load %arg5[%c0_8, %c0_9] : memref<64x64xbf16, #tpu.memory_space<vmem>>, vector<64x64xbf16>
    %cst_10 = arith.constant dense<0.000000e+00> : vector<1024x64xf32>
    %11 = tpu.matmul %9, %10, %cst_10 {dimension_numbers = #tpu.dot_dimension_numbers<[1], [0], [0], [1], [0, 0, 1, 1], [], []>} : vector<1024x64xbf16>, vector<64x64xbf16>, vector<1024x64xf32> -> vector<1024x64xf32>
    %12 = arith.truncf %11 : vector<1024x64xf32> to vector<1024x64xbf16>
    %c0_11 = arith.constant 0 : index
    %c0_12 = arith.constant 0 : index
    %13 = vector.load %arg6[%c0_11, %c0_12] : memref<1x64xbf16, #tpu.memory_space<vmem>>, vector<1x64xbf16>
    %14 = vector.broadcast %13 : vector<1x64xbf16> to vector<1024x64xbf16>
    %15 = arith.addf %12, %14 : vector<1024x64xbf16>
    %cst_13 = arith.constant 0.000000e+00 : bf16
    %16 = vector.broadcast %cst_13 : bf16 to vector<1024x64xbf16>
    %17 = arith.maximumf %15, %16 : vector<1024x64xbf16>
    %c0_14 = arith.constant 0 : index
    %c0_15 = arith.constant 0 : index
    %18 = vector.load %arg7[%c0_14, %c0_15] : memref<64x64xbf16, #tpu.memory_space<vmem>>, vector<64x64xbf16>
    %cst_16 = arith.constant dense<0.000000e+00> : vector<1024x64xf32>
    %19 = tpu.matmul %17, %18, %cst_16 {dimension_numbers = #tpu.dot_dimension_numbers<[1], [0], [0], [1], [0, 0, 1, 1], [], []>} : vector<1024x64xbf16>, vector<64x64xbf16>, vector<1024x64xf32> -> vector<1024x64xf32>
    %20 = arith.truncf %19 : vector<1024x64xf32> to vector<1024x64xbf16>
    %c0_17 = arith.constant 0 : index
    %c0_18 = arith.constant 0 : index
    %21 = vector.load %arg8[%c0_17, %c0_18] : memref<1x64xbf16, #tpu.memory_space<vmem>>, vector<1x64xbf16>
    %22 = vector.broadcast %21 : vector<1x64xbf16> to vector<1024x64xbf16>
    %23 = arith.addf %20, %22 : vector<1024x64xbf16>
    %cst_19 = arith.constant 0.000000e+00 : bf16
    %24 = vector.broadcast %cst_19 : bf16 to vector<1024x64xbf16>
    %25 = arith.maximumf %23, %24 : vector<1024x64xbf16>
    %c0_20 = arith.constant 0 : index
    %c0_21 = arith.constant 0 : index
    %26 = vector.load %arg9[%c0_20, %c0_21] : memref<64x128xbf16, #tpu.memory_space<vmem>>, vector<64x128xbf16>
    %cst_22 = arith.constant dense<0.000000e+00> : vector<1024x128xf32>
    %27 = tpu.matmul %25, %26, %cst_22 {dimension_numbers = #tpu.dot_dimension_numbers<[1], [0], [0], [1], [0, 0, 1, 1], [], []>} : vector<1024x64xbf16>, vector<64x128xbf16>, vector<1024x128xf32> -> vector<1024x128xf32>
    %28 = arith.truncf %27 : vector<1024x128xf32> to vector<1024x128xbf16>
    %c0_23 = arith.constant 0 : index
    %c0_24 = arith.constant 0 : index
    %29 = vector.load %arg10[%c0_23, %c0_24] : memref<1x128xbf16, #tpu.memory_space<vmem>>, vector<1x128xbf16>
    %30 = vector.broadcast %29 : vector<1x128xbf16> to vector<1024x128xbf16>
    %31 = arith.addf %28, %30 : vector<1024x128xbf16>
    %cst_25 = arith.constant 0.000000e+00 : bf16
    %32 = vector.broadcast %cst_25 : bf16 to vector<1024x128xbf16>
    %33 = arith.maximumf %31, %32 : vector<1024x128xbf16>
    %c0_26 = arith.constant 0 : index
    %c0_27 = arith.constant 0 : index
    %34 = vector.load %arg11[%c0_26, %c0_27] : memref<128x128xbf16, #tpu.memory_space<vmem>>, vector<128x128xbf16>
    %cst_28 = arith.constant dense<0.000000e+00> : vector<1024x128xf32>
    %35 = tpu.matmul %33, %34, %cst_28 {dimension_numbers = #tpu.dot_dimension_numbers<[1], [0], [0], [1], [0, 0, 1, 1], [], []>} : vector<1024x128xbf16>, vector<128x128xbf16>, vector<1024x128xf32> -> vector<1024x128xf32>
    %36 = arith.truncf %35 : vector<1024x128xf32> to vector<1024x128xbf16>
    %c0_29 = arith.constant 0 : index
    %c0_30 = arith.constant 0 : index
    %37 = vector.load %arg12[%c0_29, %c0_30] : memref<1x128xbf16, #tpu.memory_space<vmem>>, vector<1x128xbf16>
    %38 = vector.broadcast %37 : vector<1x128xbf16> to vector<1024x128xbf16>
    %39 = arith.addf %36, %38 : vector<1024x128xbf16>
    %cst_31 = arith.constant 0.000000e+00 : bf16
    %40 = vector.broadcast %cst_31 : bf16 to vector<1024x128xbf16>
    %41 = arith.maximumf %39, %40 : vector<1024x128xbf16>
    %42 = vector.shape_cast %41 : vector<1024x128xbf16> to vector<64x16x128xbf16>
    %cst_32 = arith.constant dense<0xFF80> : vector<16x128xbf16>
    %43 = vector.multi_reduction <maximumf>, %42, %cst_32 [0] : vector<64x16x128xbf16> to vector<16x128xbf16>
    %c0_i32 = arith.constant 0 : i32
    %44 = arith.cmpi eq, %arg1, %c0_i32 : i32
    %45 = arith.extui %44 : i1 to i32
    %c0_i32_33 = arith.constant 0 : i32
    %46 = arith.cmpi ne, %45, %c0_i32_33 : i32
    scf.if %46 {
      %c0_37 = arith.constant 0 : index
      %c0_38 = arith.constant 0 : index
      %53 = vector.load %arg18[%c0_37, %c0_38] : memref<16x128xbf16, #tpu.memory_space<vmem>>, vector<16x128xbf16>
      tpu.vector_store %arg18[%c0_37, %c0_38], %43 {strides = array<i32>} : memref<16x128xbf16, #tpu.memory_space<vmem>>, vector<16x128xbf16>,
    } else {
    }
    %c0_i32_34 = arith.constant 0 : i32
    %47 = arith.cmpi sgt, %arg1, %c0_i32_34 : i32
    %48 = arith.extui %47 : i1 to i32
    %c0_i32_35 = arith.constant 0 : i32
    %49 = arith.cmpi ne, %48, %c0_i32_35 : i32
    scf.if %49 {
      %c0_37 = arith.constant 0 : index
      %c0_38 = arith.constant 0 : index
      %53 = vector.load %arg18[%c0_37, %c0_38] : memref<16x128xbf16, #tpu.memory_space<vmem>>, vector<16x128xbf16>
      %54 = arith.maximumf %53, %43 : vector<16x128xbf16>
      %c0_39 = arith.constant 0 : index
      %c0_40 = arith.constant 0 : index
      %55 = vector.load %arg18[%c0_39, %c0_40] : memref<16x128xbf16, #tpu.memory_space<vmem>>, vector<16x128xbf16>
      tpu.vector_store %arg18[%c0_39, %c0_40], %54 {strides = array<i32>} : memref<16x128xbf16, #tpu.memory_space<vmem>>, vector<16x128xbf16>,
    } else {
    }
    %c1_i32 = arith.constant 1 : i32
    %50 = arith.cmpi eq, %arg1, %c1_i32 : i32
    %51 = arith.extui %50 : i1 to i32
    %c0_i32_36 = arith.constant 0 : i32
    %52 = arith.cmpi ne, %51, %c0_i32_36 : i32
    scf.if %52 {
      %c0_37 = arith.constant 0 : index
      %c0_38 = arith.constant 0 : index
      %53 = vector.load %arg18[%c0_37, %c0_38] : memref<16x128xbf16, #tpu.memory_space<vmem>>, vector<16x128xbf16>
      %c0_39 = arith.constant 0 : index
      %c0_40 = arith.constant 0 : index
      %54 = vector.load %arg13[%c0_39, %c0_40] : memref<128x512xbf16, #tpu.memory_space<vmem>>, vector<128x512xbf16>
      %cst_41 = arith.constant dense<0.000000e+00> : vector<16x512xf32>
      %55 = tpu.matmul %53, %54, %cst_41 {dimension_numbers = #tpu.dot_dimension_numbers<[1], [0], [0], [1], [0, 0, 1, 1], [], []>} : vector<16x128xbf16>, vector<128x512xbf16>, vector<16x512xf32> -> vector<16x512xf32>
      %56 = arith.truncf %55 : vector<16x512xf32> to vector<16x512xbf16>
      %c0_42 = arith.constant 0 : index
      %c0_43 = arith.constant 0 : index
      %57 = vector.load %arg14[%c0_42, %c0_43] : memref<1x512xbf16, #tpu.memory_space<vmem>>, vector<1x512xbf16>
      %58 = vector.broadcast %57 : vector<1x512xbf16> to vector<16x512xbf16>
      %59 = arith.addf %56, %58 : vector<16x512xbf16>
      %cst_44 = arith.constant 0.000000e+00 : bf16
      %60 = vector.broadcast %cst_44 : bf16 to vector<16x512xbf16>
      %61 = arith.maximumf %59, %60 : vector<16x512xbf16>
      %c0_45 = arith.constant 0 : index
      %c0_46 = arith.constant 0 : index
      %62 = vector.load %arg15[%c0_45, %c0_46] : memref<512x128xbf16, #tpu.memory_space<vmem>>, vector<512x128xbf16>
      %cst_47 = arith.constant dense<0.000000e+00> : vector<16x128xf32>
      %63 = tpu.matmul %61, %62, %cst_47 {dimension_numbers = #tpu.dot_dimension_numbers<[1], [0], [0], [1], [0, 0, 1, 1], [], []>} : vector<16x512xbf16>, vector<512x128xbf16>, vector<16x128xf32> -> vector<16x128xf32>
      %c0_48 = arith.constant 0 : index
      %c0_49 = arith.constant 0 : index
      %64 = vector.load %arg16[%c0_48, %c0_49] : memref<1x128xf32, #tpu.memory_space<vmem>>, vector<1x128xf32>
      %65 = vector.broadcast %64 : vector<1x128xf32> to vector<16x128xf32>
      %66 = arith.addf %63, %65 : vector<16x128xf32>
      %c0_50 = arith.constant 0 : index
      %c0_51 = arith.constant 0 : index
      %67 = vector.load %arg17[%c0_50, %c0_51] : memref<16x128xf32, #tpu.memory_space<vmem>>, vector<16x128xf32>
      tpu.vector_store %arg17[%c0_50, %c0_51], %66 {strides = array<i32>} : memref<16x128xf32, #tpu.memory_space<vmem>>, vector<16x128xf32>,
    } else {
    }
    return
  }
  func.func @transform_0(%arg0: i32, %arg1: i32) -> (i32, i32, i32, i32) {
    %c0_i32 = arith.constant 0 : i32
    %c0_i32_0 = arith.constant 0 : i32
    %c0_i32_1 = arith.constant 0 : i32
    return %arg0, %arg1, %c0_i32, %c0_i32_0 : i32, i32, i32, i32
  }
  func.func @transform_1(%arg0: i32, %arg1: i32) -> (i32, i32) {
    %c0_i32 = arith.constant 0 : i32
    %c0_i32_0 = arith.constant 0 : i32
    %c0_i32_1 = arith.constant 0 : i32
    return %c0_i32, %c0_i32_0 : i32, i32
  }
  func.func @transform_2(%arg0: i32, %arg1: i32) -> (i32, i32) {
    %c0_i32 = arith.constant 0 : i32
    %c0_i32_0 = arith.constant 0 : i32
    %c0_i32_1 = arith.constant 0 : i32
    return %c0_i32, %c0_i32_0 : i32, i32
  }
  func.func @transform_3(%arg0: i32, %arg1: i32) -> (i32, i32) {
    %c0_i32 = arith.constant 0 : i32
    %c0_i32_0 = arith.constant 0 : i32
    %c0_i32_1 = arith.constant 0 : i32
    return %c0_i32, %c0_i32_0 : i32, i32
  }
  func.func @transform_4(%arg0: i32, %arg1: i32) -> (i32, i32) {
    %c0_i32 = arith.constant 0 : i32
    %c0_i32_0 = arith.constant 0 : i32
    %c0_i32_1 = arith.constant 0 : i32
    return %c0_i32, %c0_i32_0 : i32, i32
  }
  func.func @transform_5(%arg0: i32, %arg1: i32) -> (i32, i32) {
    %c0_i32 = arith.constant 0 : i32
    %c0_i32_0 = arith.constant 0 : i32
    %c0_i32_1 = arith.constant 0 : i32
    return %c0_i32, %c0_i32_0 : i32, i32
  }
  func.func @transform_6(%arg0: i32, %arg1: i32) -> (i32, i32) {
    %c0_i32 = arith.constant 0 : i32
    %c0_i32_0 = arith.constant 0 : i32
    %c0_i32_1 = arith.constant 0 : i32
    return %c0_i32, %c0_i32_0 : i32, i32
  }
  func.func @transform_7(%arg0: i32, %arg1: i32) -> (i32, i32) {
    %c0_i32 = arith.constant 0 : i32
    %c0_i32_0 = arith.constant 0 : i32
    %c0_i32_1 = arith.constant 0 : i32
    return %c0_i32, %c0_i32_0 : i32, i32
  }
  func.func @transform_8(%arg0: i32, %arg1: i32) -> (i32, i32) {
    %c0_i32 = arith.constant 0 : i32
    %c0_i32_0 = arith.constant 0 : i32
    %c0_i32_1 = arith.constant 0 : i32
    return %c0_i32, %c0_i32_0 : i32, i32
  }
  func.func @transform_9(%arg0: i32, %arg1: i32) -> (i32, i32) {
    %c0_i32 = arith.constant 0 : i32
    %c0_i32_0 = arith.constant 0 : i32
    %c0_i32_1 = arith.constant 0 : i32
    return %c0_i32, %c0_i32_0 : i32, i32
  }
  func.func @transform_10(%arg0: i32, %arg1: i32) -> (i32, i32) {
    %c0_i32 = arith.constant 0 : i32
    %c0_i32_0 = arith.constant 0 : i32
    %c0_i32_1 = arith.constant 0 : i32
    return %c0_i32, %c0_i32_0 : i32, i32
  }
  func.func @transform_11(%arg0: i32, %arg1: i32) -> (i32, i32) {
    %c0_i32 = arith.constant 0 : i32
    %c0_i32_0 = arith.constant 0 : i32
    %c0_i32_1 = arith.constant 0 : i32
    return %c0_i32, %c0_i32_0 : i32, i32
  }
  func.func @transform_12(%arg0: i32, %arg1: i32) -> (i32, i32) {
    %c0_i32 = arith.constant 0 : i32
    %c0_i32_0 = arith.constant 0 : i32
    %c0_i32_1 = arith.constant 0 : i32
    return %c0_i32, %c0_i32_0 : i32, i32
  }
  func.func @transform_13(%arg0: i32, %arg1: i32) -> (i32, i32) {
    %c0_i32 = arith.constant 0 : i32
    %c0_i32_0 = arith.constant 0 : i32
    %c0_i32_1 = arith.constant 0 : i32
    return %c0_i32, %c0_i32_0 : i32, i32
  }
  func.func @transform_14(%arg0: i32, %arg1: i32) -> (i32, i32) {
    %c0_i32 = arith.constant 0 : i32
    %c0_i32_0 = arith.constant 0 : i32
    %c0_i32_1 = arith.constant 0 : i32
    return %c0_i32, %c0_i32_0 : i32, i32
  }
  func.func @transform_15(%arg0: i32, %arg1: i32) -> (i32, i32) {
    %c0_i32 = arith.constant 0 : i32
    %c0_i32_0 = arith.constant 0 : i32
    return %arg0, %c0_i32 : i32, i32
  }
}

</mosaic_0001>

<bundles_post_ra>
// kernel: tpu_custom_call.1
= control target key start
LH: loop header
LB: loop body
LE: loop exit
PB: predicated region body
PF: predicated region fallthrough
CT: control target
= control target key end

     0   :  { %s10078_s0 = inlined_call_operand.vmem [shape: bf16[2,2,1024,8], index: 0, kind: input, shape index: {}]   ;;  %s10079_s1 = inlined_call_operand.vmem [shape: bf16[8,64], index: 1, kind: input, shape index: {}]   ;;  %s10080_s2 = inlined_call_operand.vmem [shape: bf16[1,64], index: 2, kind: input, shape index: {}]   ;;  %s10081_s3 = inlined_call_operand.vmem [shape: bf16[64,64], index: 3, kind: input, shape index: {}]   ;;  %s10082_s4 = inlined_call_operand.vmem [shape: bf16[1,64], index: 4, kind: input, shape index: {}]   ;;  %s10083_s5 = inlined_call_operand.vmem [shape: bf16[64,64], index: 5, kind: input, shape index: {}]   ;;  %s10084_s6 = inlined_call_operand.vmem [shape: bf16[1,64], index: 6, kind: input, shape index: {}]   ;;  %s10085_s7 = inlined_call_operand.vmem [shape: bf16[64,128], index: 7, kind: input, shape index: {}]   ;;  %s10086_s8 = inlined_call_operand.vmem [shape: bf16[1,128], index: 8, kind: input, shape index: {}]   ;;  %s10087_s9 = inlined_call_operand.vmem [shape: bf16[128,128], index: 9, kind: input, shape index: {}]   ;;  %s10088_s10 = inlined_call_operand.vmem [shape: bf16[1,128], index: 10, kind: input, shape index: {}]   ;;  %s10089_s11 = inlined_call_operand.vmem [shape: bf16[128,512], index: 11, kind: input, shape index: {}]   ;;  %s10090_s12 = inlined_call_operand.vmem [shape: bf16[1,512], index: 12, kind: input, shape index: {}]   ;;  %s10091_s13 = inlined_call_operand.vmem [shape: bf16[512,128], index: 13, kind: input, shape index: {}]   ;;  %s10092_s14 = inlined_call_operand.vmem [shape: f32[1,128], index: 14, kind: input, shape index: {}]   ;;  %s10093_s15 = inlined_call_operand.hbm [shape: f32[32,128], index: 15, kind: output, shape index: {}]  }
   0x1   :  { %10103 = sst [smem:[#allocation15_spill]] %s10079_s1 }
   0x2   :  { %20 = vsyncpa [#allocation4], 0 }
   0x3   :  { %22 = vsyncpa [#allocation4 + $0x1], 0  ;;  %s8448_s18 = smov 0   ;;  %s8450_s19 = smov 0  }
   0x4   :  { %s8452_s20 = smov 0   ;;  %s8454_s21 = smov 0  }
   0x5   :  { %s8456_s22 = smov 0   ;;  %s8458_s23 = smov 0  }
   0x6   :  { %s8460_s24 = smov 0   ;;  %s8462_s25 = smov 0  }
   0x7 LB: > { %10104 = sst [smem:[#allocation6_spill]] %s8332_s18  ;;  %s6521_s26 = sadd.s32 4294967295, %s8360_s25   ;;  %s8360_s25 = sphi %s8462_s25, %s28_s25   ;;  %s8356_s24 = sphi %s8460_s24, %s10125_s24   ;;  %s8352_s23 = sphi %s8458_s23, %s10124_s23   ;;  %s8348_s22 = sphi %s8456_s22, %s10123_s22   ;;  %s8344_s21 = sphi %s8454_s21, %s10122_s21   ;;  %s8340_s20 = sphi %s8452_s20, %s10121_s20   ;;  %s8336_s19 = sphi %s8450_s19, %s10127_s19   ;;  %s8332_s18 = sphi %s8448_s18, %s10126_s18  }
   0x8   : > { %10105 = sst [smem:[#allocation7_spill]] %s8340_s20  ;;  %s6522_s27 = sadd.s32 4294967294, %s8360_s25  }
   0x9   : > { %10106 = sst [smem:[#allocation8_spill]] %s8352_s23  ;;  %s37_s28 = sadd.s32 1, %s8352_s23 }
   0xa   : > { %10107 = sst [smem:[#allocation9_spill]] %s8356_s24  ;;  %p38_p0 = scmp.ge.s32.totalorder %s37_s28, 2 }
   0xb   : > { %10108 = sst [smem:[#allocation10_spill]] %s8360_s25  ;;  %s40_s29 = sadd.s32 1, %s8356_s24 }
   0xc   : > { %p379_p1 = scmp.ne.s32.totalorder %s8340_s20, %s8336_s19  ;;  %p380_p2 = scmp.eq.s32.totalorder %s6521_s26, 3 }
   0xd   : > { %s10129_s28 = smov (%p38_p0, %s37_s28), 0  ;;  %s10131_s29 = smov (!%p38_p0, %s40_s29), %s8356_s24 }
   0xe   : > { %10109 = sst [smem:[#allocation11_spill]] %s10129_s28  ;;  %p8497_p3 = por %p380_p2, %p379_p1 }
   0xf   : > { %p385_p4 = scmp.ne.s32.totalorder %s8336_s19, %s8332_s18  ;;  %p42_p5 = scmp.ge.s32.totalorder %s10131_s29, 2 }
  0x10   : > { %p386_p6 = scmp.eq.s32.totalorder %s6522_s27, 3  ;;  %p6525_p7 = scmp.ge.s32.totalorder %s8360_s25, 1 }
  0x11   : > { %p458_p8 = scmp.lt.s32.totalorder %s8360_s25, 5  ;;  %s10133_s29 = smov (%p42_p5, %s10131_s29), 0 }
  0x12   : > { %10111 = sst [smem:[#allocation12_spill]] %s10133_s29  ;;  %p8507_p9 = por %p386_p6, %p385_p4 }
  0x13   : > { %p459_p10 = pnand %p6525_p7, %p458_p8  ;;  %s366_s17 = ssub.s32 %s8356_s24, %s10133_s29 }
  0x14   : > { %s10112_s16 = scalar_select %p8507_p9, 1, 0 }
  0x15   : > { %s369_s26 = sadd.s32 1, %s8340_s20  ;;  %p367_p11 = scmp.eq.s32.totalorder %s366_s17, 0 }
  0x16   : > { %10113 = sst [smem:[#allocation13_spill]] %s10112_s16  ;;  %462 = sbr.rel (%p459_p10) target bundleno = 1814 (0x716), region = 80 }
  0x17   : > { %s8515_s28 = scalar_select %p367_p11, %s8340_s20, %s369_s26  }
  0x18   : > { %s10099_s27 = sand.u32 (!%p459_p10), 1, %s8336_s19   ;;  %s10115_s1 = sld [smem:[#allocation15_spill]] (!%p459_p10) }
  0x19   : > { %10114 = sst [smem:[#allocation14_spill]] %s8515_s28  ;;  %p510_p12 = scmp.lt.s32.totalorder (!%p459_p10), %s8348_s22, 1 }
  0x1a   : > { %s8524_s29 = sshll.u32 (!%p459_p10), %s10099_s27, 4  ;;  %p512_p13 = scmp.lt.s32.totalorder (!%p459_p10), %s8344_s21, 1 }
  0x1b   : > { %vm1163_vm0 = vcmask 1043456   ;;  %v8125_v2 = vld [vmem:[%s10081_s3 + $0x18] sm:$0xff]   ;;  %s511_s24 = scalar_select %p510_p12, %s8348_s22, 1  ;;  %vm970_vm1 = vcmask 64512   ;;  %v8142_v11 = vld [vmem:[%s10081_s3 + $0x10] sm:$0xff]   ;;  %v8155_v16 = vld [vmem:[%s10081_s3 + $0x8] sm:$0xff]  }
  0x1c   : > { %s513_s28 = scalar_select %p512_p13, %s8344_s21, 1  ;;  %v8164_v19 = vld [vmem:[%s10081_s3] sm:$0xff]   ;;  %vm1944_vm2 = vcmask 523264  }
  0x1d   : > { %s6528_s18 = sshll.u32 %s511_s24, 8  ;;  %s9800_s16 = scalar_lea.vmem [#allocation3], %s8524_s29 }
  0x1e   : > { %v649_v0 = vld [vmem:[%s10115_s1] sm:$0xf]  ;;  %s6527_s23 = sshll.u32 %s513_s28, 7  ;;  %p6870_p0 = scmp.ne.s32.totalorder %s8344_s21, 0 }
  0x1f   : > { %8025 = vmatprep.subr.msk.bf16.mxu0 %vm1163_vm0, %v649_v0  ;;  %v1165_v1 = vsel %vm1163_vm0, %v649_v0, 0  ;;  %8026 = vmatprep.subr.msk.bf16.mxu1 %vm1163_vm0, %v649_v0  ;;  %s516_s1 = sadd.s32 %s6528_s18, %s6527_s23 }
  0x20   : > { %7342 = vmatpush3.bf16.msra.mxu0 %v1165_v1  ;;  %8024 = vmatpush3.bf16.msra.mxu1 %v1165_v1  ;;  %s6529_s20 = sshll.u32 %s516_s1, 2 }
  0x21   : > { %7471 = vmatprep.subr.bf16.mxu1 %v8125_v2  ;;  %s8535_s25 = scalar_lea.vmem %s10078_s0, %s6529_s20 }
  0x22   : > { %v8103_v3 = vld [vmem:[%s8535_s25] sm:$0xff]   ;;  %v8104_v4 = vld [vmem:[%s8535_s25 + $0x8] sm:$0xff]   ;;  %v8105_v5 = vld [vmem:[%s8535_s25 + $0x10] sm:$0xff]  }
  0x23   : > { %7343 = vmatprep.mubr.msk.bf16.mxu0 %vm970_vm1, %v8103_v3  ;;  %v8106_v6 = vld [vmem:[%s8535_s25 + $0x18] sm:$0xff]   ;;  %v8107_v7 = vld [vmem:[%s8535_s25 + $0x20] sm:$0xff]   ;;  %v8108_v8 = vld [vmem:[%s8535_s25 + $0x28] sm:$0xff]  }
  0x24   : > { %7344 = vmatmul.mubr.msk.bf16.vlgmr.msra.gmra.mxu0 %vm970_vm1, %v8104_v4  ;;  %v8109_v9 = vld [vmem:[%s8535_s25 + $0x30] sm:$0xff]   ;;  %v8122_v10 = vld [vmem:[%s8535_s25 + $0x100] sm:$0xff]   ;;  %v8124_v12 = vld [vmem:[%s8535_s25 + $0x108] sm:$0xff]  }
  0x25   : > { %7347 = vmatprep.mubr.msk.bf16.mxu0 %vm970_vm1, %v8105_v5  ;;  %7407 = vmatprep.mubr.msk.bf16.mxu1 %vm970_vm1, %v8122_v10  ;;  %v8110_v13 = vld [vmem:[%s8535_s25 + $0x38] sm:$0xff]   ;;  %v8127_v14 = vld [vmem:[%s8535_s25 + $0x110] sm:$0xff]   ;;  %v8111_v15 = vld [vmem:[%s8535_s25 + $0x40] sm:$0xff]  }
  0x26   : > { %7408 = vmatmul.mubr.msk.bf16.vlgmr.msra.gmra.mxu1 %vm970_vm1, %v8124_v12  ;;  %v8129_v17 = vld [vmem:[%s8535_s25 + $0x118] sm:$0xff]   ;;  %v8131_v18 = vld [vmem:[%s8535_s25 + $0x120] sm:$0xff]   ;;  %v8112_v20 = vld [vmem:[%s8535_s25 + $0x48] sm:$0xff]  }
  0x27   : > { %7472 = vmatpush3.bf16.msra.mxu1 %v8125_v2  ;;  %7411 = vmatprep.mubr.msk.bf16.mxu1 %vm970_vm1, %v8127_v14  ;;  %v8113_v21 = vld [vmem:[%s8535_s25 + $0x50] sm:$0xff]   ;;  %v8133_v22 = vld [vmem:[%s8535_s25 + $0x128] sm:$0xff]   ;;  %v8114_v24 = vld [vmem:[%s8535_s25 + $0x58] sm:$0xff]  }
  0x28   : > { %7473 = vmatprep.subr.bf16.mxu1 %v8142_v11  ;;  %v8135_v23 = vld [vmem:[%s8535_s25 + $0x130] sm:$0xff]   ;;  %v8115_v25 = vld [vmem:[%s8535_s25 + $0x60] sm:$0xff]   ;;  %v8137_v26 = vld [vmem:[%s8535_s25 + $0x138] sm:$0xff]  }
  0x29   : > { %v8139_v27 = vld [vmem:[%s8535_s25 + $0x140] sm:$0xff]   ;;  %v8116_v28 = vld [vmem:[%s8535_s25 + $0x68] sm:$0xff]   ;;  %v8117_v29 = vld [vmem:[%s8535_s25 + $0x70] sm:$0xff]  }
  0x2a   : > { %v8141_v30 = vld [vmem:[%s8535_s25 + $0x148] sm:$0xff]   ;;  %v8144_v31 = vld [vmem:[%s8535_s25 + $0x150] sm:$0xff]   ;;  %v8118_v32 = vld [vmem:[%s8535_s25 + $0x78] sm:$0xff]  }
  0x2b   : > { %7474 = vmatpush3.bf16.msra.mxu1 %v8142_v11  ;;  %v8119_v33 = vld [vmem:[%s8535_s25 + $0x80] sm:$0xff]   ;;  %v8146_v34 = vld [vmem:[%s8535_s25 + $0x158] sm:$0xff]   ;;  %v8120_v36 = vld [vmem:[%s8535_s25 + $0x88] sm:$0xff]  }
  0x2c   : > { %7348 = vmatmul.mubr.msk.bf16.gmra.mxu0 %vm970_vm1, %v8106_v6  ;;  %7475 = vmatprep.subr.bf16.mxu1 %v8155_v16  ;;  %v8148_v35 = vld [vmem:[%s8535_s25 + $0x160] sm:$0xff]   ;;  %v8121_v37 = vld [vmem:[%s8535_s25 + $0x90] sm:$0xff]   ;;  %v8150_v38 = vld [vmem:[%s8535_s25 + $0x168] sm:$0xff]  }
  0x2d   : > { %7351 = vmatprep.mubr.msk.bf16.mxu0 %vm970_vm1, %v8107_v7  ;;  %v8151_v39 = vld [vmem:[%s8535_s25 + $0x170] sm:$0xff]   ;;  %v8123_v40 = vld [vmem:[%s8535_s25 + $0x98] sm:$0xff]   ;;  %v8126_v41 = vld [vmem:[%s8535_s25 + $0xa0] sm:$0xff]   ;;  %v1780_v7 = vlaneseq }
  0x2e   : > { %7412 = vmatmul.mubr.msk.bf16.gmra.mxu1 %vm970_vm1, %v8129_v17  ;;  %v8152_v42 = vld [vmem:[%s8535_s25 + $0x178] sm:$0xff]   ;;  %v8153_v43 = vld [vmem:[%s8535_s25 + $0x180] sm:$0xff]   ;;  %v8128_v44 = vld [vmem:[%s8535_s25 + $0xa8] sm:$0xff]  }
  0x2f   : > { %7415 = vmatprep.mubr.msk.bf16.mxu1 %vm970_vm1, %v8131_v18  ;;  %7476 = vmatpush3.bf16.msra.mxu1 %v8155_v16  ;;  %v8130_v45 = vld [vmem:[%s8535_s25 + $0xb0] sm:$0xff]   ;;  %v8154_v46 = vld [vmem:[%s8535_s25 + $0x188] sm:$0xff]   ;;  %v8132_v48 = vld [vmem:[%s8535_s25 + $0xb8] sm:$0xff]  }
  0x30   : > { %7477 = vmatprep.subr.bf16.mxu1 %v8164_v19  ;;  %v8156_v47 = vld [vmem:[%s8535_s25 + $0x190] sm:$0xff]   ;;  %v8134_v49 = vld [vmem:[%s8535_s25 + $0xc0] sm:$0xff]   ;;  %v8157_v50 = vld [vmem:[%s8535_s25 + $0x198] sm:$0xff]  }
  0x31   : > { %v8158_v51 = vld [vmem:[%s8535_s25 + $0x1a0] sm:$0xff]   ;;  %v8136_v52 = vld [vmem:[%s8535_s25 + $0xc8] sm:$0xff]   ;;  %v8138_v53 = vld [vmem:[%s8535_s25 + $0xd0] sm:$0xff]  }
  0x32   : > { %v8159_v54 = vld [vmem:[%s8535_s25 + $0x1a8] sm:$0xff]   ;;  %v8160_v55 = vld [vmem:[%s8535_s25 + $0x1b0] sm:$0xff]   ;;  %v8140_v56 = vld [vmem:[%s8535_s25 + $0xd8] sm:$0xff]  }
  0x33   : > { %7478 = vmatpush3.bf16.msra.mxu1 %v8164_v19  ;;  %v8143_v57 = vld [vmem:[%s8535_s25 + $0xe0] sm:$0xff]   ;;  %v8161_v58 = vld [vmem:[%s8535_s25 + $0x1b8] sm:$0xff]   ;;  %v8145_v60 = vld [vmem:[%s8535_s25 + $0xe8] sm:$0xff]  }
  0x34   : > { %7352 = vmatmul.mubr.msk.bf16.gmra.mxu0 %vm970_vm1, %v8108_v8  ;;  %v8162_v59 = vld [vmem:[%s8535_s25 + $0x1c0] sm:$0xff]   ;;  %v8147_v61 = vld [vmem:[%s8535_s25 + $0xf0] sm:$0xff]   ;;  %v8163_v62 = vld [vmem:[%s8535_s25 + $0x1c8] sm:$0xff]  }
  0x35   : > { %7355 = vmatprep.mubr.msk.bf16.mxu0 %vm970_vm1, %v8109_v9  ;;  %v8165_v63 = vld [vmem:[%s8535_s25 + $0x1d0] sm:$0xff]   ;;  %v8149_v0 = vld [vmem:[%s8535_s25 + $0xf8] sm:$0xff]   ;;  %v8167_v2 = vld [vmem:[%s8535_s25 + $0x1e0] sm:$0xff]   ;;  %v8680_v9 = vshrl.u32 %v1780_v7, 7 }
  0x36   : > { %7416 = vmatmul.mubr.msk.bf16.gmra.mxu1 %vm970_vm1, %v8133_v22  ;;  %v8166_v1 = vld [vmem:[%s8535_s25 + $0x1d8] sm:$0xff]   ;;  %v8168_v3 = vld [vmem:[%s8535_s25 + $0x1e8] sm:$0xff]   ;;  %v8169_v4 = vld [vmem:[%s8535_s25 + $0x1f0] sm:$0xff]  }
  0x37   : > { %7419 = vmatprep.mubr.msk.bf16.mxu1 %vm970_vm1, %v8135_v23  ;;  %v8170_v5 = vld [vmem:[%s8535_s25 + $0x1f8] sm:$0xff]   ;;  %v8172_v8 = vld [vmem:[%s10083_s5 + $0x10] sm:$0xff]   ;;  %v1776_v10 = vld [vmem:[%s10080_s2] sm:$0x1] }
  0x38   : > { %v8171_v6 = vld [vmem:[%s10083_s5 + $0x18] sm:$0xff]   ;;  %v1778_v12 = vpack.i.b16 %v1776_v10, %v1776_v10 }
  0x39   : > { %7607 = vmatprep.subr.bf16.mxu0 %v8171_v6 }
  0x3a   : > { %7608 = vmatpush3.bf16.msra.mxu0 %v8171_v6 }
  0x3b   : > { %7609 = vmatprep.subr.bf16.mxu0 %v8172_v8 }
  0x3c   : > { %7356 = vmatmul.mubr.msk.bf16.gmra.mxu0 %vm970_vm1, %v8110_v13  ;;  %v8686_v13 = vsub.s32 0, %v8680_v9 }
  0x3d   : > { %7359 = vmatprep.mubr.msk.bf16.mxu0 %vm970_vm1, %v8111_v15 }
  0x3e   : > { %7420 = vmatmul.mubr.msk.bf16.gmra.mxu1 %vm970_vm1, %v8137_v26  ;;  %7610 = vmatpush3.bf16.msra.mxu0 %v8172_v8  ;;  %v8689_v16 = vrot.slane %v1778_v12, %v8686_v13  ;;  %v8174_v8 = vld [vmem:[%s10085_s7 + $0x18] sm:$0xff]  }
  0x3f   : > { %7423 = vmatprep.mubr.msk.bf16.mxu1 %vm970_vm1, %v8139_v27  ;;  %7743 = vmatprep.subr.bf16.mxu1 %v8174_v8 }
  0x44   : > { %7360 = vmatmul.mubr.msk.bf16.gmra.mxu0 %vm970_vm1, %v8112_v20 }
  0x45   : > { %7363 = vmatprep.mubr.msk.bf16.mxu0 %vm970_vm1, %v8113_v21 }
  0x46   : > { %7424 = vmatmul.mubr.msk.bf16.gmra.mxu1 %vm970_vm1, %v8141_v30 }
  0x47   : > { %7427 = vmatprep.mubr.msk.bf16.mxu1 %vm970_vm1, %v8144_v31 }
  0x4c   : > { %7364 = vmatmul.mubr.msk.bf16.gmra.mxu0 %vm970_vm1, %v8114_v24  ;;  %v8362_v24 = vmov 0  }
  0x4d   : > { %7367 = vmatprep.mubr.msk.bf16.mxu0 %vm970_vm1, %v8115_v25 }
  0x4e   : > { %7428 = vmatmul.mubr.msk.bf16.gmra.mxu1 %vm970_vm1, %v8146_v34 }
  0x4f   : > { %7431 = vmatprep.mubr.msk.bf16.mxu1 %vm970_vm1, %v8148_v35 }
  0x54   : > { %7368 = vmatmul.mubr.msk.bf16.gmra.mxu0 %vm970_vm1, %v8116_v28 }
  0x55   : > { %7371 = vmatprep.mubr.msk.bf16.mxu0 %vm970_vm1, %v8117_v29 }
  0x56   : > { %7432 = vmatmul.mubr.msk.bf16.gmra.mxu1 %vm970_vm1, %v8150_v38 }
  0x57   : > { %7435 = vmatprep.mubr.msk.bf16.mxu1 %vm970_vm1, %v8151_v39 }
  0x5c   : > { %7372 = vmatmul.mubr.msk.bf16.gmra.mxu0 %vm970_vm1, %v8118_v32 }
  0x5d   : > { %7375 = vmatprep.mubr.msk.bf16.mxu0 %vm970_vm1, %v8119_v33 }
  0x5e   : > { %7436 = vmatmul.mubr.msk.bf16.gmra.mxu1 %vm970_vm1, %v8152_v42 }
  0x5f   : > { %7439 = vmatprep.mubr.msk.bf16.mxu1 %vm970_vm1, %v8153_v43  ;;  %v8173_v43 = vld [vmem:[%s10083_s5 + $0x8] sm:$0xff]  }
  0x60   : > { %7611 = vmatprep.subr.bf16.mxu0 %v8173_v43 }
  0x61   : > { %7612 = vmatpush3.bf16.msra.mxu0 %v8173_v43  ;;  %v8175_v43 = vld [vmem:[%s10083_s5] sm:$0xff]  }
  0x62   : > { %7613 = vmatprep.subr.bf16.mxu0 %v8175_v43 }
  0x64   : > { %7376 = vmatmul.mubr.msk.bf16.gmra.mxu0 %vm970_vm1, %v8120_v36 }
  0x65   : > { %7379 = vmatprep.mubr.msk.bf16.mxu0 %vm970_vm1, %v8121_v37  ;;  %7614 = vmatpush3.bf16.msra.mxu0 %v8175_v43 }
  0x66   : > { %7440 = vmatmul.mubr.msk.bf16.gmra.mxu1 %vm970_vm1, %v8154_v46 }
  0x67   : > { %7443 = vmatprep.mubr.msk.bf16.mxu1 %vm970_vm1, %v8156_v47 }
  0x6c   : > { %7380 = vmatmul.mubr.msk.bf16.gmra.mxu0 %vm970_vm1, %v8123_v40 }
  0x6d   : > { %7383 = vmatprep.mubr.msk.bf16.mxu0 %vm970_vm1, %v8126_v41 }
  0x6e   : > { %7444 = vmatmul.mubr.msk.bf16.gmra.mxu1 %vm970_vm1, %v8157_v50 }
  0x6f   : > { %7447 = vmatprep.mubr.msk.bf16.mxu1 %vm970_vm1, %v8158_v51 }
  0x74   : > { %7384 = vmatmul.mubr.msk.bf16.gmra.mxu0 %vm970_vm1, %v8128_v44 }
  0x75   : > { %7387 = vmatprep.mubr.msk.bf16.mxu0 %vm970_vm1, %v8130_v45 }
  0x76   : > { %7448 = vmatmul.mubr.msk.bf16.gmra.mxu1 %vm970_vm1, %v8159_v54 }
  0x77   : > { %7451 = vmatprep.mubr.msk.bf16.mxu1 %vm970_vm1, %v8160_v55 }
  0x7c   : > { %7388 = vmatmul.mubr.msk.bf16.gmra.mxu0 %vm970_vm1, %v8132_v48 }
  0x7d   : > { %7391 = vmatprep.mubr.msk.bf16.mxu0 %vm970_vm1, %v8134_v49 }
  0x7e   : > { %7452 = vmatmul.mubr.msk.bf16.gmra.mxu1 %vm970_vm1, %v8161_v58 }
  0x7f   : > { %7455 = vmatprep.mubr.msk.bf16.mxu1 %vm970_vm1, %v8162_v59 }
  0x84   : > { %7392 = vmatmul.mubr.msk.bf16.gmra.mxu0 %vm970_vm1, %v8136_v52 }
  0x85   : > { %7395 = vmatprep.mubr.msk.bf16.mxu0 %vm970_vm1, %v8138_v53 }
  0x86   : > { %7456 = vmatmul.mubr.msk.bf16.gmra.mxu1 %vm970_vm1, %v8163_v62 }
  0x87   : > { %7459 = vmatprep.mubr.msk.bf16.mxu1 %vm970_vm1, %v8165_v63 }
  0x8c   : > { %7396 = vmatmul.mubr.msk.bf16.gmra.mxu0 %vm970_vm1, %v8140_v56 }
  0x8d   : > { %7399 = vmatprep.mubr.msk.bf16.mxu0 %vm970_vm1, %v8143_v57 }
  0x8e   : > { %7460 = vmatmul.mubr.msk.bf16.gmra.mxu1 %vm970_vm1, %v8166_v1 }
  0x8f   : > { %7463 = vmatprep.mubr.msk.bf16.mxu1 %vm970_vm1, %v8167_v2 }
  0x94   : > { %7400 = vmatmul.mubr.msk.bf16.gmra.mxu0 %vm970_vm1, %v8145_v60 }
  0x95   : > { %7403 = vmatprep.mubr.msk.bf16.mxu0 %vm970_vm1, %v8147_v61 }
  0x96   : > { %7464 = vmatmul.mubr.msk.bf16.gmra.mxu1 %vm970_vm1, %v8168_v3 }
  0x97   : > { %7467 = vmatprep.mubr.msk.bf16.mxu1 %vm970_vm1, %v8169_v4 }
  0x9c   : > { %7404 = vmatmul.mubr.msk.bf16.gmra.mxu0 %vm970_vm1, %v8149_v0 }
  0x9e   : > { %7468 = vmatmul.mubr.msk.bf16.gmra.mxu1 %vm970_vm1, %v8170_v5 }
  0xe4   : > { %v7345_v11 = vpop.f32.mrf.mxu0 }
  0xe6   : > { %v1201_v14 = vpop.f32.mrf.mxu0  ;;  %v8701_v38 = vpop.f32.mrf.mxu1 }
  0xe8   : > { %v7346_v15 = vpop.f32.mrf.mxu0  ;;  %v8705_v41 = vpop.f32.mrf.mxu1 }
  0xe9   : > { %v1713_v17 = vpack.c.bf16 %v7346_v15, %v7345_v11 }
  0xea   : > { %v1204_v18 = vpop.f32.mrf.mxu0  ;;  %v8711_v46 = vpop.f32.mrf.mxu1 }
  0xeb   : > { %v1712_v19 = vpack.c.bf16 %v1204_v18, %v1201_v14  ;;  %v1785_v20 = vadd.bf16 %v8689_v16, %v1713_v17 }
  0xec   : > { %v7349_v21 = vpop.f32.mrf.mxu0  ;;  %v8714_v49 = vpop.f32.mrf.mxu1 }
  0xed   : > { %v1784_v22 = vadd.bf16 %v8689_v16, %v1712_v19  ;;  %v1849_v26 = vmax.bf16 %v8362_v24, %v1785_v20 }
  0xee   : > { %v1217_v23 = vpop.f32.mrf.mxu0  ;;  %v8718_v53 = vpop.f32.mrf.mxu1 }
  0xef   : > { %v1848_v25 = vmax.bf16 %v8362_v24, %v1784_v22 }
  0xf0   : > { %v7350_v27 = vpop.f32.mrf.mxu0  ;;  %v8722_v56 = vpop.f32.mrf.mxu1 }
  0xf1   : > { %v1715_v28 = vpack.c.bf16 %v7350_v27, %v7349_v21  ;;  %7479 = vmatprep.mubr.msk.bf16.mxu1 %vm1944_vm2, %v1848_v25 }
  0xf2   : > { %v1220_v29 = vpop.f32.mrf.mxu0  ;;  %7480 = vmatmul.mubr.msk.bf16.vlgmr.msra.gmra.mxu1 %vm1944_vm2, %v1849_v26  ;;  %v8725_v60 = vpop.f32.mrf.mxu1 }
  0xf3   : > { %v1714_v30 = vpack.c.bf16 %v1220_v29, %v1217_v23  ;;  %v1787_v31 = vadd.bf16 %v8689_v16, %v1715_v28  ;;  %7744 = vmatpush3.bf16.msra.mxu1 %v8174_v8 }
  0xf4   : > { %v7353_v32 = vpop.f32.mrf.mxu0  ;;  %v8728_v63 = vpop.f32.mrf.mxu1 }
  0xf5   : > { %v1786_v33 = vadd.bf16 %v8689_v16, %v1714_v30  ;;  %v1851_v36 = vmax.bf16 %v8362_v24, %v1787_v31 }
  0xf6   : > { %v1233_v34 = vpop.f32.mrf.mxu0  ;;  %v8732_v3 = vpop.f32.mrf.mxu1 }
  0xf7   : > { %v1850_v35 = vmax.bf16 %v8362_v24, %v1786_v33 }
  0xf8   : > { %v7354_v37 = vpop.f32.mrf.mxu0  ;;  %v8736_v6 = vpop.f32.mrf.mxu1 }
  0xf9   : > { %v1717_v39 = vpack.c.bf16 %v7354_v37, %v7353_v32  ;;  %7483 = vmatprep.mubr.msk.bf16.mxu1 %vm1944_vm2, %v1850_v35 }
  0xfa   : > { %v1236_v40 = vpop.f32.mrf.mxu0  ;;  %7484 = vmatmul.mubr.msk.bf16.gmra.mxu1 %vm1944_vm2, %v1851_v36  ;;  %v8742_v12 = vpop.f32.mrf.mxu1 }
  0xfb   : > { %v1716_v42 = vpack.c.bf16 %v1236_v40, %v1233_v34  ;;  %v1789_v44 = vadd.bf16 %v8689_v16, %v1717_v39 }
  0xfc   : > { %v7357_v45 = vpop.f32.mrf.mxu0  ;;  %v8745_v17 = vpop.f32.mrf.mxu1 }
  0xfd   : > { %v1788_v47 = vadd.bf16 %v8689_v16, %v1716_v42  ;;  %v1853_v51 = vmax.bf16 %v8362_v24, %v1789_v44 }
  0xfe   : > { %v1249_v48 = vpop.f32.mrf.mxu0  ;;  %v8749_v21 = vpop.f32.mrf.mxu1 }
  0xff   : > { %v1852_v50 = vmax.bf16 %v8362_v24, %v1788_v47 }
 0x100   : > { %v7358_v52 = vpop.f32.mrf.mxu0  ;;  %v8753_v25 = vpop.f32.mrf.mxu1 }
 0x101   : > { %v1719_v54 = vpack.c.bf16 %v7358_v52, %v7357_v45  ;;  %7487 = vmatprep.mubr.msk.bf16.mxu1 %vm1944_vm2, %v1852_v50 }
 0x102   : > { %v1252_v55 = vpop.f32.mrf.mxu0  ;;  %7488 = vmatmul.mubr.msk.bf16.gmra.mxu1 %vm1944_vm2, %v1853_v51  ;;  %v8756_v29 = vpop.f32.mrf.mxu1 }
 0x103   : > { %v1718_v57 = vpack.c.bf16 %v1252_v55, %v1249_v48  ;;  %v1791_v58 = vadd.bf16 %v8689_v16, %v1719_v54 }
 0x104   : > { %v7361_v59 = vpop.f32.mrf.mxu0  ;;  %v8759_v32 = vpop.f32.mrf.mxu1 }
 0x105   : > { %v1790_v61 = vadd.bf16 %v8689_v16, %v1718_v57  ;;  %v1855_v1 = vmax.bf16 %v8362_v24, %v1791_v58 }
 0x106   : > { %v1265_v62 = vpop.f32.mrf.mxu0  ;;  %v8763_v36 = vpop.f32.mrf.mxu1 }
 0x107   : > { %v1854_v0 = vmax.bf16 %v8362_v24, %v1790_v61 }
 0x108   : > { %v7362_v2 = vpop.f32.mrf.mxu0  ;;  %v8767_v40 = vpop.f32.mrf.mxu1 }
 0x109   : > { %v1721_v4 = vpack.c.bf16 %v7362_v2, %v7361_v59  ;;  %7491 = vmatprep.mubr.msk.bf16.mxu1 %vm1944_vm2, %v1854_v0 }
 0x10a   : > { %v1268_v5 = vpop.f32.mrf.mxu0  ;;  %7492 = vmatmul.mubr.msk.bf16.gmra.mxu1 %vm1944_vm2, %v1855_v1  ;;  %v8773_v47 = vpop.f32.mrf.mxu1 }
 0x10b   : > { %v1720_v7 = vpack.c.bf16 %v1268_v5, %v1265_v62  ;;  %v1793_v10 = vadd.bf16 %v8689_v16, %v1721_v4 }
 0x10c   : > { %v7365_v11 = vpop.f32.mrf.mxu0  ;;  %v8776_v51 = vpop.f32.mrf.mxu1 }
 0x10d   : > { %v1792_v14 = vadd.bf16 %v8689_v16, %v1720_v7  ;;  %v1857_v19 = vmax.bf16 %v8362_v24, %v1793_v10 }
 0x10e   : > { %v1281_v15 = vpop.f32.mrf.mxu0  ;;  %v8780_v57 = vpop.f32.mrf.mxu1 }
 0x10f   : > { %v1856_v18 = vmax.bf16 %v8362_v24, %v1792_v14 }
 0x110   : > { %v7366_v20 = vpop.f32.mrf.mxu0  ;;  %v8784_v61 = vpop.f32.mrf.mxu1 }
 0x111   : > { %v1723_v22 = vpack.c.bf16 %v7366_v20, %v7365_v11  ;;  %7495 = vmatprep.mubr.msk.bf16.mxu1 %vm1944_vm2, %v1856_v18 }
 0x112   : > { %v1284_v23 = vpop.f32.mrf.mxu0  ;;  %7496 = vmatmul.mubr.msk.bf16.gmra.mxu1 %vm1944_vm2, %v1857_v19  ;;  %v8787_v2 = vpop.f32.mrf.mxu1 }
 0x113   : > { %v1722_v26 = vpack.c.bf16 %v1284_v23, %v1281_v15  ;;  %v1795_v27 = vadd.bf16 %v8689_v16, %v1723_v22 }
 0x114   : > { %v7369_v28 = vpop.f32.mrf.mxu0  ;;  %v8790_v7 = vpop.f32.mrf.mxu1 }
 0x115   : > { %v1794_v30 = vadd.bf16 %v8689_v16, %v1722_v26  ;;  %v1859_v34 = vmax.bf16 %v8362_v24, %v1795_v27 }
 0x116   : > { %v1297_v31 = vpop.f32.mrf.mxu0  ;;  %v8794_v14 = vpop.f32.mrf.mxu1 }
 0x117   : > { %v1858_v33 = vmax.bf16 %v8362_v24, %v1794_v30 }
 0x118   : > { %v7370_v35 = vpop.f32.mrf.mxu0  ;;  %v8798_v19 = vpop.f32.mrf.mxu1 }
 0x119   : > { %v1725_v37 = vpack.c.bf16 %v7370_v35, %v7369_v28  ;;  %7499 = vmatprep.mubr.msk.bf16.mxu1 %vm1944_vm2, %v1858_v33 }
 0x11a   : > { %v1300_v39 = vpop.f32.mrf.mxu0  ;;  %7500 = vmatmul.mubr.msk.bf16.gmra.mxu1 %vm1944_vm2, %v1859_v34  ;;  %v8801_v26 = vpop.f32.mrf.mxu1 }
 0x11b   : > { %v1724_v42 = vpack.c.bf16 %v1300_v39, %v1297_v31  ;;  %v1797_v44 = vadd.bf16 %v8689_v16, %v1725_v37 }
 0x11c   : > { %v7373_v45 = vpop.f32.mrf.mxu0  ;;  %v8804_v30 = vpop.f32.mrf.mxu1 }
 0x11d   : > { %v1796_v48 = vadd.bf16 %v8689_v16, %v1724_v42  ;;  %v1861_v54 = vmax.bf16 %v8362_v24, %v1797_v44 }
 0x11e   : > { %v1313_v50 = vpop.f32.mrf.mxu0  ;;  %v8808_v35 = vpop.f32.mrf.mxu1 }
 0x11f   : > { %v1860_v52 = vmax.bf16 %v8362_v24, %v1796_v48 }
 0x120   : > { %v7374_v55 = vpop.f32.mrf.mxu0  ;;  %v8812_v42 = vpop.f32.mrf.mxu1 }
 0x121   : > { %v1727_v58 = vpack.c.bf16 %v7374_v55, %v7373_v45  ;;  %7503 = vmatprep.mubr.msk.bf16.mxu1 %vm1944_vm2, %v1860_v52 }
 0x122   : > { %v1316_v59 = vpop.f32.mrf.mxu0  ;;  %7504 = vmatmul.mubr.msk.bf16.gmra.mxu1 %vm1944_vm2, %v1861_v54  ;;  %v8815_v48 = vpop.f32.mrf.mxu1 }
 0x123   : > { %v1726_v62 = vpack.c.bf16 %v1316_v59, %v1313_v50  ;;  %v1799_v0 = vadd.bf16 %v8689_v16, %v1727_v58 }
 0x124   : > { %v7377_v1 = vpop.f32.mrf.mxu0  ;;  %v8818_v54 = vpop.f32.mrf.mxu1 }
 0x125   : > { %v1798_v4 = vadd.bf16 %v8689_v16, %v1726_v62  ;;  %v1863_v10 = vmax.bf16 %v8362_v24, %v1799_v0 }
 0x126   : > { %v1329_v5 = vpop.f32.mrf.mxu0  ;;  %v8822_v62 = vpop.f32.mrf.mxu1 }
 0x127   : > { %v1862_v8 = vmax.bf16 %v8362_v24, %v1798_v4 }
 0x128   : > { %v7378_v11 = vpop.f32.mrf.mxu0  ;;  %v8826_v4 = vpop.f32.mrf.mxu1 }
 0x129   : > { %v1729_v15 = vpack.c.bf16 %v7378_v11, %v7377_v1  ;;  %7507 = vmatprep.mubr.msk.bf16.mxu1 %vm1944_vm2, %v1862_v8 }
 0x12a   : > { %v1332_v18 = vpop.f32.mrf.mxu0  ;;  %7508 = vmatmul.mubr.msk.bf16.gmra.mxu1 %vm1944_vm2, %v1863_v10  ;;  %v8829_v11 = vpop.f32.mrf.mxu1 }
 0x12b   : > { %v1728_v20 = vpack.c.bf16 %v1332_v18, %v1329_v5  ;;  %v1801_v22 = vadd.bf16 %v8689_v16, %v1729_v15 }
 0x12c   : > { %v7381_v23 = vpop.f32.mrf.mxu0 }
 0x12d   : > { %v1800_v27 = vadd.bf16 %v8689_v16, %v1728_v20  ;;  %v1865_v33 = vmax.bf16 %v8362_v24, %v1801_v22 }
 0x12e   : > { %v1345_v28 = vpop.f32.mrf.mxu0 }
 0x12f   : > { %v1864_v31 = vmax.bf16 %v8362_v24, %v1800_v27  ;;  %v8834_v27 = vpop.f32.mrf.mxu1 }
 0x130   : > { %v7382_v34 = vpop.f32.mrf.mxu0 }
 0x131   : > { %v1731_v37 = vpack.c.bf16 %v7382_v34, %v7381_v23  ;;  %7511 = vmatprep.mubr.msk.bf16.mxu1 %vm1944_vm2, %v1864_v31 }
 0x132   : > { %v1348_v39 = vpop.f32.mrf.mxu0  ;;  %7512 = vmatmul.mubr.msk.bf16.gmra.mxu1 %vm1944_vm2, %v1865_v33 }
 0x133   : > { %v1730_v43 = vpack.c.bf16 %v1348_v39, %v1345_v28  ;;  %v1803_v44 = vadd.bf16 %v8689_v16, %v1731_v37  ;;  %v8839_v39 = vpop.f32.mrf.mxu1 }
 0x134   : > { %v7385_v45 = vpop.f32.mrf.mxu0 }
 0x135   : > { %v1802_v50 = vadd.bf16 %v8689_v16, %v1730_v43  ;;  %v1867_v58 = vmax.bf16 %v8362_v24, %v1803_v44 }
 0x136   : > { %v1361_v52 = vpop.f32.mrf.mxu0 }
 0x137   : > { %v1866_v55 = vmax.bf16 %v8362_v24, %v1802_v50 }
 0x138   : > { %v7386_v59 = vpop.f32.mrf.mxu0 }
 0x139   : > { %v1733_v0 = vpack.c.bf16 %v7386_v59, %v7385_v45  ;;  %7515 = vmatprep.mubr.msk.bf16.mxu1 %vm1944_vm2, %v1866_v55  ;;  %v8844_v55 = vpop.f32.mrf.mxu1 }
 0x13a   : > { %v1364_v1 = vpop.f32.mrf.mxu0  ;;  %7516 = vmatmul.mubr.msk.bf16.gmra.mxu1 %vm1944_vm2, %v1867_v58 }
 0x13b   : > { %v1732_v5 = vpack.c.bf16 %v1364_v1, %v1361_v52  ;;  %v1805_v8 = vadd.bf16 %v8689_v16, %v1733_v0 }
 0x13c   : > { %v7389_v10 = vpop.f32.mrf.mxu0 }
 0x13d   : > { %v1804_v15 = vadd.bf16 %v8689_v16, %v1732_v5  ;;  %v1869_v22 = vmax.bf16 %v8362_v24, %v1805_v8  ;;  %v8849_v8 = vpop.f32.mrf.mxu1 }
 0x13e   : > { %v1377_v18 = vpop.f32.mrf.mxu0 }
 0x13f   : > { %v1868_v20 = vmax.bf16 %v8362_v24, %v1804_v15  ;;  %v8176_v15 = vld [vmem:[%s10085_s7 + $0x10] sm:$0xff]  }
 0x140   : > { %v7390_v23 = vpop.f32.mrf.mxu0  ;;  %7745 = vmatprep.subr.bf16.mxu1 %v8176_v15 }
 0x141   : > { %v1735_v28 = vpack.c.bf16 %v7390_v23, %v7389_v10  ;;  %7519 = vmatprep.mubr.msk.bf16.mxu1 %vm1944_vm2, %v1868_v20  ;;  %7746 = vmatpush3.bf16.msra.mxu1 %v8176_v15 }
 0x142   : > { %v1380_v31 = vpop.f32.mrf.mxu0  ;;  %7520 = vmatmul.mubr.msk.bf16.gmra.mxu1 %vm1944_vm2, %v1869_v22 }
 0x143   : > { %v1734_v33 = vpack.c.bf16 %v1380_v31, %v1377_v18  ;;  %v1807_v34 = vadd.bf16 %v8689_v16, %v1735_v28  ;;  %v8857_v28 = vpop.f32.mrf.mxu1 }
 0x144   : > { %v7393_v37 = vpop.f32.mrf.mxu0 }
 0x145   : > { %v1806_v43 = vadd.bf16 %v8689_v16, %v1734_v33  ;;  %v1871_v50 = vmax.bf16 %v8362_v24, %v1807_v34 }
 0x146   : > { %v1393_v44 = vpop.f32.mrf.mxu0 }
 0x147   : > { %v1870_v45 = vmax.bf16 %v8362_v24, %v1806_v43 }
 0x148   : > { %v7394_v52 = vpop.f32.mrf.mxu0 }
 0x149   : > { %v1737_v58 = vpack.c.bf16 %v7394_v52, %v7393_v37  ;;  %7523 = vmatprep.mubr.msk.bf16.mxu1 %vm1944_vm2, %v1870_v45 }
 0x14a   : > { %v1396_v59 = vpop.f32.mrf.mxu0  ;;  %7524 = vmatmul.mubr.msk.bf16.gmra.mxu1 %vm1944_vm2, %v1871_v50 }
 0x14b   : > { %v1736_v0 = vpack.c.bf16 %v1396_v59, %v1393_v44  ;;  %v1809_v1 = vadd.bf16 %v8689_v16, %v1737_v58  ;;  %v8862_v44 = vpop.f32.mrf.mxu1 }
 0x14c   : > { %v7397_v5 = vpop.f32.mrf.mxu0 }
 0x14d   : > { %v1808_v10 = vadd.bf16 %v8689_v16, %v1736_v0  ;;  %v1873_v22 = vmax.bf16 %v8362_v24, %v1809_v1  ;;  %v8867_v0 = vpop.f32.mrf.mxu1 }
 0x14e   : > { %v1409_v18 = vpop.f32.mrf.mxu0 }
 0x14f   : > { %v1872_v20 = vmax.bf16 %v8362_v24, %v1808_v10 }
 0x150   : > { %v7398_v23 = vpop.f32.mrf.mxu0 }
 0x151   : > { %v1739_v31 = vpack.c.bf16 %v7398_v23, %v7397_v5  ;;  %7527 = vmatprep.mubr.msk.bf16.mxu1 %vm1944_vm2, %v1872_v20  ;;  %v8872_v20 = vpop.f32.mrf.mxu1 }
 0x152   : > { %v1412_v33 = vpop.f32.mrf.mxu0  ;;  %7528 = vmatmul.mubr.msk.bf16.gmra.mxu1 %vm1944_vm2, %v1873_v22 }
 0x153   : > { %v1738_v34 = vpack.c.bf16 %v1412_v33, %v1409_v18  ;;  %v1811_v37 = vadd.bf16 %v8689_v16, %v1739_v31 }
 0x154   : > { %v7401_v43 = vpop.f32.mrf.mxu0 }
 0x155   : > { %v1810_v45 = vadd.bf16 %v8689_v16, %v1738_v34  ;;  %v1875_v58 = vmax.bf16 %v8362_v24, %v1811_v37  ;;  %v8877_v37 = vpop.f32.mrf.mxu1 }
 0x156   : > { %v1425_v50 = vpop.f32.mrf.mxu0 }
 0x157   : > { %v1874_v52 = vmax.bf16 %v8362_v24, %v1810_v45 }
 0x158   : > { %v7402_v59 = vpop.f32.mrf.mxu0 }
 0x159   : > { %v1741_v1 = vpack.c.bf16 %v7402_v59, %v7401_v43  ;;  %7531 = vmatprep.mubr.msk.bf16.mxu1 %vm1944_vm2, %v1874_v52  ;;  %v1744_v43 = vpack.c.bf16 %v8714_v49, %v8705_v41  ;;  %v8884_v59 = vpop.f32.mrf.mxu1  ;;  %v1745_v41 = vpack.c.bf16 %v8711_v46, %v8701_v38 }
 0x15a   : > { %v1428_v5 = vpop.f32.mrf.mxu0  ;;  %7532 = vmatmul.mubr.msk.bf16.gmra.mxu1 %vm1944_vm2, %v1875_v58 }
 0x15b   : > { %v1740_v10 = vpack.c.bf16 %v1428_v5, %v1425_v50  ;;  %v1813_v15 = vadd.bf16 %v8689_v16, %v1741_v1  ;;  %v1816_v1 = vadd.bf16 %v8689_v16, %v1744_v43 }
 0x15c   : > { %v7405_v18 = vpop.f32.mrf.mxu0 }
 0x15d   : > { %v1812_v22 = vadd.bf16 %v8689_v16, %v1740_v10  ;;  %v1877_v33 = vmax.bf16 %v8362_v24, %v1813_v15  ;;  %v8892_v15 = vpop.f32.mrf.mxu1 }
 0x15e   : > { %v1441_v23 = vpop.f32.mrf.mxu0 }
 0x15f   : > { %v1876_v31 = vmax.bf16 %v8362_v24, %v1812_v22  ;;  %v1746_v22 = vpack.c.bf16 %v8728_v63, %v8722_v56  ;;  %v1748_v63 = vpack.c.bf16 %v8745_v17, %v8736_v6  ;;  %v1750_v6 = vpack.c.bf16 %v8759_v32, %v8753_v25 }
 0x160   : > { %v7406_v34 = vpop.f32.mrf.mxu0  ;;  %v1752_v25 = vpack.c.bf16 %v8776_v51, %v8767_v40  ;;  %v1754_v40 = vpack.c.bf16 %v8790_v7, %v8784_v61  ;;  %v1755_v61 = vpack.c.bf16 %v8787_v2, %v8780_v57  ;;  %v1757_v2 = vpack.c.bf16 %v8801_v26, %v8794_v14 }
 0x161   : > { %v1743_v45 = vpack.c.bf16 %v7406_v34, %v7405_v18  ;;  %7535 = vmatprep.mubr.msk.bf16.mxu1 %vm1944_vm2, %v1876_v31  ;;  %v1880_v18 = vmax.bf16 %v8362_v24, %v1816_v1  ;;  %v8901_v31 = vpop.f32.mrf.mxu1  ;;  %v1818_v38 = vadd.bf16 %v8689_v16, %v1746_v22  ;;  %v1759_v14 = vpack.c.bf16 %v8815_v48, %v8808_v35 }
 0x162   : > { %v1444_v50 = vpop.f32.mrf.mxu0  ;;  %7536 = vmatmul.mubr.msk.bf16.gmra.mxu1 %vm1944_vm2, %v1877_v33  ;;  %v1747_v33 = vpack.c.bf16 %v8725_v60, %v8718_v53  ;;  %v1749_v53 = vpack.c.bf16 %v8742_v12, %v8732_v3  ;;  %v1751_v3 = vpack.c.bf16 %v8756_v29, %v8749_v21  ;;  %v1753_v21 = vpack.c.bf16 %v8773_v47, %v8763_v36  ;;  %v8177_v36 = vld [vmem:[%s10085_s7 + $0x8] sm:$0xff]  }
 0x163   : > { %v1742_v52 = vpack.c.bf16 %v1444_v50, %v1441_v23  ;;  %v1815_v58 = vadd.bf16 %v8689_v16, %v1743_v45  ;;  %v1817_v23 = vadd.bf16 %v8689_v16, %v1745_v41  ;;  %v8907_v34 = vpop.f32.mrf.mxu1  ;;  %v1882_v56 = vmax.bf16 %v8362_v24, %v1818_v38  ;;  %7747 = vmatprep.subr.bf16.mxu1 %v8177_v36 }
 0x164   : > { %v1819_v43 = vadd.bf16 %v8689_v16, %v1747_v33  ;;  %v1820_v50 = vadd.bf16 %v8689_v16, %v1748_v63  ;;  %v1821_v17 = vadd.bf16 %v8689_v16, %v1749_v53  ;;  %v1823_v32 = vadd.bf16 %v8689_v16, %v1751_v3  ;;  %7748 = vmatpush3.bf16.msra.mxu1 %v8177_v36 }
 0x165   : > { %v1814_v5 = vadd.bf16 %v8689_v16, %v1742_v52  ;;  %v1879_v49 = vmax.bf16 %v8362_v24, %v1815_v58  ;;  %v1881_v46 = vmax.bf16 %v8362_v24, %v1817_v23  ;;  %v8915_v45 = vpop.f32.mrf.mxu1  ;;  %v1825_v51 = vadd.bf16 %v8689_v16, %v1753_v21 }
 0x166   : > { %v1883_v52 = vmax.bf16 %v8362_v24, %v1819_v43  ;;  %v1884_v58 = vmax.bf16 %v8362_v24, %v1820_v50  ;;  %v1887_v22 = vmax.bf16 %v8362_v24, %v1823_v32  ;;  %v1827_v63 = vadd.bf16 %v8689_v16, %v1755_v61 }
 0x167   : > { %v1878_v10 = vmax.bf16 %v8362_v24, %v1814_v5  ;;  %v8921_v60 = vpop.f32.mrf.mxu1  ;;  %v1822_v5 = vadd.bf16 %v8689_v16, %v1750_v6  ;;  %v1889_v47 = vmax.bf16 %v8362_v24, %v1825_v51  ;;  %v1761_v35 = vpack.c.bf16 %v8829_v11, %v8822_v62  ;;  %v2746_v62 = vld [vmem:[%s10082_s4] sm:$0x1] }
 0x168   : > { %v1891_v57 = vmax.bf16 %v8362_v24, %v1827_v63  ;;  %v1764_v21 = vpack.c.bf16 %v8877_v37, %v8867_v0  ;;  %v1765_v0 = vpack.c.bf16 %v8872_v20, %v8862_v44 }
 0x169   : > { %7539 = vmatprep.mubr.msk.bf16.mxu1 %vm1944_vm2, %v1878_v10  ;;  %v8929_v1 = vpop.f32.mrf.mxu1  ;;  %v1885_v10 = vmax.bf16 %v8362_v24, %v1821_v17  ;;  %v1886_v41 = vmax.bf16 %v8362_v24, %v1822_v5 }
 0x16a   : > { %7540 = vmatmul.mubr.msk.bf16.gmra.mxu1 %vm1944_vm2, %v1879_v49  ;;  %v1836_v36 = vadd.bf16 %v8689_v16, %v1764_v21 }
 0x16b   : > { %7543 = vmatprep.mubr.msk.bf16.mxu1 %vm1944_vm2, %v1880_v18  ;;  %v8935_v12 = vpop.f32.mrf.mxu1  ;;  %v1824_v18 = vadd.bf16 %v8689_v16, %v1752_v25 }
 0x16d   : > { %v8943_v49 = vpop.f32.mrf.mxu1  ;;  %v1888_v23 = vmax.bf16 %v8362_v24, %v1824_v18 }
 0x16f   : > { %v8949_v29 = vpop.f32.mrf.mxu1 }
 0x171   : > { %v8957_v38 = vpop.f32.mrf.mxu1 }
 0x172   : > { %7544 = vmatmul.mubr.msk.bf16.gmra.mxu1 %vm1944_vm2, %v1881_v46  ;;  %v1826_v46 = vadd.bf16 %v8689_v16, %v1754_v40  ;;  %v2748_v40 = vpack.i.b16 %v2746_v62, %v2746_v62  ;;  %v1769_v62 = vpack.c.bf16 %v8929_v1, %v8915_v45 }
 0x173   : > { %7547 = vmatprep.mubr.msk.bf16.mxu1 %vm1944_vm2, %v1882_v56  ;;  %v8966_v7 = vpop.f32.mrf.mxu1  ;;  %v1756_v56 = vpack.c.bf16 %v8804_v30, %v8798_v19  ;;  %v1758_v19 = vpack.c.bf16 %v8818_v54, %v8812_v42  ;;  %v1829_v30 = vadd.bf16 %v8689_v16, %v1757_v2  ;;  %v1760_v42 = vpack.c.bf16 %v8834_v27, %v8826_v4 }
 0x174   : > { %v1890_v33 = vmax.bf16 %v8362_v24, %v1826_v46  ;;  %v1831_v54 = vadd.bf16 %v8689_v16, %v1759_v14  ;;  %v1762_v4 = vpack.c.bf16 %v8857_v28, %v8844_v55  ;;  %v1833_v27 = vadd.bf16 %v8689_v16, %v1761_v35 }
 0x175   : > { %v8974_v43 = vpop.f32.mrf.mxu1  ;;  %v1828_v50 = vadd.bf16 %v8689_v16, %v1756_v56  ;;  %v1830_v6 = vadd.bf16 %v8689_v16, %v1758_v19  ;;  %v1893_v17 = vmax.bf16 %v8362_v24, %v1829_v30  ;;  %v1832_v3 = vadd.bf16 %v8689_v16, %v1760_v42 }
 0x176   : > { %v1834_v18 = vadd.bf16 %v8689_v16, %v1762_v4  ;;  %v1897_v11 = vmax.bf16 %v8362_v24, %v1833_v27  ;;  %v1766_v56 = vpack.c.bf16 %v8907_v34, %v8892_v15  ;;  %v1768_v42 = vpack.c.bf16 %v8935_v12, %v8921_v60 }
 0x177   : > { %v1892_v53 = vmax.bf16 %v8362_v24, %v1828_v50  ;;  %v1894_v5 = vmax.bf16 %v8362_v24, %v1830_v6  ;;  %v1896_v25 = vmax.bf16 %v8362_v24, %v1832_v3  ;;  %v1841_v45 = vadd.bf16 %v8689_v16, %v1769_v62 }
 0x178   : > { %v1898_v28 = vmax.bf16 %v8362_v24, %v1834_v18  ;;  %v1838_v44 = vadd.bf16 %v8689_v16, %v1766_v56 }
 0x17a   : > { %7548 = vmatmul.mubr.msk.bf16.gmra.mxu1 %vm1944_vm2, %v1883_v52  ;;  %v8980_v52 = vpop.f32.mrf.mxu1 }
 0x17b   : > { %7551 = vmatprep.mubr.msk.bf16.mxu1 %vm1944_vm2, %v1884_v58 }
 0x17c   : > { %v8988_v58 = vpop.f32.mrf.mxu1 }
 0x17e   : > { %v8994_v26 = vpop.f32.mrf.mxu1 }
 0x17f   : > { %v1772_v56 = vpack.c.bf16 %v8994_v26, %v8980_v52 }
 0x182   : > { %7552 = vmatmul.mubr.msk.bf16.gmra.mxu1 %vm1944_vm2, %v1885_v10  ;;  %v9002_v10 = vpop.f32.mrf.mxu1 }
 0x183   : > { %7555 = vmatprep.mubr.msk.bf16.mxu1 %vm1944_vm2, %v1886_v41  ;;  %v1895_v41 = vmax.bf16 %v8362_v24, %v1831_v54 }
 0x184   : > { %v9008_v48 = vpop.f32.mrf.mxu1 }
 0x186   : > { %v9016_v32 = vpop.f32.mrf.mxu1 }
 0x188   : > { %v9025_v55 = vpop.f32.mrf.mxu1 }
 0x18a   : > { %7556 = vmatmul.mubr.msk.bf16.gmra.mxu1 %vm1944_vm2, %v1887_v22  ;;  %v1763_v22 = vpack.c.bf16 %v8849_v8, %v8839_v39  ;;  %v9035_v39 = vrot.slane %v2748_v40, %v8686_v13 }
 0x18b   : > { %7559 = vmatprep.mubr.msk.bf16.mxu1 %vm1944_vm2, %v1888_v23 }
 0x18c   : > { %v1835_v51 = vadd.bf16 %v8689_v16, %v1763_v22 }
 0x18e   : > { %v1899_v61 = vmax.bf16 %v8362_v24, %v1835_v51 }
 0x192   : > { %7560 = vmatmul.mubr.msk.bf16.gmra.mxu1 %vm1944_vm2, %v1889_v47 }
 0x193   : > { %7563 = vmatprep.mubr.msk.bf16.mxu1 %vm1944_vm2, %v1890_v33  ;;  %v1900_v33 = vmax.bf16 %v8362_v24, %v1836_v36 }
 0x19a   : > { %7564 = vmatmul.mubr.msk.bf16.gmra.mxu1 %vm1944_vm2, %v1891_v57 }
 0x19b   : > { %7567 = vmatprep.mubr.msk.bf16.mxu1 %vm1944_vm2, %v1892_v53  ;;  %v1837_v53 = vadd.bf16 %v8689_v16, %v1765_v0  ;;  %v1771_v0 = vpack.c.bf16 %v8957_v38, %v8943_v49 }
 0x19d   : > { %v1901_v6 = vmax.bf16 %v8362_v24, %v1837_v53  ;;  %v1843_v49 = vadd.bf16 %v8689_v16, %v1771_v0  ;;  %v1844_v53 = vadd.bf16 %v8689_v16, %v1772_v56 }
 0x1a2   : > { %7568 = vmatmul.mubr.msk.bf16.gmra.mxu1 %vm1944_vm2, %v1893_v17  ;;  %v1767_v17 = vpack.c.bf16 %v8901_v31, %v8884_v59 }
 0x1a3   : > { %7571 = vmatprep.mubr.msk.bf16.mxu1 %vm1944_vm2, %v1894_v5  ;;  %v1902_v5 = vmax.bf16 %v8362_v24, %v1838_v44 }
 0x1a4   : > { %v1839_v59 = vadd.bf16 %v8689_v16, %v1767_v17 }
 0x1a6   : > { %v1903_v18 = vmax.bf16 %v8362_v24, %v1839_v59 }
 0x1aa   : > { %7572 = vmatmul.mubr.msk.bf16.gmra.mxu1 %vm1944_vm2, %v1895_v41 }
 0x1ab   : > { %7575 = vmatprep.mubr.msk.bf16.mxu1 %vm1944_vm2, %v1896_v25  ;;  %v1840_v25 = vadd.bf16 %v8689_v16, %v1768_v42 }
 0x1ad   : > { %v1904_v22 = vmax.bf16 %v8362_v24, %v1840_v25 }
 0x1b2   : > { %v7481_v23 = vpop.f32.mrf.mxu1  ;;  %7576 = vmatmul.mubr.msk.bf16.gmra.mxu1 %vm1944_vm2, %v1897_v11 }
 0x1b3   : > { %7579 = vmatprep.mubr.msk.bf16.mxu1 %vm1944_vm2, %v1898_v28  ;;  %v1770_v28 = vpack.c.bf16 %v8966_v7, %v8949_v29  ;;  %v8178_v29 = vld [vmem:[%s10085_s7] sm:$0xff]  }
 0x1b4   : > { %v2171_v46 = vpop.f32.mrf.mxu1  ;;  %7749 = vmatprep.subr.bf16.mxu1 %v8178_v29 }
 0x1b5   : > { %7750 = vmatpush3.bf16.msra.mxu1 %v8178_v29 }
 0x1b6   : > { %v7482_v47 = vpop.f32.mrf.mxu1 }
 0x1b7   : > { %v2683_v8 = vpack.c.bf16 %v7482_v47, %v7481_v23 }
 0x1b8   : > { %v2174_v37 = vpop.f32.mrf.mxu1 }
 0x1b9   : > { %v2682_v63 = vpack.c.bf16 %v2174_v37, %v2171_v46  ;;  %v2755_v50 = vadd.bf16 %v9035_v39, %v2683_v8  ;;  %v1842_v46 = vadd.bf16 %v8689_v16, %v1770_v28 }
 0x1ba   : > { %v7485_v57 = vpop.f32.mrf.mxu1  ;;  %7580 = vmatmul.mubr.msk.bf16.gmra.mxu1 %vm1944_vm2, %v1899_v61  ;;  %v1905_v61 = vmax.bf16 %v8362_v24, %v1841_v45 }
 0x1bb   : > { %v2754_v2 = vadd.bf16 %v9035_v39, %v2682_v63  ;;  %7583 = vmatprep.mubr.msk.bf16.mxu1 %vm1944_vm2, %v1900_v33  ;;  %v2819_v30 = vmax.bf16 %v8362_v24, %v2755_v50  ;;  %v1906_v33 = vmax.bf16 %v8362_v24, %v1842_v46 }
 0x1bc   : > { %v2187_v19 = vpop.f32.mrf.mxu1 }
 0x1bd   : > { %v2818_v20 = vmax.bf16 %v8362_v24, %v2754_v2 }
 0x1be   : > { %v7486_v15 = vpop.f32.mrf.mxu1 }
 0x1bf   : > { %v2685_v34 = vpack.c.bf16 %v7486_v15, %v7485_v57  ;;  %7615 = vmatprep.mubr.msk.bf16.mxu0 %vm1944_vm2, %v2818_v20  ;;  %v1907_v20 = vmax.bf16 %v8362_v24, %v1843_v49 }
 0x1c0   : > { %v2190_v14 = vpop.f32.mrf.mxu1  ;;  %7616 = vmatmul.mubr.msk.bf16.vlgmr.msra.gmra.mxu0 %vm1944_vm2, %v2819_v30  ;;  %v1773_v30 = vpack.c.bf16 %v8988_v58, %v8974_v43 }
 0x1c1   : > { %v2684_v54 = vpack.c.bf16 %v2190_v14, %v2187_v19  ;;  %v2757_v3 = vadd.bf16 %v9035_v39, %v2685_v34  ;;  %v1908_v34 = vmax.bf16 %v8362_v24, %v1844_v53 }
 0x1c2   : > { %v7489_v41 = vpop.f32.mrf.mxu1  ;;  %7584 = vmatmul.mubr.msk.bf16.gmra.mxu1 %vm1944_vm2, %v1901_v6  ;;  %v1774_v6 = vpack.c.bf16 %v9025_v55, %v9008_v48  ;;  %v1845_v43 = vadd.bf16 %v8689_v16, %v1773_v30  ;;  %v8179_v48 = vld [vmem:[%s10087_s9 + $0x38] sm:$0xff]  }
 0x1c3   : > { %v2756_v35 = vadd.bf16 %v9035_v39, %v2684_v54  ;;  %7587 = vmatprep.mubr.msk.bf16.mxu1 %vm1944_vm2, %v1902_v5  ;;  %v2821_v27 = vmax.bf16 %v8362_v24, %v2757_v3  ;;  %7879 = vmatprep.subr.bf16.mxu0 %v8179_v48 }
 0x1c4   : > { %v2203_v31 = vpop.f32.mrf.mxu1  ;;  %v1846_v54 = vadd.bf16 %v8689_v16, %v1774_v6  ;;  %v1909_v59 = vmax.bf16 %v8362_v24, %v1845_v43  ;;  %7880 = vmatpush3.bf16.msra.mxu0 %v8179_v48 }
 0x1c5   : > { %v2820_v4 = vmax.bf16 %v8362_v24, %v2756_v35 }
 0x1c6   : > { %v7490_v60 = vpop.f32.mrf.mxu1 }
 0x1c7   : > { %v2687_v12 = vpack.c.bf16 %v7490_v60, %v7489_v41  ;;  %7619 = vmatprep.mubr.msk.bf16.mxu0 %vm1944_vm2, %v2820_v4  ;;  %v1910_v4 = vmax.bf16 %v8362_v24, %v1846_v54 }
 0x1c8   : > { %v2206_v11 = vpop.f32.mrf.mxu1  ;;  %7620 = vmatmul.mubr.msk.bf16.gmra.mxu0 %vm1944_vm2, %v2821_v27 }
 0x1c9   : > { %v2686_v21 = vpack.c.bf16 %v2206_v11, %v2203_v31  ;;  %v2759_v23 = vadd.bf16 %v9035_v39, %v2687_v12  ;;  %v1775_v31 = vpack.c.bf16 %v9016_v32, %v9002_v10 }
 0x1ca   : > { %v7493_v40 = vpop.f32.mrf.mxu1  ;;  %7588 = vmatmul.mubr.msk.bf16.gmra.mxu1 %vm1944_vm2, %v1903_v18 }
 0x1cb   : > { %v2758_v51 = vadd.bf16 %v9035_v39, %v2686_v21  ;;  %7591 = vmatprep.mubr.msk.bf16.mxu1 %vm1944_vm2, %v1904_v22  ;;  %v2823_v7 = vmax.bf16 %v8362_v24, %v2759_v23  ;;  %v1847_v62 = vadd.bf16 %v8689_v16, %v1775_v31 }
 0x1cc   : > { %v2219_v1 = vpop.f32.mrf.mxu1 }
 0x1cd   : > { %v2822_v36 = vmax.bf16 %v8362_v24, %v2758_v51  ;;  %v1911_v21 = vmax.bf16 %v8362_v24, %v1847_v62 }
 0x1ce   : > { %v7494_v47 = vpop.f32.mrf.mxu1 }
 0x1cf   : > { %v2689_v8 = vpack.c.bf16 %v7494_v47, %v7493_v40  ;;  %7623 = vmatprep.mubr.msk.bf16.mxu0 %vm1944_vm2, %v2822_v36 }
 0x1d0   : > { %v2222_v37 = vpop.f32.mrf.mxu1  ;;  %7624 = vmatmul.mubr.msk.bf16.gmra.mxu0 %vm1944_vm2, %v2823_v7 }
 0x1d1   : > { %v2688_v63 = vpack.c.bf16 %v2222_v37, %v2219_v1  ;;  %v2761_v50 = vadd.bf16 %v9035_v39, %v2689_v8 }
 0x1d2   : > { %v7497_v57 = vpop.f32.mrf.mxu1  ;;  %7592 = vmatmul.mubr.msk.bf16.gmra.mxu1 %vm1944_vm2, %v1905_v61 }
 0x1d3   : > { %v2760_v2 = vadd.bf16 %v9035_v39, %v2688_v63  ;;  %7595 = vmatprep.mubr.msk.bf16.mxu1 %vm1944_vm2, %v1906_v33  ;;  %v2825_v44 = vmax.bf16 %v8362_v24, %v2761_v50 }
 0x1d4   : > { %v2235_v38 = vpop.f32.mrf.mxu1 }
 0x1d5   : > { %v2824_v19 = vmax.bf16 %v8362_v24, %v2760_v2 }
 0x1d6   : > { %v7498_v52 = vpop.f32.mrf.mxu1 }
 0x1d7   : > { %v2691_v26 = vpack.c.bf16 %v7498_v52, %v7497_v57  ;;  %7627 = vmatprep.mubr.msk.bf16.mxu0 %vm1944_vm2, %v2824_v19 }
 0x1d8   : > { %v2238_v15 = vpop.f32.mrf.mxu1  ;;  %7628 = vmatmul.mubr.msk.bf16.gmra.mxu0 %vm1944_vm2, %v2825_v44 }
 0x1d9   : > { %v2690_v17 = vpack.c.bf16 %v2238_v15, %v2235_v38  ;;  %v2763_v14 = vadd.bf16 %v9035_v39, %v2691_v26  ;;  %v8180_v26 = vld [vmem:[%s10087_s9 + $0x30] sm:$0xff]  }
 0x1da   : > { %v7501_v5 = vpop.f32.mrf.mxu1  ;;  %7596 = vmatmul.mubr.msk.bf16.gmra.mxu1 %vm1944_vm2, %v1907_v20  ;;  %7881 = vmatprep.subr.bf16.mxu0 %v8180_v26 }
 0x1db   : > { %v2762_v42 = vadd.bf16 %v9035_v39, %v2690_v17  ;;  %7599 = vmatprep.mubr.msk.bf16.mxu1 %vm1944_vm2, %v1908_v34  ;;  %v2827_v55 = vmax.bf16 %v8362_v24, %v2763_v14  ;;  %7882 = vmatpush3.bf16.msra.mxu0 %v8180_v26 }
 0x1dc   : > { %v2251_v58 = vpop.f32.mrf.mxu1 }
 0x1dd   : > { %v2826_v3 = vmax.bf16 %v8362_v24, %v2762_v42 }
 0x1de   : > { %v7502_v41 = vpop.f32.mrf.mxu1 }
 0x1df   : > { %v2693_v35 = vpack.c.bf16 %v7502_v41, %v7501_v5  ;;  %7631 = vmatprep.mubr.msk.bf16.mxu0 %vm1944_vm2, %v2826_v3 }
 0x1e0   : > { %v2254_v25 = vpop.f32.mrf.mxu1  ;;  %7632 = vmatmul.mubr.msk.bf16.gmra.mxu0 %vm1944_vm2, %v2827_v55 }
 0x1e1   : > { %v2692_v27 = vpack.c.bf16 %v2254_v25, %v2251_v58  ;;  %v2765_v60 = vadd.bf16 %v9035_v39, %v2693_v35 }
 0x1e2   : > { %v7505_v12 = vpop.f32.mrf.mxu1  ;;  %7600 = vmatmul.mubr.msk.bf16.gmra.mxu1 %vm1944_vm2, %v1909_v59 }
 0x1e3   : > { %v2764_v18 = vadd.bf16 %v9035_v39, %v2692_v27  ;;  %7603 = vmatprep.mubr.msk.bf16.mxu1 %vm1944_vm2, %v1910_v4  ;;  %v2829_v32 = vmax.bf16 %v8362_v24, %v2765_v60 }
 0x1e4   : > { %v2267_v11 = vpop.f32.mrf.mxu1 }
 0x1e5   : > { %v2828_v10 = vmax.bf16 %v8362_v24, %v2764_v18 }
 0x1e6   : > { %v7506_v22 = vpop.f32.mrf.mxu1 }
 0x1e7   : > { %v2695_v28 = vpack.c.bf16 %v7506_v22, %v7505_v12  ;;  %7635 = vmatprep.mubr.msk.bf16.mxu0 %vm1944_vm2, %v2828_v10 }
 0x1e8   : > { %v2270_v23 = vpop.f32.mrf.mxu1  ;;  %7636 = vmatmul.mubr.msk.bf16.gmra.mxu0 %vm1944_vm2, %v2829_v32 }
 0x1e9   : > { %v2694_v40 = vpack.c.bf16 %v2270_v23, %v2267_v11  ;;  %v2767_v51 = vadd.bf16 %v9035_v39, %v2695_v28 }
 0x1ea   : > { %v7509_v45 = vpop.f32.mrf.mxu1  ;;  %7604 = vmatmul.mubr.msk.bf16.gmra.mxu1 %vm1944_vm2, %v1911_v21 }
 0x1eb   : > { %v2766_v16 = vadd.bf16 %v9035_v39, %v2694_v40  ;;  %v2831_v36 = vmax.bf16 %v8362_v24, %v2767_v51 }
 0x1ec   : > { %v2283_v1 = vpop.f32.mrf.mxu1 }
 0x1ed   : > { %v2830_v46 = vmax.bf16 %v8362_v24, %v2766_v16 }
 0x1ee   : > { %v7510_v29 = vpop.f32.mrf.mxu1 }
 0x1ef   : > { %v2697_v7 = vpack.c.bf16 %v7510_v29, %v7509_v45  ;;  %7639 = vmatprep.mubr.msk.bf16.mxu0 %vm1944_vm2, %v2830_v46  ;;  %v8181_v29 = vld [vmem:[%s10087_s9 + $0x28] sm:$0xff]  }
 0x1f0   : > { %v2286_v47 = vpop.f32.mrf.mxu1  ;;  %7640 = vmatmul.mubr.msk.bf16.gmra.mxu0 %vm1944_vm2, %v2831_v36  ;;  %7883 = vmatprep.subr.bf16.mxu0 %v8181_v29 }
 0x1f1   : > { %v2696_v8 = vpack.c.bf16 %v2286_v47, %v2283_v1  ;;  %v2769_v61 = vadd.bf16 %v9035_v39, %v2697_v7  ;;  %7884 = vmatpush3.bf16.msra.mxu0 %v8181_v29 }
 0x1f2   : > { %v7513_v0 = vpop.f32.mrf.mxu1 }
 0x1f3   : > { %v2768_v37 = vadd.bf16 %v9035_v39, %v2696_v8  ;;  %v2833_v63 = vmax.bf16 %v8362_v24, %v2769_v61 }
 0x1f4   : > { %v2299_v33 = vpop.f32.mrf.mxu1 }
 0x1f5   : > { %v2832_v56 = vmax.bf16 %v8362_v24, %v2768_v37 }
 0x1f6   : > { %v7514_v50 = vpop.f32.mrf.mxu1 }
 0x1f7   : > { %v2699_v57 = vpack.c.bf16 %v7514_v50, %v7513_v0  ;;  %7643 = vmatprep.mubr.msk.bf16.mxu0 %vm1944_vm2, %v2832_v56 }
 0x1f8   : > { %v2302_v2 = vpop.f32.mrf.mxu1  ;;  %7644 = vmatmul.mubr.msk.bf16.gmra.mxu0 %vm1944_vm2, %v2833_v63 }
 0x1f9   : > { %v2698_v49 = vpack.c.bf16 %v2302_v2, %v2299_v33  ;;  %v2771_v38 = vadd.bf16 %v9035_v39, %v2699_v57 }
 0x1fa   : > { %v7517_v53 = vpop.f32.mrf.mxu1 }
 0x1fb   : > { %v2770_v19 = vadd.bf16 %v9035_v39, %v2698_v49  ;;  %v2835_v20 = vmax.bf16 %v8362_v24, %v2771_v38 }
 0x1fc   : > { %v2315_v44 = vpop.f32.mrf.mxu1 }
 0x1fd   : > { %v2834_v52 = vmax.bf16 %v8362_v24, %v2770_v19 }
 0x1fe   : > { %v7518_v30 = vpop.f32.mrf.mxu1 }
 0x1ff   : > { %v2701_v15 = vpack.c.bf16 %v7518_v30, %v7517_v53  ;;  %7647 = vmatprep.mubr.msk.bf16.mxu0 %vm1944_vm2, %v2834_v52 }
 0x200   : > { %v2318_v34 = vpop.f32.mrf.mxu1  ;;  %7648 = vmatmul.mubr.msk.bf16.gmra.mxu0 %vm1944_vm2, %v2835_v20 }
 0x201   : > { %v2700_v6 = vpack.c.bf16 %v2318_v34, %v2315_v44  ;;  %v2773_v17 = vadd.bf16 %v9035_v39, %v2701_v15 }
 0x202   : > { %v7521_v14 = vpop.f32.mrf.mxu1 }
 0x203   : > { %v2772_v5 = vadd.bf16 %v9035_v39, %v2700_v6  ;;  %v2837_v58 = vmax.bf16 %v8362_v24, %v2773_v17 }
 0x204   : > { %v2331_v42 = vpop.f32.mrf.mxu1 }
 0x205   : > { %v2836_v43 = vmax.bf16 %v8362_v24, %v2772_v5 }
 0x206   : > { %v7522_v54 = vpop.f32.mrf.mxu1 }
 0x207   : > { %v2703_v3 = vpack.c.bf16 %v7522_v54, %v7521_v14  ;;  %7651 = vmatprep.mubr.msk.bf16.mxu0 %vm1944_vm2, %v2836_v43 }
 0x208   : > { %v2334_v48 = vpop.f32.mrf.mxu1  ;;  %7652 = vmatmul.mubr.msk.bf16.gmra.mxu0 %vm1944_vm2, %v2837_v58 }
 0x209   : > { %v2702_v55 = vpack.c.bf16 %v2334_v48, %v2331_v42  ;;  %v2775_v41 = vadd.bf16 %v9035_v39, %v2703_v3 }
 0x20a   : > { %v7525_v35 = vpop.f32.mrf.mxu1 }
 0x20b   : > { %v2774_v59 = vadd.bf16 %v9035_v39, %v2702_v55  ;;  %v2839_v4 = vmax.bf16 %v8362_v24, %v2775_v41 }
 0x20c   : > { %v2347_v31 = vpop.f32.mrf.mxu1 }
 0x20d   : > { %v2838_v25 = vmax.bf16 %v8362_v24, %v2774_v59 }
 0x20e   : > { %v7526_v27 = vpop.f32.mrf.mxu1 }
 0x20f   : > { %v2705_v60 = vpack.c.bf16 %v7526_v27, %v7525_v35  ;;  %7655 = vmatprep.mubr.msk.bf16.mxu0 %vm1944_vm2, %v2838_v25  ;;  %v8182_v25 = vld [vmem:[%s10087_s9 + $0x20] sm:$0xff]  }
 0x210   : > { %v2350_v12 = vpop.f32.mrf.mxu1  ;;  %7656 = vmatmul.mubr.msk.bf16.gmra.mxu0 %vm1944_vm2, %v2839_v4  ;;  %7885 = vmatprep.subr.bf16.mxu0 %v8182_v25 }
 0x211   : > { %v2704_v18 = vpack.c.bf16 %v2350_v12, %v2347_v31  ;;  %v2777_v62 = vadd.bf16 %v9035_v39, %v2705_v60  ;;  %7886 = vmatpush3.bf16.msra.mxu0 %v8182_v25 }
 0x212   : > { %v7529_v11 = vpop.f32.mrf.mxu1 }
 0x213   : > { %v2776_v10 = vadd.bf16 %v9035_v39, %v2704_v18  ;;  %v2841_v28 = vmax.bf16 %v8362_v24, %v2777_v62 }
 0x214   : > { %v2363_v32 = vpop.f32.mrf.mxu1 }
 0x215   : > { %v2840_v22 = vmax.bf16 %v8362_v24, %v2776_v10 }
 0x216   : > { %v7530_v21 = vpop.f32.mrf.mxu1 }
 0x217   : > { %v2707_v23 = vpack.c.bf16 %v7530_v21, %v7529_v11  ;;  %7659 = vmatprep.mubr.msk.bf16.mxu0 %vm1944_vm2, %v2840_v22 }
 0x218   : > { %v2366_v40 = vpop.f32.mrf.mxu1  ;;  %7660 = vmatmul.mubr.msk.bf16.gmra.mxu0 %vm1944_vm2, %v2841_v28 }
 0x219   : > { %v2706_v51 = vpack.c.bf16 %v2366_v40, %v2363_v32  ;;  %v2779_v45 = vadd.bf16 %v9035_v39, %v2707_v23 }
 0x21a   : > { %v7533_v16 = vpop.f32.mrf.mxu1 }
 0x21b   : > { %v2778_v1 = vadd.bf16 %v9035_v39, %v2706_v51  ;;  %v2843_v7 = vmax.bf16 %v8362_v24, %v2779_v45 }
 0x21c   : > { %v2379_v46 = vpop.f32.mrf.mxu1 }
 0x21d   : > { %v2842_v36 = vmax.bf16 %v8362_v24, %v2778_v1 }
 0x21e   : > { %v7534_v47 = vpop.f32.mrf.mxu1 }
 0x21f   : > { %v2709_v8 = vpack.c.bf16 %v7534_v47, %v7533_v16  ;;  %7663 = vmatprep.mubr.msk.bf16.mxu0 %vm1944_vm2, %v2842_v36 }
 0x220   : > { %v2382_v61 = vpop.f32.mrf.mxu1  ;;  %7664 = vmatmul.mubr.msk.bf16.gmra.mxu0 %vm1944_vm2, %v2843_v7 }
 0x221   : > { %v2708_v0 = vpack.c.bf16 %v2382_v61, %v2379_v46  ;;  %v2781_v37 = vadd.bf16 %v9035_v39, %v2709_v8 }
 0x222   : > { %v7537_v33 = vpop.f32.mrf.mxu1 }
 0x223   : > { %v2780_v56 = vadd.bf16 %v9035_v39, %v2708_v0  ;;  %v2845_v57 = vmax.bf16 %v8362_v24, %v2781_v37 }
 0x224   : > { %v2395_v63 = vpop.f32.mrf.mxu1 }
 0x225   : > { %v2844_v50 = vmax.bf16 %v8362_v24, %v2780_v56 }
 0x226   : > { %v7538_v2 = vpop.f32.mrf.mxu1 }
 0x227   : > { %v2711_v49 = vpack.c.bf16 %v7538_v2, %v7537_v33  ;;  %7667 = vmatprep.mubr.msk.bf16.mxu0 %vm1944_vm2, %v2844_v50 }
 0x228   : > { %v2398_v38 = vpop.f32.mrf.mxu1  ;;  %7668 = vmatmul.mubr.msk.bf16.gmra.mxu0 %vm1944_vm2, %v2845_v57 }
 0x229   : > { %v2710_v53 = vpack.c.bf16 %v2398_v38, %v2395_v63  ;;  %v2783_v19 = vadd.bf16 %v9035_v39, %v2711_v49 }
 0x22a   : > { %v7541_v44 = vpop.f32.mrf.mxu1 }
 0x22b   : > { %v2782_v52 = vadd.bf16 %v9035_v39, %v2710_v53  ;;  %v2847_v30 = vmax.bf16 %v8362_v24, %v2783_v19 }
 0x22c   : > { %v2411_v26 = vpop.f32.mrf.mxu1 }
 0x22d   : > { %v2846_v20 = vmax.bf16 %v8362_v24, %v2782_v52 }
 0x22e   : > { %v7542_v15 = vpop.f32.mrf.mxu1 }
 0x22f   : > { %v2713_v34 = vpack.c.bf16 %v7542_v15, %v7541_v44  ;;  %7671 = vmatprep.mubr.msk.bf16.mxu0 %vm1944_vm2, %v2846_v20  ;;  %v8183_v20 = vld [vmem:[%s10087_s9 + $0x18] sm:$0xff]  }
 0x230   : > { %v2414_v6 = vpop.f32.mrf.mxu1  ;;  %7672 = vmatmul.mubr.msk.bf16.gmra.mxu0 %vm1944_vm2, %v2847_v30  ;;  %7887 = vmatprep.subr.bf16.mxu0 %v8183_v20 }
 0x231   : > { %v2712_v17 = vpack.c.bf16 %v2414_v6, %v2411_v26  ;;  %v2785_v14 = vadd.bf16 %v9035_v39, %v2713_v34  ;;  %7888 = vmatpush3.bf16.msra.mxu0 %v8183_v20 }
 0x232   : > { %v7545_v5 = vpop.f32.mrf.mxu1 }
 0x233   : > { %v2784_v42 = vadd.bf16 %v9035_v39, %v2712_v17  ;;  %v2849_v54 = vmax.bf16 %v8362_v24, %v2785_v14 }
 0x234   : > { %v2427_v43 = vpop.f32.mrf.mxu1 }
 0x235   : > { %v2848_v58 = vmax.bf16 %v8362_v24, %v2784_v42 }
 0x236   : > { %v7546_v3 = vpop.f32.mrf.mxu1 }
 0x237   : > { %v2715_v48 = vpack.c.bf16 %v7546_v3, %v7545_v5  ;;  %7675 = vmatprep.mubr.msk.bf16.mxu0 %vm1944_vm2, %v2848_v58 }
 0x238   : > { %v2430_v55 = vpop.f32.mrf.mxu1  ;;  %7676 = vmatmul.mubr.msk.bf16.gmra.mxu0 %vm1944_vm2, %v2849_v54 }
 0x239   : > { %v2714_v41 = vpack.c.bf16 %v2430_v55, %v2427_v43  ;;  %v2787_v35 = vadd.bf16 %v9035_v39, %v2715_v48 }
 0x23a   : > { %v7549_v59 = vpop.f32.mrf.mxu1 }
 0x23b   : > { %v2786_v31 = vadd.bf16 %v9035_v39, %v2714_v41  ;;  %v2851_v60 = vmax.bf16 %v8362_v24, %v2787_v35 }
 0x23c   : > { %v2443_v4 = vpop.f32.mrf.mxu1 }
 0x23d   : > { %v2850_v27 = vmax.bf16 %v8362_v24, %v2786_v31 }
 0x23e   : > { %v7550_v12 = vpop.f32.mrf.mxu1 }
 0x23f   : > { %v2717_v18 = vpack.c.bf16 %v7550_v12, %v7549_v59  ;;  %7679 = vmatprep.mubr.msk.bf16.mxu0 %vm1944_vm2, %v2850_v27 }
 0x240   : > { %v2446_v62 = vpop.f32.mrf.mxu1  ;;  %7680 = vmatmul.mubr.msk.bf16.gmra.mxu0 %vm1944_vm2, %v2851_v60 }
 0x241   : > { %v2716_v11 = vpack.c.bf16 %v2446_v62, %v2443_v4  ;;  %v2789_v10 = vadd.bf16 %v9035_v39, %v2717_v18 }
 0x242   : > { %v7553_v32 = vpop.f32.mrf.mxu1 }
 0x243   : > { %v2788_v22 = vadd.bf16 %v9035_v39, %v2716_v11  ;;  %v2853_v23 = vmax.bf16 %v8362_v24, %v2789_v10 }
 0x244   : > { %v2459_v28 = vpop.f32.mrf.mxu1 }
 0x245   : > { %v2852_v21 = vmax.bf16 %v8362_v24, %v2788_v22 }
 0x246   : > { %v7554_v40 = vpop.f32.mrf.mxu1 }
 0x247   : > { %v2719_v51 = vpack.c.bf16 %v7554_v40, %v7553_v32  ;;  %7683 = vmatprep.mubr.msk.bf16.mxu0 %vm1944_vm2, %v2852_v21 }
 0x248   : > { %v2462_v45 = vpop.f32.mrf.mxu1  ;;  %7684 = vmatmul.mubr.msk.bf16.gmra.mxu0 %vm1944_vm2, %v2853_v23 }
 0x249   : > { %v2718_v16 = vpack.c.bf16 %v2462_v45, %v2459_v28  ;;  %v2791_v1 = vadd.bf16 %v9035_v39, %v2719_v51 }
 0x24a   : > { %v7557_v46 = vpop.f32.mrf.mxu1 }
 0x24b   : > { %v2790_v36 = vadd.bf16 %v9035_v39, %v2718_v16  ;;  %v2855_v47 = vmax.bf16 %v8362_v24, %v2791_v1 }
 0x24c   : > { %v2475_v29 = vpop.f32.mrf.mxu1 }
 0x24d   : > { %v2854_v7 = vmax.bf16 %v8362_v24, %v2790_v36 }
 0x24e   : > { %v7558_v8 = vpop.f32.mrf.mxu1 }
 0x24f   : > { %v2721_v61 = vpack.c.bf16 %v7558_v8, %v7557_v46  ;;  %7687 = vmatprep.mubr.msk.bf16.mxu0 %vm1944_vm2, %v2854_v7  ;;  %v8184_v7 = vld [vmem:[%s10087_s9 + $0x10] sm:$0xff]  }
 0x250   : > { %v2478_v0 = vpop.f32.mrf.mxu1  ;;  %7688 = vmatmul.mubr.msk.bf16.gmra.mxu0 %vm1944_vm2, %v2855_v47  ;;  %7889 = vmatprep.subr.bf16.mxu0 %v8184_v7 }
 0x251   : > { %v2720_v37 = vpack.c.bf16 %v2478_v0, %v2475_v29  ;;  %v2793_v33 = vadd.bf16 %v9035_v39, %v2721_v61  ;;  %v3715_v61 = vld [vmem:[%s10084_s6] sm:$0x1]  ;;  %7890 = vmatpush3.bf16.msra.mxu0 %v8184_v7 }
 0x252   : > { %v7561_v56 = vpop.f32.mrf.mxu1 }
 0x253   : > { %v2792_v63 = vadd.bf16 %v9035_v39, %v2720_v37  ;;  %v2857_v2 = vmax.bf16 %v8362_v24, %v2793_v33 }
 0x254   : > { %v2491_v50 = vpop.f32.mrf.mxu1 }
 0x255   : > { %v2856_v57 = vmax.bf16 %v8362_v24, %v2792_v63 }
 0x256   : > { %v7562_v49 = vpop.f32.mrf.mxu1 }
 0x257   : > { %v2723_v38 = vpack.c.bf16 %v7562_v49, %v7561_v56  ;;  %7691 = vmatprep.mubr.msk.bf16.mxu0 %vm1944_vm2, %v2856_v57 }
 0x258   : > { %v2494_v53 = vpop.f32.mrf.mxu1  ;;  %7692 = vmatmul.mubr.msk.bf16.gmra.mxu0 %vm1944_vm2, %v2857_v2 }
 0x259   : > { %v2722_v19 = vpack.c.bf16 %v2494_v53, %v2491_v50  ;;  %v2795_v44 = vadd.bf16 %v9035_v39, %v2723_v38  ;;  %v3717_v50 = vpack.i.b16 %v3715_v61, %v3715_v61 }
 0x25a   : > { %v7565_v52 = vpop.f32.mrf.mxu1 }
 0x25b   : > { %v2794_v26 = vadd.bf16 %v9035_v39, %v2722_v19  ;;  %v2859_v34 = vmax.bf16 %v8362_v24, %v2795_v44 }
 0x25c   : > { %v2507_v30 = vpop.f32.mrf.mxu1 }
 0x25d   : > { %v2858_v15 = vmax.bf16 %v8362_v24, %v2794_v26 }
 0x25e   : > { %v7566_v6 = vpop.f32.mrf.mxu1 }
 0x25f   : > { %v2725_v17 = vpack.c.bf16 %v7566_v6, %v7565_v52  ;;  %7695 = vmatprep.mubr.msk.bf16.mxu0 %vm1944_vm2, %v2858_v15  ;;  %v9273_v52 = vrot.slane %v3717_v50, %v8686_v13 }
 0x260   : > { %v2510_v14 = vpop.f32.mrf.mxu1  ;;  %7696 = vmatmul.mubr.msk.bf16.gmra.mxu0 %vm1944_vm2, %v2859_v34 }
 0x261   : > { %v2724_v5 = vpack.c.bf16 %v2510_v14, %v2507_v30  ;;  %v2797_v42 = vadd.bf16 %v9035_v39, %v2725_v17 }
 0x262   : > { %v7569_v43 = vpop.f32.mrf.mxu1 }
 0x263   : > { %v2796_v58 = vadd.bf16 %v9035_v39, %v2724_v5  ;;  %v2861_v48 = vmax.bf16 %v8362_v24, %v2797_v42 }
 0x264   : > { %v2523_v54 = vpop.f32.mrf.mxu1 }
 0x265   : > { %v2860_v3 = vmax.bf16 %v8362_v24, %v2796_v58 }
 0x266   : > { %v7570_v55 = vpop.f32.mrf.mxu1 }
 0x267   : > { %v2727_v41 = vpack.c.bf16 %v7570_v55, %v7569_v43  ;;  %7699 = vmatprep.mubr.msk.bf16.mxu0 %vm1944_vm2, %v2860_v3 }
 0x268   : > { %v2526_v35 = vpop.f32.mrf.mxu1  ;;  %7700 = vmatmul.mubr.msk.bf16.gmra.mxu0 %vm1944_vm2, %v2861_v48 }
 0x269   : > { %v2726_v59 = vpack.c.bf16 %v2526_v35, %v2523_v54  ;;  %v2799_v31 = vadd.bf16 %v9035_v39, %v2727_v41 }
 0x26a   : > { %v7573_v25 = vpop.f32.mrf.mxu1 }
 0x26b   : > { %v2798_v4 = vadd.bf16 %v9035_v39, %v2726_v59  ;;  %v2863_v12 = vmax.bf16 %v8362_v24, %v2799_v31 }
 0x26c   : > { %v2539_v27 = vpop.f32.mrf.mxu1 }
 0x26d   : > { %v2862_v60 = vmax.bf16 %v8362_v24, %v2798_v4 }
 0x26e   : > { %v7574_v18 = vpop.f32.mrf.mxu1 }
 0x26f   : > { %v2729_v62 = vpack.c.bf16 %v7574_v18, %v7573_v25  ;;  %7703 = vmatprep.mubr.msk.bf16.mxu0 %vm1944_vm2, %v2862_v60 }
 0x270   : > { %v2542_v11 = vpop.f32.mrf.mxu1  ;;  %7704 = vmatmul.mubr.msk.bf16.gmra.mxu0 %vm1944_vm2, %v2863_v12 }
 0x271   : > { %v2728_v10 = vpack.c.bf16 %v2542_v11, %v2539_v27  ;;  %v2801_v32 = vadd.bf16 %v9035_v39, %v2729_v62 }
 0x272   : > { %v7577_v22 = vpop.f32.mrf.mxu1 }
 0x273   : > { %v2800_v28 = vadd.bf16 %v9035_v39, %v2728_v10  ;;  %v2865_v40 = vmax.bf16 %v8362_v24, %v2801_v32 }
 0x274   : > { %v2555_v21 = vpop.f32.mrf.mxu1 }
 0x275   : > { %v2864_v23 = vmax.bf16 %v8362_v24, %v2800_v28 }
 0x276   : > { %v7578_v51 = vpop.f32.mrf.mxu1 }
 0x277   : > { %v2731_v45 = vpack.c.bf16 %v7578_v51, %v7577_v22  ;;  %7707 = vmatprep.mubr.msk.bf16.mxu0 %vm1944_vm2, %v2864_v23 }
 0x278   : > { %v2558_v16 = vpop.f32.mrf.mxu1  ;;  %7708 = vmatmul.mubr.msk.bf16.gmra.mxu0 %vm1944_vm2, %v2865_v40 }
 0x279   : > { %v2730_v1 = vpack.c.bf16 %v2558_v16, %v2555_v21  ;;  %v2803_v46 = vadd.bf16 %v9035_v39, %v2731_v45 }
 0x27a   : > { %v7581_v36 = vpop.f32.mrf.mxu1 }
 0x27b   : > { %v2802_v29 = vadd.bf16 %v9035_v39, %v2730_v1  ;;  %v2867_v0 = vmax.bf16 %v8362_v24, %v2803_v46 }
 0x27c   : > { %v2571_v47 = vpop.f32.mrf.mxu1 }
 0x27d   : > { %v2866_v8 = vmax.bf16 %v8362_v24, %v2802_v29 }
 0x27e   : > { %v7582_v37 = vpop.f32.mrf.mxu1 }
 0x27f   : > { %v2733_v33 = vpack.c.bf16 %v7582_v37, %v7581_v36  ;;  %7711 = vmatprep.mubr.msk.bf16.mxu0 %vm1944_vm2, %v2866_v8 }
 0x280   : > { %v2574_v56 = vpop.f32.mrf.mxu1  ;;  %v7617_v63 = vpop.f32.mrf.mxu0  ;;  %7712 = vmatmul.mubr.msk.bf16.gmra.mxu0 %vm1944_vm2, %v2867_v0 }
 0x281   : > { %v2732_v57 = vpack.c.bf16 %v2574_v56, %v2571_v47  ;;  %v2805_v2 = vadd.bf16 %v9035_v39, %v2733_v33 }
 0x282   : > { %v7585_v49 = vpop.f32.mrf.mxu1  ;;  %v3140_v38 = vpop.f32.mrf.mxu0 }
 0x283   : > { %v2804_v53 = vadd.bf16 %v9035_v39, %v2732_v57  ;;  %v2869_v30 = vmax.bf16 %v8362_v24, %v2805_v2 }
 0x284   : > { %v2587_v19 = vpop.f32.mrf.mxu1  ;;  %v7618_v44 = vpop.f32.mrf.mxu0 }
 0x285   : > { %v2868_v26 = vmax.bf16 %v8362_v24, %v2804_v53  ;;  %v3652_v20 = vpack.c.bf16 %v7618_v44, %v7617_v63 }
 0x286   : > { %v7586_v15 = vpop.f32.mrf.mxu1  ;;  %v3143_v34 = vpop.f32.mrf.mxu0 }
 0x287   : > { %v2735_v6 = vpack.c.bf16 %v7586_v15, %v7585_v49  ;;  %v3651_v17 = vpack.c.bf16 %v3143_v34, %v3140_v38  ;;  %7715 = vmatprep.mubr.msk.bf16.mxu0 %vm1944_vm2, %v2868_v26  ;;  %v3724_v14 = vadd.bf16 %v9273_v52, %v3652_v20 }
 0x288   : > { %v2590_v5 = vpop.f32.mrf.mxu1  ;;  %v7621_v42 = vpop.f32.mrf.mxu0  ;;  %7716 = vmatmul.mubr.msk.bf16.gmra.mxu0 %vm1944_vm2, %v2869_v30 }
 0x289   : > { %v3723_v43 = vadd.bf16 %v9273_v52, %v3651_v17  ;;  %v2734_v58 = vpack.c.bf16 %v2590_v5, %v2587_v19  ;;  %v2807_v54 = vadd.bf16 %v9035_v39, %v2735_v6  ;;  %v3788_v35 = vmax.bf16 %v8362_v24, %v3724_v14  ;;  %v8185_v19 = vld [vmem:[%s10087_s9 + $0x8] sm:$0xff]  }
 0x28a   : > { %v7589_v3 = vpop.f32.mrf.mxu1  ;;  %v3156_v48 = vpop.f32.mrf.mxu0  ;;  %7891 = vmatprep.subr.bf16.mxu0 %v8185_v19 }
 0x28b   : > { %v3787_v55 = vmax.bf16 %v8362_v24, %v3723_v43  ;;  %v2806_v41 = vadd.bf16 %v9035_v39, %v2734_v58  ;;  %v2871_v27 = vmax.bf16 %v8362_v24, %v2807_v54  ;;  %7892 = vmatpush3.bf16.msra.mxu0 %v8185_v19 }
 0x28c   : > { %v2603_v59 = vpop.f32.mrf.mxu1  ;;  %v7622_v31 = vpop.f32.mrf.mxu0 }
 0x28d   : > { %v2870_v25 = vmax.bf16 %v8362_v24, %v2806_v41  ;;  %v3654_v4 = vpack.c.bf16 %v7622_v31, %v7621_v42  ;;  %7751 = vmatprep.mubr.msk.bf16.mxu1 %vm1944_vm2, %v3787_v55 }
 0x28e   : > { %v7590_v60 = vpop.f32.mrf.mxu1  ;;  %v3159_v12 = vpop.f32.mrf.mxu0  ;;  %7752 = vmatmul.mubr.msk.bf16.vlgmr.msra.gmra.mxu1 %vm1944_vm2, %v3788_v35 }
 0x28f   : > { %v2737_v18 = vpack.c.bf16 %v7590_v60, %v7589_v3  ;;  %v3653_v62 = vpack.c.bf16 %v3159_v12, %v3156_v48  ;;  %7719 = vmatprep.mubr.msk.bf16.mxu0 %vm1944_vm2, %v2870_v25  ;;  %v3726_v11 = vadd.bf16 %v9273_v52, %v3654_v4 }
 0x290   : > { %v2606_v10 = vpop.f32.mrf.mxu1  ;;  %v7625_v32 = vpop.f32.mrf.mxu0  ;;  %7720 = vmatmul.mubr.msk.bf16.gmra.mxu0 %vm1944_vm2, %v2871_v27 }
 0x291   : > { %v3725_v22 = vadd.bf16 %v9273_v52, %v3653_v62  ;;  %v2736_v28 = vpack.c.bf16 %v2606_v10, %v2603_v59  ;;  %v2809_v21 = vadd.bf16 %v9035_v39, %v2737_v18  ;;  %v3790_v16 = vmax.bf16 %v8362_v24, %v3726_v11 }
 0x292   : > { %v7593_v23 = vpop.f32.mrf.mxu1  ;;  %v3172_v40 = vpop.f32.mrf.mxu0 }
 0x293   : > { %v3789_v51 = vmax.bf16 %v8362_v24, %v3725_v22  ;;  %v2808_v45 = vadd.bf16 %v9035_v39, %v2736_v28  ;;  %v2873_v7 = vmax.bf16 %v8362_v24, %v2809_v21 }
 0x294   : > { %v2619_v1 = vpop.f32.mrf.mxu1  ;;  %v7626_v46 = vpop.f32.mrf.mxu0 }
 0x295   : > { %v2872_v36 = vmax.bf16 %v8362_v24, %v2808_v45  ;;  %v3656_v29 = vpack.c.bf16 %v7626_v46, %v7625_v32  ;;  %7755 = vmatprep.mubr.msk.bf16.mxu1 %vm1944_vm2, %v3789_v51 }
 0x296   : > { %v7594_v47 = vpop.f32.mrf.mxu1  ;;  %v3175_v8 = vpop.f32.mrf.mxu0  ;;  %7756 = vmatmul.mubr.msk.bf16.gmra.mxu1 %vm1944_vm2, %v3790_v16 }
 0x297   : > { %v2739_v61 = vpack.c.bf16 %v7594_v47, %v7593_v23  ;;  %v3655_v0 = vpack.c.bf16 %v3175_v8, %v3172_v40  ;;  %7723 = vmatprep.mubr.msk.bf16.mxu0 %vm1944_vm2, %v2872_v36  ;;  %v3728_v37 = vadd.bf16 %v9273_v52, %v3656_v29 }
 0x298   : > { %v2622_v33 = vpop.f32.mrf.mxu1  ;;  %v7629_v56 = vpop.f32.mrf.mxu0  ;;  %7724 = vmatmul.mubr.msk.bf16.gmra.mxu0 %vm1944_vm2, %v2873_v7 }
 0x299   : > { %v3727_v63 = vadd.bf16 %v9273_v52, %v3655_v0  ;;  %v2738_v50 = vpack.c.bf16 %v2622_v33, %v2619_v1  ;;  %v2811_v57 = vadd.bf16 %v9035_v39, %v2739_v61  ;;  %v3792_v44 = vmax.bf16 %v8362_v24, %v3728_v37 }
 0x29a   : > { %v7597_v2 = vpop.f32.mrf.mxu1  ;;  %v3188_v49 = vpop.f32.mrf.mxu0 }
 0x29b   : > { %v3791_v38 = vmax.bf16 %v8362_v24, %v3727_v63  ;;  %v2810_v53 = vadd.bf16 %v9035_v39, %v2738_v50  ;;  %v2875_v34 = vmax.bf16 %v8362_v24, %v2811_v57 }
 0x29c   : > { %v2635_v26 = vpop.f32.mrf.mxu1  ;;  %v7630_v20 = vpop.f32.mrf.mxu0 }
 0x29d   : > { %v2874_v30 = vmax.bf16 %v8362_v24, %v2810_v53  ;;  %v3658_v15 = vpack.c.bf16 %v7630_v20, %v7629_v56  ;;  %7759 = vmatprep.mubr.msk.bf16.mxu1 %vm1944_vm2, %v3791_v38 }
 0x29e   : > { %v7598_v6 = vpop.f32.mrf.mxu1  ;;  %v3191_v17 = vpop.f32.mrf.mxu0  ;;  %7760 = vmatmul.mubr.msk.bf16.gmra.mxu1 %vm1944_vm2, %v3792_v44 }
 0x29f   : > { %v2741_v14 = vpack.c.bf16 %v7598_v6, %v7597_v2  ;;  %v3657_v5 = vpack.c.bf16 %v3191_v17, %v3188_v49  ;;  %7727 = vmatprep.mubr.msk.bf16.mxu0 %vm1944_vm2, %v2874_v30  ;;  %v3730_v42 = vadd.bf16 %v9273_v52, %v3658_v15 }
 0x2a0   : > { %v2638_v43 = vpop.f32.mrf.mxu1  ;;  %v7633_v58 = vpop.f32.mrf.mxu0  ;;  %7728 = vmatmul.mubr.msk.bf16.gmra.mxu0 %vm1944_vm2, %v2875_v34 }
 0x2a1   : > { %v3729_v54 = vadd.bf16 %v9273_v52, %v3657_v5  ;;  %v2740_v3 = vpack.c.bf16 %v2638_v43, %v2635_v26  ;;  %v2813_v48 = vadd.bf16 %v9035_v39, %v2741_v14  ;;  %v3794_v31 = vmax.bf16 %v8362_v24, %v3730_v42  ;;  %v8186_v43 = vld [vmem:[%s10087_s9] sm:$0xff]  }
 0x2a2   : > { %v7601_v55 = vpop.f32.mrf.mxu1  ;;  %v3204_v41 = vpop.f32.mrf.mxu0  ;;  %7893 = vmatprep.subr.bf16.mxu0 %v8186_v43 }
 0x2a3   : > { %v3793_v35 = vmax.bf16 %v8362_v24, %v3729_v54  ;;  %v2812_v59 = vadd.bf16 %v9035_v39, %v2740_v3  ;;  %v2877_v12 = vmax.bf16 %v8362_v24, %v2813_v48  ;;  %7894 = vmatpush3.bf16.msra.mxu0 %v8186_v43 }
 0x2a4   : > { %v2651_v25 = vpop.f32.mrf.mxu1  ;;  %v7634_v4 = vpop.f32.mrf.mxu0 }
 0x2a5   : > { %v2876_v27 = vmax.bf16 %v8362_v24, %v2812_v59  ;;  %v3660_v60 = vpack.c.bf16 %v7634_v4, %v7633_v58  ;;  %7763 = vmatprep.mubr.msk.bf16.mxu1 %vm1944_vm2, %v3793_v35 }
 0x2a6   : > { %v7602_v18 = vpop.f32.mrf.mxu1  ;;  %v3207_v62 = vpop.f32.mrf.mxu0  ;;  %7764 = vmatmul.mubr.msk.bf16.gmra.mxu1 %vm1944_vm2, %v3794_v31 }
 0x2a7   : > { %v2743_v11 = vpack.c.bf16 %v7602_v18, %v7601_v55  ;;  %v3659_v10 = vpack.c.bf16 %v3207_v62, %v3204_v41  ;;  %7731 = vmatprep.mubr.msk.bf16.mxu0 %vm1944_vm2, %v2876_v27  ;;  %v3732_v32 = vadd.bf16 %v9273_v52, %v3660_v60 }
 0x2a8   : > { %v2654_v22 = vpop.f32.mrf.mxu1  ;;  %v7637_v28 = vpop.f32.mrf.mxu0  ;;  %7732 = vmatmul.mubr.msk.bf16.gmra.mxu0 %vm1944_vm2, %v2877_v12 }
 0x2a9   : > { %v3731_v21 = vadd.bf16 %v9273_v52, %v3659_v10  ;;  %v2742_v23 = vpack.c.bf16 %v2654_v22, %v2651_v25  ;;  %v2815_v40 = vadd.bf16 %v9035_v39, %v2743_v11  ;;  %v3796_v46 = vmax.bf16 %v8362_v24, %v3732_v32 }
 0x2aa   : > { %v7605_v51 = vpop.f32.mrf.mxu1  ;;  %v3220_v45 = vpop.f32.mrf.mxu0 }
 0x2ab   : > { %v3795_v16 = vmax.bf16 %v8362_v24, %v3731_v21  ;;  %v2814_v1 = vadd.bf16 %v9035_v39, %v2742_v23  ;;  %v2879_v8 = vmax.bf16 %v8362_v24, %v2815_v40 }
 0x2ac   : > { %v2667_v36 = vpop.f32.mrf.mxu1  ;;  %v7638_v29 = vpop.f32.mrf.mxu0 }
 0x2ad   : > { %v2878_v7 = vmax.bf16 %v8362_v24, %v2814_v1  ;;  %v3662_v47 = vpack.c.bf16 %v7638_v29, %v7637_v28  ;;  %7767 = vmatprep.mubr.msk.bf16.mxu1 %vm1944_vm2, %v3795_v16 }
 0x2ae   : > { %v7606_v61 = vpop.f32.mrf.mxu1  ;;  %v3223_v0 = vpop.f32.mrf.mxu0  ;;  %7768 = vmatmul.mubr.msk.bf16.gmra.mxu1 %vm1944_vm2, %v3796_v46 }
 0x2af   : > { %v2745_v37 = vpack.c.bf16 %v7606_v61, %v7605_v51  ;;  %v3661_v33 = vpack.c.bf16 %v3223_v0, %v3220_v45  ;;  %7735 = vmatprep.mubr.msk.bf16.mxu0 %vm1944_vm2, %v2878_v7  ;;  %v3734_v56 = vadd.bf16 %v9273_v52, %v3662_v47 }
 0x2b0   : > { %v2670_v63 = vpop.f32.mrf.mxu1  ;;  %v7641_v50 = vpop.f32.mrf.mxu0  ;;  %7736 = vmatmul.mubr.msk.bf16.gmra.mxu0 %vm1944_vm2, %v2879_v8 }
 0x2b1   : > { %v3733_v57 = vadd.bf16 %v9273_v52, %v3661_v33  ;;  %v2744_v2 = vpack.c.bf16 %v2670_v63, %v2667_v36  ;;  %v2817_v49 = vadd.bf16 %v9035_v39, %v2745_v37  ;;  %v3798_v44 = vmax.bf16 %v8362_v24, %v3734_v56 }
 0x2b2   : > { %v3236_v38 = vpop.f32.mrf.mxu0 }
 0x2b3   : > { %v3797_v53 = vmax.bf16 %v8362_v24, %v3733_v57  ;;  %v2816_v19 = vadd.bf16 %v9035_v39, %v2744_v2  ;;  %v2881_v15 = vmax.bf16 %v8362_v24, %v2817_v49 }
 0x2b4   : > { %v7642_v26 = vpop.f32.mrf.mxu0 }
 0x2b5   : > { %v2880_v20 = vmax.bf16 %v8362_v24, %v2816_v19  ;;  %v3664_v30 = vpack.c.bf16 %v7642_v26, %v7641_v50  ;;  %7771 = vmatprep.mubr.msk.bf16.mxu1 %vm1944_vm2, %v3797_v53 }
 0x2b6   : > { %v3239_v34 = vpop.f32.mrf.mxu0  ;;  %7772 = vmatmul.mubr.msk.bf16.gmra.mxu1 %vm1944_vm2, %v3798_v44 }
 0x2b7   : > { %v3663_v6 = vpack.c.bf16 %v3239_v34, %v3236_v38  ;;  %7739 = vmatprep.mubr.msk.bf16.mxu0 %vm1944_vm2, %v2880_v20  ;;  %v3736_v17 = vadd.bf16 %v9273_v52, %v3664_v30 }
 0x2b8   : > { %v7645_v14 = vpop.f32.mrf.mxu0  ;;  %7740 = vmatmul.mubr.msk.bf16.gmra.mxu0 %vm1944_vm2, %v2881_v15 }
 0x2b9   : > { %v3735_v39 = vadd.bf16 %v9273_v52, %v3663_v6  ;;  %v3800_v58 = vmax.bf16 %v8362_v24, %v3736_v17 }
 0x2ba   : > { %v3252_v5 = vpop.f32.mrf.mxu0 }
 0x2bb   : > { %v3799_v42 = vmax.bf16 %v8362_v24, %v3735_v39 }
 0x2bc   : > { %v7646_v54 = vpop.f32.mrf.mxu0 }
 0x2bd   : > { %v3666_v3 = vpack.c.bf16 %v7646_v54, %v7645_v14  ;;  %7775 = vmatprep.mubr.msk.bf16.mxu1 %vm1944_vm2, %v3799_v42 }
 0x2be   : > { %v3255_v48 = vpop.f32.mrf.mxu0  ;;  %7776 = vmatmul.mubr.msk.bf16.gmra.mxu1 %vm1944_vm2, %v3800_v58 }
 0x2bf   : > { %v3665_v55 = vpack.c.bf16 %v3255_v48, %v3252_v5  ;;  %v3738_v41 = vadd.bf16 %v9273_v52, %v3666_v3 }
 0x2c0   : > { %v7649_v35 = vpop.f32.mrf.mxu0 }
 0x2c1   : > { %v3737_v59 = vadd.bf16 %v9273_v52, %v3665_v55  ;;  %v3802_v4 = vmax.bf16 %v8362_v24, %v3738_v41 }
 0x2c2   : > { %v3268_v31 = vpop.f32.mrf.mxu0 }
 0x2c3   : > { %v3801_v25 = vmax.bf16 %v8362_v24, %v3737_v59 }
 0x2c4   : > { %v7650_v27 = vpop.f32.mrf.mxu0 }
 0x2c5   : > { %v3668_v60 = vpack.c.bf16 %v7650_v27, %v7649_v35  ;;  %7779 = vmatprep.mubr.msk.bf16.mxu1 %vm1944_vm2, %v3801_v25 }
 0x2c6   : > { %v3271_v12 = vpop.f32.mrf.mxu0  ;;  %7780 = vmatmul.mubr.msk.bf16.gmra.mxu1 %vm1944_vm2, %v3802_v4 }
 0x2c7   : > { %v3667_v18 = vpack.c.bf16 %v3271_v12, %v3268_v31  ;;  %v3740_v62 = vadd.bf16 %v9273_v52, %v3668_v60 }
 0x2c8   : > { %v7653_v11 = vpop.f32.mrf.mxu0 }
 0x2c9   : > { %v3739_v10 = vadd.bf16 %v9273_v52, %v3667_v18  ;;  %v3804_v28 = vmax.bf16 %v8362_v24, %v3740_v62 }
 0x2ca   : > { %v3284_v32 = vpop.f32.mrf.mxu0 }
 0x2cb   : > { %v3803_v22 = vmax.bf16 %v8362_v24, %v3739_v10 }
 0x2cc   : > { %v7654_v21 = vpop.f32.mrf.mxu0 }
 0x2cd   : > { %v3670_v23 = vpack.c.bf16 %v7654_v21, %v7653_v11  ;;  %7783 = vmatprep.mubr.msk.bf16.mxu1 %vm1944_vm2, %v3803_v22 }
 0x2ce   : > { %v3287_v40 = vpop.f32.mrf.mxu0  ;;  %7784 = vmatmul.mubr.msk.bf16.gmra.mxu1 %vm1944_vm2, %v3804_v28 }
 0x2cf   : > { %v3669_v51 = vpack.c.bf16 %v3287_v40, %v3284_v32  ;;  %v3742_v45 = vadd.bf16 %v9273_v52, %v3670_v23 }
 0x2d0   : > { %v7657_v16 = vpop.f32.mrf.mxu0 }
 0x2d1   : > { %v3741_v1 = vadd.bf16 %v9273_v52, %v3669_v51  ;;  %v3806_v29 = vmax.bf16 %v8362_v24, %v3742_v45 }
 0x2d2   : > { %v3300_v46 = vpop.f32.mrf.mxu0 }
 0x2d3   : > { %v3805_v36 = vmax.bf16 %v8362_v24, %v3741_v1 }
 0x2d4   : > { %v7658_v7 = vpop.f32.mrf.mxu0 }
 0x2d5   : > { %v3672_v47 = vpack.c.bf16 %v7658_v7, %v7657_v16  ;;  %7787 = vmatprep.mubr.msk.bf16.mxu1 %vm1944_vm2, %v3805_v36 }
 0x2d6   : > { %v3303_v8 = vpop.f32.mrf.mxu0  ;;  %7788 = vmatmul.mubr.msk.bf16.gmra.mxu1 %vm1944_vm2, %v3806_v29 }
 0x2d7   : > { %v3671_v61 = vpack.c.bf16 %v3303_v8, %v3300_v46  ;;  %v3744_v0 = vadd.bf16 %v9273_v52, %v3672_v47 }
 0x2d8   : > { %v7661_v37 = vpop.f32.mrf.mxu0 }
 0x2d9   : > { %v3743_v33 = vadd.bf16 %v9273_v52, %v3671_v61  ;;  %v3808_v50 = vmax.bf16 %v8362_v24, %v3744_v0 }
 0x2da   : > { %v3316_v56 = vpop.f32.mrf.mxu0 }
 0x2db   : > { %v3807_v63 = vmax.bf16 %v8362_v24, %v3743_v33 }
 0x2dc   : > { %v7662_v57 = vpop.f32.mrf.mxu0 }
 0x2dd   : > { %v3674_v2 = vpack.c.bf16 %v7662_v57, %v7661_v37  ;;  %7791 = vmatprep.mubr.msk.bf16.mxu1 %vm1944_vm2, %v3807_v63 }
 0x2de   : > { %v3319_v49 = vpop.f32.mrf.mxu0  ;;  %7792 = vmatmul.mubr.msk.bf16.gmra.mxu1 %vm1944_vm2, %v3808_v50 }
 0x2df   : > { %v3673_v38 = vpack.c.bf16 %v3319_v49, %v3316_v56  ;;  %v3746_v53 = vadd.bf16 %v9273_v52, %v3674_v2 }
 0x2e0   : > { %v7665_v19 = vpop.f32.mrf.mxu0 }
 0x2e1   : > { %v3745_v44 = vadd.bf16 %v9273_v52, %v3673_v38  ;;  %v3810_v30 = vmax.bf16 %v8362_v24, %v3746_v53 }
 0x2e2   : > { %v3332_v26 = vpop.f32.mrf.mxu0 }
 0x2e3   : > { %v3809_v20 = vmax.bf16 %v8362_v24, %v3745_v44 }
 0x2e4   : > { %v7666_v15 = vpop.f32.mrf.mxu0 }
 0x2e5   : > { %v3676_v34 = vpack.c.bf16 %v7666_v15, %v7665_v19  ;;  %7795 = vmatprep.mubr.msk.bf16.mxu1 %vm1944_vm2, %v3809_v20 }
 0x2e6   : > { %v3335_v6 = vpop.f32.mrf.mxu0  ;;  %7796 = vmatmul.mubr.msk.bf16.gmra.mxu1 %vm1944_vm2, %v3810_v30 }
 0x2e7   : > { %v3675_v17 = vpack.c.bf16 %v3335_v6, %v3332_v26  ;;  %v3748_v14 = vadd.bf16 %v9273_v52, %v3676_v34 }
 0x2e8   : > { %v7669_v39 = vpop.f32.mrf.mxu0 }
 0x2e9   : > { %v3747_v5 = vadd.bf16 %v9273_v52, %v3675_v17  ;;  %v3812_v58 = vmax.bf16 %v8362_v24, %v3748_v14 }
 0x2ea   : > { %v3348_v42 = vpop.f32.mrf.mxu0 }
 0x2eb   : > { %v3811_v43 = vmax.bf16 %v8362_v24, %v3747_v5 }
 0x2ec   : > { %v7670_v54 = vpop.f32.mrf.mxu0 }
 0x2ed   : > { %v3678_v3 = vpack.c.bf16 %v7670_v54, %v7669_v39  ;;  %7799 = vmatprep.mubr.msk.bf16.mxu1 %vm1944_vm2, %v3811_v43 }
 0x2ee   : > { %v3351_v48 = vpop.f32.mrf.mxu0  ;;  %7800 = vmatmul.mubr.msk.bf16.gmra.mxu1 %vm1944_vm2, %v3812_v58 }
 0x2ef   : > { %v3677_v55 = vpack.c.bf16 %v3351_v48, %v3348_v42  ;;  %v3750_v41 = vadd.bf16 %v9273_v52, %v3678_v3 }
 0x2f0   : > { %v7673_v35 = vpop.f32.mrf.mxu0 }
 0x2f1   : > { %v3749_v59 = vadd.bf16 %v9273_v52, %v3677_v55  ;;  %v3814_v4 = vmax.bf16 %v8362_v24, %v3750_v41 }
 0x2f2   : > { %v3364_v31 = vpop.f32.mrf.mxu0 }
 0x2f3   : > { %v3813_v25 = vmax.bf16 %v8362_v24, %v3749_v59 }
 0x2f4   : > { %v7674_v27 = vpop.f32.mrf.mxu0 }
 0x2f5   : > { %v3680_v60 = vpack.c.bf16 %v7674_v27, %v7673_v35  ;;  %7803 = vmatprep.mubr.msk.bf16.mxu1 %vm1944_vm2, %v3813_v25 }
 0x2f6   : > { %v3367_v12 = vpop.f32.mrf.mxu0  ;;  %7804 = vmatmul.mubr.msk.bf16.gmra.mxu1 %vm1944_vm2, %v3814_v4 }
 0x2f7   : > { %v3679_v18 = vpack.c.bf16 %v3367_v12, %v3364_v31  ;;  %v3752_v62 = vadd.bf16 %v9273_v52, %v3680_v60 }
 0x2f8   : > { %v7677_v11 = vpop.f32.mrf.mxu0 }
 0x2f9   : > { %v3751_v10 = vadd.bf16 %v9273_v52, %v3679_v18  ;;  %v3816_v28 = vmax.bf16 %v8362_v24, %v3752_v62 }
 0x2fa   : > { %v3380_v32 = vpop.f32.mrf.mxu0 }
 0x2fb   : > { %v3815_v22 = vmax.bf16 %v8362_v24, %v3751_v10 }
 0x2fc   : > { %v7678_v21 = vpop.f32.mrf.mxu0 }
 0x2fd   : > { %v3682_v23 = vpack.c.bf16 %v7678_v21, %v7677_v11  ;;  %7807 = vmatprep.mubr.msk.bf16.mxu1 %vm1944_vm2, %v3815_v22 }
 0x2fe   : > { %v3383_v40 = vpop.f32.mrf.mxu0  ;;  %7808 = vmatmul.mubr.msk.bf16.gmra.mxu1 %vm1944_vm2, %v3816_v28 }
 0x2ff   : > { %v3681_v51 = vpack.c.bf16 %v3383_v40, %v3380_v32  ;;  %v3754_v45 = vadd.bf16 %v9273_v52, %v3682_v23 }
 0x300   : > { %v7681_v16 = vpop.f32.mrf.mxu0 }
 0x301   : > { %v3753_v1 = vadd.bf16 %v9273_v52, %v3681_v51  ;;  %v3818_v29 = vmax.bf16 %v8362_v24, %v3754_v45 }
 0x302   : > { %v3396_v46 = vpop.f32.mrf.mxu0 }
 0x303   : > { %v3817_v36 = vmax.bf16 %v8362_v24, %v3753_v1 }
 0x304   : > { %v7682_v7 = vpop.f32.mrf.mxu0 }
 0x305   : > { %v3684_v47 = vpack.c.bf16 %v7682_v7, %v7681_v16  ;;  %7811 = vmatprep.mubr.msk.bf16.mxu1 %vm1944_vm2, %v3817_v36 }
 0x306   : > { %v3399_v8 = vpop.f32.mrf.mxu0  ;;  %7812 = vmatmul.mubr.msk.bf16.gmra.mxu1 %vm1944_vm2, %v3818_v29 }
 0x307   : > { %v3683_v61 = vpack.c.bf16 %v3399_v8, %v3396_v46  ;;  %v3756_v0 = vadd.bf16 %v9273_v52, %v3684_v47 }
 0x308   : > { %v7685_v37 = vpop.f32.mrf.mxu0 }
 0x309   : > { %v3755_v33 = vadd.bf16 %v9273_v52, %v3683_v61  ;;  %v3820_v50 = vmax.bf16 %v8362_v24, %v3756_v0 }
 0x30a   : > { %v3412_v56 = vpop.f32.mrf.mxu0 }
 0x30b   : > { %v3819_v63 = vmax.bf16 %v8362_v24, %v3755_v33 }
 0x30c   : > { %v7686_v57 = vpop.f32.mrf.mxu0 }
 0x30d   : > { %v3686_v2 = vpack.c.bf16 %v7686_v57, %v7685_v37  ;;  %7815 = vmatprep.mubr.msk.bf16.mxu1 %vm1944_vm2, %v3819_v63 }
 0x30e   : > { %v3415_v49 = vpop.f32.mrf.mxu0  ;;  %7816 = vmatmul.mubr.msk.bf16.gmra.mxu1 %vm1944_vm2, %v3820_v50 }
 0x30f   : > { %v3685_v38 = vpack.c.bf16 %v3415_v49, %v3412_v56  ;;  %v3758_v53 = vadd.bf16 %v9273_v52, %v3686_v2 }
 0x310   : > { %v7689_v19 = vpop.f32.mrf.mxu0 }
 0x311   : > { %v3757_v44 = vadd.bf16 %v9273_v52, %v3685_v38  ;;  %v3822_v30 = vmax.bf16 %v8362_v24, %v3758_v53 }
 0x312   : > { %v3428_v26 = vpop.f32.mrf.mxu0 }
 0x313   : > { %v3821_v20 = vmax.bf16 %v8362_v24, %v3757_v44 }
 0x314   : > { %v7690_v15 = vpop.f32.mrf.mxu0 }
 0x315   : > { %v3688_v34 = vpack.c.bf16 %v7690_v15, %v7689_v19  ;;  %7819 = vmatprep.mubr.msk.bf16.mxu1 %vm1944_vm2, %v3821_v20 }
 0x316   : > { %v3431_v6 = vpop.f32.mrf.mxu0  ;;  %7820 = vmatmul.mubr.msk.bf16.gmra.mxu1 %vm1944_vm2, %v3822_v30 }
 0x317   : > { %v3687_v17 = vpack.c.bf16 %v3431_v6, %v3428_v26  ;;  %v3760_v14 = vadd.bf16 %v9273_v52, %v3688_v34 }
 0x318   : > { %v7693_v39 = vpop.f32.mrf.mxu0 }
 0x319   : > { %v3759_v5 = vadd.bf16 %v9273_v52, %v3687_v17  ;;  %v3824_v58 = vmax.bf16 %v8362_v24, %v3760_v14 }
 0x31a   : > { %v3444_v42 = vpop.f32.mrf.mxu0 }
 0x31b   : > { %v3823_v43 = vmax.bf16 %v8362_v24, %v3759_v5 }
 0x31c   : > { %v7694_v54 = vpop.f32.mrf.mxu0 }
 0x31d   : > { %v3690_v3 = vpack.c.bf16 %v7694_v54, %v7693_v39  ;;  %7823 = vmatprep.mubr.msk.bf16.mxu1 %vm1944_vm2, %v3823_v43 }
 0x31e   : > { %v3447_v48 = vpop.f32.mrf.mxu0  ;;  %7824 = vmatmul.mubr.msk.bf16.gmra.mxu1 %vm1944_vm2, %v3824_v58  ;;  %v4684_v58 = vld [vmem:[%s10086_s8] sm:$0x1] }
 0x31f   : > { %v3689_v55 = vpack.c.bf16 %v3447_v48, %v3444_v42  ;;  %v3762_v41 = vadd.bf16 %v9273_v52, %v3690_v3 }
 0x320   : > { %v7697_v35 = vpop.f32.mrf.mxu0 }
 0x321   : > { %v3761_v59 = vadd.bf16 %v9273_v52, %v3689_v55  ;;  %v3826_v4 = vmax.bf16 %v8362_v24, %v3762_v41 }
 0x322   : > { %v3460_v31 = vpop.f32.mrf.mxu0 }
 0x323   : > { %v3825_v25 = vmax.bf16 %v8362_v24, %v3761_v59 }
 0x324   : > { %v7698_v27 = vpop.f32.mrf.mxu0 }
 0x325   : > { %v3692_v60 = vpack.c.bf16 %v7698_v27, %v7697_v35  ;;  %7827 = vmatprep.mubr.msk.bf16.mxu1 %vm1944_vm2, %v3825_v25  ;;  %v4686_v35 = vpack.i.b16 %v4684_v58, %v4684_v58 }
 0x326   : > { %v3463_v12 = vpop.f32.mrf.mxu0  ;;  %7828 = vmatmul.mubr.msk.bf16.gmra.mxu1 %vm1944_vm2, %v3826_v4 }
 0x327   : > { %v3691_v18 = vpack.c.bf16 %v3463_v12, %v3460_v31  ;;  %v3764_v62 = vadd.bf16 %v9273_v52, %v3692_v60 }
 0x328   : > { %v7701_v11 = vpop.f32.mrf.mxu0 }
 0x329   : > { %v3763_v10 = vadd.bf16 %v9273_v52, %v3691_v18  ;;  %v3828_v28 = vmax.bf16 %v8362_v24, %v3764_v62  ;;  %v9477_v18 = vrot.slane %v4686_v35, %v8686_v13 }
 0x32a   : > { %v3476_v32 = vpop.f32.mrf.mxu0 }
 0x32b   : > { %v3827_v22 = vmax.bf16 %v8362_v24, %v3763_v10 }
 0x32c   : > { %v7702_v21 = vpop.f32.mrf.mxu0 }
 0x32d   : > { %v3694_v23 = vpack.c.bf16 %v7702_v21, %v7701_v11  ;;  %7831 = vmatprep.mubr.msk.bf16.mxu1 %vm1944_vm2, %v3827_v22 }
 0x32e   : > { %v3479_v40 = vpop.f32.mrf.mxu0  ;;  %7832 = vmatmul.mubr.msk.bf16.gmra.mxu1 %vm1944_vm2, %v3828_v28 }
 0x32f   : > { %v3693_v51 = vpack.c.bf16 %v3479_v40, %v3476_v32  ;;  %v3766_v45 = vadd.bf16 %v9273_v52, %v3694_v23 }
 0x330   : > { %v7705_v16 = vpop.f32.mrf.mxu0 }
 0x331   : > { %v3765_v1 = vadd.bf16 %v9273_v52, %v3693_v51  ;;  %v3830_v29 = vmax.bf16 %v8362_v24, %v3766_v45 }
 0x332   : > { %v3492_v46 = vpop.f32.mrf.mxu0 }
 0x333   : > { %v3829_v36 = vmax.bf16 %v8362_v24, %v3765_v1 }
 0x334   : > { %v7706_v7 = vpop.f32.mrf.mxu0 }
 0x335   : > { %v3696_v47 = vpack.c.bf16 %v7706_v7, %v7705_v16  ;;  %7835 = vmatprep.mubr.msk.bf16.mxu1 %vm1944_vm2, %v3829_v36 }
 0x336   : > { %v3495_v8 = vpop.f32.mrf.mxu0  ;;  %7836 = vmatmul.mubr.msk.bf16.gmra.mxu1 %vm1944_vm2, %v3830_v29 }
 0x337   : > { %v3695_v61 = vpack.c.bf16 %v3495_v8, %v3492_v46  ;;  %v3768_v0 = vadd.bf16 %v9273_v52, %v3696_v47 }
 0x338   : > { %v7709_v37 = vpop.f32.mrf.mxu0 }
 0x339   : > { %v3767_v33 = vadd.bf16 %v9273_v52, %v3695_v61  ;;  %v3832_v50 = vmax.bf16 %v8362_v24, %v3768_v0 }
 0x33a   : > { %v3508_v56 = vpop.f32.mrf.mxu0 }
 0x33b   : > { %v3831_v63 = vmax.bf16 %v8362_v24, %v3767_v33 }
 0x33c   : > { %v7710_v57 = vpop.f32.mrf.mxu0 }
 0x33d   : > { %v3698_v2 = vpack.c.bf16 %v7710_v57, %v7709_v37  ;;  %7839 = vmatprep.mubr.msk.bf16.mxu1 %vm1944_vm2, %v3831_v63 }
 0x33e   : > { %v3511_v49 = vpop.f32.mrf.mxu0  ;;  %7840 = vmatmul.mubr.msk.bf16.gmra.mxu1 %vm1944_vm2, %v3832_v50 }
 0x33f   : > { %v3697_v38 = vpack.c.bf16 %v3511_v49, %v3508_v56  ;;  %v3770_v53 = vadd.bf16 %v9273_v52, %v3698_v2 }
 0x340   : > { %v7713_v19 = vpop.f32.mrf.mxu0 }
 0x341   : > { %v3769_v44 = vadd.bf16 %v9273_v52, %v3697_v38  ;;  %v3834_v30 = vmax.bf16 %v8362_v24, %v3770_v53 }
 0x342   : > { %v3524_v26 = vpop.f32.mrf.mxu0 }
 0x343   : > { %v3833_v20 = vmax.bf16 %v8362_v24, %v3769_v44 }
 0x344   : > { %v7714_v15 = vpop.f32.mrf.mxu0 }
 0x345   : > { %v3700_v34 = vpack.c.bf16 %v7714_v15, %v7713_v19  ;;  %7843 = vmatprep.mubr.msk.bf16.mxu1 %vm1944_vm2, %v3833_v20 }
 0x346   : > { %v3527_v6 = vpop.f32.mrf.mxu0  ;;  %7844 = vmatmul.mubr.msk.bf16.gmra.mxu1 %vm1944_vm2, %v3834_v30 }
 0x347   : > { %v3699_v17 = vpack.c.bf16 %v3527_v6, %v3524_v26  ;;  %v3772_v14 = vadd.bf16 %v9273_v52, %v3700_v34 }
 0x348   : > { %v7717_v39 = vpop.f32.mrf.mxu0 }
 0x349   : > { %v3771_v5 = vadd.bf16 %v9273_v52, %v3699_v17  ;;  %v3836_v54 = vmax.bf16 %v8362_v24, %v3772_v14 }
 0x34a   : > { %v3540_v42 = vpop.f32.mrf.mxu0 }
 0x34b   : > { %v3835_v43 = vmax.bf16 %v8362_v24, %v3771_v5 }
 0x34c   : > { %v7718_v3 = vpop.f32.mrf.mxu0 }
 0x34d   : > { %v3702_v48 = vpack.c.bf16 %v7718_v3, %v7717_v39  ;;  %7847 = vmatprep.mubr.msk.bf16.mxu1 %vm1944_vm2, %v3835_v43 }
 0x34e   : > { %v3543_v55 = vpop.f32.mrf.mxu0  ;;  %v7753_v41 = vpop.f32.mrf.mxu1  ;;  %7848 = vmatmul.mubr.msk.bf16.gmra.mxu1 %vm1944_vm2, %v3836_v54 }
 0x34f   : > { %v3701_v59 = vpack.c.bf16 %v3543_v55, %v3540_v42  ;;  %v3774_v31 = vadd.bf16 %v9273_v52, %v3702_v48 }
 0x350   : > { %v7721_v25 = vpop.f32.mrf.mxu0  ;;  %v4109_v4 = vpop.f32.mrf.mxu1 }
 0x351   : > { %v3773_v27 = vadd.bf16 %v9273_v52, %v3701_v59  ;;  %v3838_v10 = vmax.bf16 %v8362_v24, %v3774_v31 }
 0x352   : > { %v3556_v60 = vpop.f32.mrf.mxu0  ;;  %v7754_v12 = vpop.f32.mrf.mxu1 }
 0x353   : > { %v3837_v62 = vmax.bf16 %v8362_v24, %v3773_v27  ;;  %v4621_v11 = vpack.c.bf16 %v7754_v12, %v7753_v41 }
 0x354   : > { %v7722_v32 = vpop.f32.mrf.mxu0  ;;  %v4112_v22 = vpop.f32.mrf.mxu1 }
 0x355   : > { %v3704_v28 = vpack.c.bf16 %v7722_v32, %v7721_v25  ;;  %v4620_v21 = vpack.c.bf16 %v4112_v22, %v4109_v4  ;;  %7851 = vmatprep.mubr.msk.bf16.mxu1 %vm1944_vm2, %v3837_v62  ;;  %v4693_v23 = vadd.bf16 %v9477_v18, %v4621_v11 }
 0x356   : > { %v3559_v40 = vpop.f32.mrf.mxu0  ;;  %v7757_v51 = vpop.f32.mrf.mxu1  ;;  %7852 = vmatmul.mubr.msk.bf16.gmra.mxu1 %vm1944_vm2, %v3838_v10 }
 0x357   : > { %v4692_v45 = vadd.bf16 %v9477_v18, %v4620_v21  ;;  %v3703_v16 = vpack.c.bf16 %v3559_v40, %v3556_v60  ;;  %v3776_v1 = vadd.bf16 %v9273_v52, %v3704_v28  ;;  %v4757_v47 = vmax.bf16 %v8362_v24, %v4693_v23 }
 0x358   : > { %v7725_v46 = vpop.f32.mrf.mxu0  ;;  %v4125_v36 = vpop.f32.mrf.mxu1 }
 0x359   : > { %v3775_v29 = vadd.bf16 %v9273_v52, %v3703_v16  ;;  %v4756_v7 = vmax.bf16 %v8362_v24, %v4692_v45  ;;  %v3840_v33 = vmax.bf16 %v8362_v24, %v3776_v1 }
 0x35a   : > { %v3572_v8 = vpop.f32.mrf.mxu0  ;;  %v7758_v61 = vpop.f32.mrf.mxu1 }
 0x35b   : > { %v3839_v0 = vmax.bf16 %v8362_v24, %v3775_v29  ;;  %v4623_v37 = vpack.c.bf16 %v7758_v61, %v7757_v51  ;;  %7895 = vmatprep.mubr.bf16.mxu0 %v4756_v7 }
 0x35c   : > { %v7726_v56 = vpop.f32.mrf.mxu0  ;;  %v4128_v63 = vpop.f32.mrf.mxu1  ;;  %7896 = vmatmul.mubr.bf16.vlgmr.msra.gmra.mxu0 %v4757_v47 }
 0x35d   : > { %v3706_v50 = vpack.c.bf16 %v7726_v56, %v7725_v46  ;;  %v4622_v57 = vpack.c.bf16 %v4128_v63, %v4125_v36  ;;  %7855 = vmatprep.mubr.msk.bf16.mxu1 %vm1944_vm2, %v3839_v0  ;;  %v4695_v2 = vadd.bf16 %v9477_v18, %v4623_v37 }
 0x35e   : > { %v3575_v49 = vpop.f32.mrf.mxu0  ;;  %v7761_v38 = vpop.f32.mrf.mxu1  ;;  %7856 = vmatmul.mubr.msk.bf16.gmra.mxu1 %vm1944_vm2, %v3840_v33 }
 0x35f   : > { %v4694_v53 = vadd.bf16 %v9477_v18, %v4622_v57  ;;  %v3705_v19 = vpack.c.bf16 %v3575_v49, %v3572_v8  ;;  %v3778_v44 = vadd.bf16 %v9273_v52, %v3706_v50  ;;  %v4759_v34 = vmax.bf16 %v8362_v24, %v4695_v2 }
 0x360   : > { %v7729_v26 = vpop.f32.mrf.mxu0  ;;  %v4141_v20 = vpop.f32.mrf.mxu1 }
 0x361   : > { %v3777_v30 = vadd.bf16 %v9273_v52, %v3705_v19  ;;  %v4758_v15 = vmax.bf16 %v8362_v24, %v4694_v53  ;;  %v3842_v5 = vmax.bf16 %v8362_v24, %v3778_v44 }
 0x362   : > { %v3588_v6 = vpop.f32.mrf.mxu0  ;;  %v7762_v17 = vpop.f32.mrf.mxu1 }
 0x363   : > { %v3841_v14 = vmax.bf16 %v8362_v24, %v3777_v30  ;;  %v4625_v39 = vpack.c.bf16 %v7762_v17, %v7761_v38  ;;  %7899 = vmatprep.mubr.bf16.mxu0 %v4758_v15 }
 0x364   : > { %v7730_v42 = vpop.f32.mrf.mxu0  ;;  %v4144_v43 = vpop.f32.mrf.mxu1  ;;  %7900 = vmatmul.mubr.bf16.gmra.mxu0 %v4759_v34 }
 0x365   : > { %v3708_v58 = vpack.c.bf16 %v7730_v42, %v7729_v26  ;;  %v4624_v54 = vpack.c.bf16 %v4144_v43, %v4141_v20  ;;  %7859 = vmatprep.mubr.msk.bf16.mxu1 %vm1944_vm2, %v3841_v14  ;;  %v4697_v3 = vadd.bf16 %v9477_v18, %v4625_v39 }
 0x366   : > { %v3591_v48 = vpop.f32.mrf.mxu0  ;;  %v7765_v55 = vpop.f32.mrf.mxu1  ;;  %7860 = vmatmul.mubr.msk.bf16.gmra.mxu1 %vm1944_vm2, %v3842_v5 }
 0x367   : > { %v4696_v41 = vadd.bf16 %v9477_v18, %v4624_v54  ;;  %v3707_v35 = vpack.c.bf16 %v3591_v48, %v3588_v6  ;;  %v3780_v59 = vadd.bf16 %v9273_v52, %v3708_v58  ;;  %v4761_v60 = vmax.bf16 %v8362_v24, %v4697_v3 }
 0x368   : > { %v7733_v31 = vpop.f32.mrf.mxu0  ;;  %v4157_v25 = vpop.f32.mrf.mxu1 }
 0x369   : > { %v3779_v4 = vadd.bf16 %v9273_v52, %v3707_v35  ;;  %v4760_v27 = vmax.bf16 %v8362_v24, %v4696_v41  ;;  %v3844_v32 = vmax.bf16 %v8362_v24, %v3780_v59 }
 0x36a   : > { %v3604_v12 = vpop.f32.mrf.mxu0  ;;  %v7766_v62 = vpop.f32.mrf.mxu1 }
 0x36b   : > { %v3843_v11 = vmax.bf16 %v8362_v24, %v3779_v4  ;;  %v4627_v10 = vpack.c.bf16 %v7766_v62, %v7765_v55  ;;  %7903 = vmatprep.mubr.bf16.mxu0 %v4760_v27 }
 0x36c   : > { %v7734_v22 = vpop.f32.mrf.mxu0  ;;  %v4160_v28 = vpop.f32.mrf.mxu1  ;;  %7904 = vmatmul.mubr.bf16.gmra.mxu0 %v4761_v60 }
 0x36d   : > { %v3710_v21 = vpack.c.bf16 %v7734_v22, %v7733_v31  ;;  %v4626_v23 = vpack.c.bf16 %v4160_v28, %v4157_v25  ;;  %7863 = vmatprep.mubr.msk.bf16.mxu1 %vm1944_vm2, %v3843_v11  ;;  %v4699_v40 = vadd.bf16 %v9477_v18, %v4627_v10 }
 0x36e   : > { %v3607_v51 = vpop.f32.mrf.mxu0  ;;  %v7769_v45 = vpop.f32.mrf.mxu1  ;;  %7864 = vmatmul.mubr.msk.bf16.gmra.mxu1 %vm1944_vm2, %v3844_v32 }
 0x36f   : > { %v4698_v16 = vadd.bf16 %v9477_v18, %v4626_v23  ;;  %v3709_v1 = vpack.c.bf16 %v3607_v51, %v3604_v12  ;;  %v3782_v46 = vadd.bf16 %v9273_v52, %v3710_v21  ;;  %v4763_v8 = vmax.bf16 %v8362_v24, %v4699_v40 }
 0x370   : > { %v7737_v36 = vpop.f32.mrf.mxu0  ;;  %v4173_v29 = vpop.f32.mrf.mxu1 }
 0x371   : > { %v3781_v7 = vadd.bf16 %v9273_v52, %v3709_v1  ;;  %v4762_v47 = vmax.bf16 %v8362_v24, %v4698_v16  ;;  %v3846_v56 = vmax.bf16 %v8362_v24, %v3782_v46 }
 0x372   : > { %v3620_v61 = vpop.f32.mrf.mxu0  ;;  %v7770_v0 = vpop.f32.mrf.mxu1 }
 0x373   : > { %v3845_v37 = vmax.bf16 %v8362_v24, %v3781_v7  ;;  %v4629_v33 = vpack.c.bf16 %v7770_v0, %v7769_v45  ;;  %7907 = vmatprep.mubr.bf16.mxu0 %v4762_v47 }
 0x374   : > { %v7738_v63 = vpop.f32.mrf.mxu0  ;;  %v4176_v50 = vpop.f32.mrf.mxu1  ;;  %7908 = vmatmul.mubr.bf16.gmra.mxu0 %v4763_v8 }
 0x375   : > { %v3712_v57 = vpack.c.bf16 %v7738_v63, %v7737_v36  ;;  %v4628_v2 = vpack.c.bf16 %v4176_v50, %v4173_v29  ;;  %7867 = vmatprep.mubr.msk.bf16.mxu1 %vm1944_vm2, %v3845_v37  ;;  %v4701_v49 = vadd.bf16 %v9477_v18, %v4629_v33 }
 0x376   : > { %v3623_v38 = vpop.f32.mrf.mxu0  ;;  %v7773_v53 = vpop.f32.mrf.mxu1  ;;  %7868 = vmatmul.mubr.msk.bf16.gmra.mxu1 %vm1944_vm2, %v3846_v56 }
 0x377   : > { %v4700_v19 = vadd.bf16 %v9477_v18, %v4628_v2  ;;  %v3711_v44 = vpack.c.bf16 %v3623_v38, %v3620_v61  ;;  %v3784_v26 = vadd.bf16 %v9273_v52, %v3712_v57  ;;  %v4765_v6 = vmax.bf16 %v8362_v24, %v4701_v49 }
 0x378   : > { %v7741_v20 = vpop.f32.mrf.mxu0  ;;  %v4189_v30 = vpop.f32.mrf.mxu1 }
 0x379   : > { %v3783_v15 = vadd.bf16 %v9273_v52, %v3711_v44  ;;  %v4764_v34 = vmax.bf16 %v8362_v24, %v4700_v19  ;;  %v3848_v42 = vmax.bf16 %v8362_v24, %v3784_v26 }
 0x37a   : > { %v3636_v17 = vpop.f32.mrf.mxu0  ;;  %v7774_v14 = vpop.f32.mrf.mxu1 }
 0x37b   : > { %v3847_v39 = vmax.bf16 %v8362_v24, %v3783_v15  ;;  %v4631_v5 = vpack.c.bf16 %v7774_v14, %v7773_v53  ;;  %7911 = vmatprep.mubr.bf16.mxu0 %v4764_v34 }
 0x37c   : > { %v7742_v43 = vpop.f32.mrf.mxu0  ;;  %v4192_v58 = vpop.f32.mrf.mxu1  ;;  %7912 = vmatmul.mubr.bf16.gmra.mxu0 %v4765_v6 }
 0x37d   : > { %v3714_v54 = vpack.c.bf16 %v7742_v43, %v7741_v20  ;;  %v4630_v3 = vpack.c.bf16 %v4192_v58, %v4189_v30  ;;  %7871 = vmatprep.mubr.msk.bf16.mxu1 %vm1944_vm2, %v3847_v39  ;;  %v4703_v48 = vadd.bf16 %v9477_v18, %v4631_v5 }
 0x37e   : > { %v3639_v55 = vpop.f32.mrf.mxu0  ;;  %v7777_v41 = vpop.f32.mrf.mxu1  ;;  %7872 = vmatmul.mubr.msk.bf16.gmra.mxu1 %vm1944_vm2, %v3848_v42 }
 0x37f   : > { %v4702_v35 = vadd.bf16 %v9477_v18, %v4630_v3  ;;  %v3713_v59 = vpack.c.bf16 %v3639_v55, %v3636_v17  ;;  %v3786_v31 = vadd.bf16 %v9273_v52, %v3714_v54  ;;  %v4767_v60 = vmax.bf16 %v8362_v24, %v4703_v48 }
 0x380   : > { %v4205_v25 = vpop.f32.mrf.mxu1 }
 0x381   : > { %v3785_v4 = vadd.bf16 %v9273_v52, %v3713_v59  ;;  %v4766_v27 = vmax.bf16 %v8362_v24, %v4702_v35  ;;  %v3850_v10 = vmax.bf16 %v8362_v24, %v3786_v31 }
 0x382   : > { %v7778_v12 = vpop.f32.mrf.mxu1 }
 0x383   : > { %v3849_v62 = vmax.bf16 %v8362_v24, %v3785_v4  ;;  %v4633_v11 = vpack.c.bf16 %v7778_v12, %v7777_v41  ;;  %7915 = vmatprep.mubr.bf16.mxu0 %v4766_v27 }
 0x384   : > { %v4208_v32 = vpop.f32.mrf.mxu1  ;;  %7916 = vmatmul.mubr.bf16.gmra.mxu0 %v4767_v60 }
 0x385   : > { %v4632_v22 = vpack.c.bf16 %v4208_v32, %v4205_v25  ;;  %7875 = vmatprep.mubr.msk.bf16.mxu1 %vm1944_vm2, %v3849_v62  ;;  %v4705_v28 = vadd.bf16 %v9477_v18, %v4633_v11 }
 0x386   : > { %v7781_v21 = vpop.f32.mrf.mxu1  ;;  %7876 = vmatmul.mubr.msk.bf16.gmra.mxu1 %vm1944_vm2, %v3850_v10 }
 0x387   : > { %v4704_v52 = vadd.bf16 %v9477_v18, %v4632_v22  ;;  %v4769_v51 = vmax.bf16 %v8362_v24, %v4705_v28 }
 0x388   : > { %v4221_v23 = vpop.f32.mrf.mxu1 }
 0x389   : > { %v4768_v40 = vmax.bf16 %v8362_v24, %v4704_v52 }
 0x38a   : > { %v7782_v45 = vpop.f32.mrf.mxu1 }
 0x38b   : > { %v4635_v16 = vpack.c.bf16 %v7782_v45, %v7781_v21  ;;  %7919 = vmatprep.mubr.bf16.mxu0 %v4768_v40 }
 0x38c   : > { %v4224_v1 = vpop.f32.mrf.mxu1  ;;  %7920 = vmatmul.mubr.bf16.gmra.mxu0 %v4769_v51 }
 0x38d   : > { %v4634_v46 = vpack.c.bf16 %v4224_v1, %v4221_v23  ;;  %v4707_v36 = vadd.bf16 %v9477_v18, %v4635_v16 }
 0x38e   : > { %v7785_v29 = vpop.f32.mrf.mxu1 }
 0x38f   : > { %v4706_v7 = vadd.bf16 %v9477_v18, %v4634_v46  ;;  %v4771_v61 = vmax.bf16 %v8362_v24, %v4707_v36 }
 0x390   : > { %v4237_v47 = vpop.f32.mrf.mxu1 }
 0x391   : > { %v4770_v8 = vmax.bf16 %v8362_v24, %v4706_v7 }
 0x392   : > { %v7786_v0 = vpop.f32.mrf.mxu1 }
 0x393   : > { %v4637_v37 = vpack.c.bf16 %v7786_v0, %v7785_v29  ;;  %7923 = vmatprep.mubr.bf16.mxu0 %v4770_v8 }
 0x394   : > { %v4240_v33 = vpop.f32.mrf.mxu1  ;;  %7924 = vmatmul.mubr.bf16.gmra.mxu0 %v4771_v61 }
 0x395   : > { %v4636_v56 = vpack.c.bf16 %v4240_v33, %v4237_v47  ;;  %v4709_v63 = vadd.bf16 %v9477_v18, %v4637_v37 }
 0x396   : > { %v7789_v50 = vpop.f32.mrf.mxu1 }
 0x397   : > { %v4708_v57 = vadd.bf16 %v9477_v18, %v4636_v56  ;;  %v4773_v38 = vmax.bf16 %v8362_v24, %v4709_v63 }
 0x398   : > { %v4253_v2 = vpop.f32.mrf.mxu1 }
 0x399   : > { %v4772_v49 = vmax.bf16 %v8362_v24, %v4708_v57 }
 0x39a   : > { %v7790_v53 = vpop.f32.mrf.mxu1 }
 0x39b   : > { %v4639_v19 = vpack.c.bf16 %v7790_v53, %v7789_v50  ;;  %7927 = vmatprep.mubr.bf16.mxu0 %v4772_v49 }
 0x39c   : > { %v4256_v44 = vpop.f32.mrf.mxu1  ;;  %7928 = vmatmul.mubr.bf16.gmra.mxu0 %v4773_v38 }
 0x39d   : > { %v4638_v26 = vpack.c.bf16 %v4256_v44, %v4253_v2  ;;  %v4711_v20 = vadd.bf16 %v9477_v18, %v4639_v19 }
 0x39e   : > { %v7793_v30 = vpop.f32.mrf.mxu1 }
 0x39f   : > { %v4710_v15 = vadd.bf16 %v9477_v18, %v4638_v26  ;;  %v4775_v17 = vmax.bf16 %v8362_v24, %v4711_v20 }
 0x3a0   : > { %v4269_v34 = vpop.f32.mrf.mxu1 }
 0x3a1   : > { %v4774_v6 = vmax.bf16 %v8362_v24, %v4710_v15 }
 0x3a2   : > { %v7794_v14 = vpop.f32.mrf.mxu1 }
 0x3a3   : > { %v4641_v39 = vpack.c.bf16 %v7794_v14, %v7793_v30  ;;  %7931 = vmatprep.mubr.bf16.mxu0 %v4774_v6 }
 0x3a4   : > { %v4272_v5 = vpop.f32.mrf.mxu1  ;;  %7932 = vmatmul.mubr.bf16.gmra.mxu0 %v4775_v17 }
 0x3a5   : > { %v4640_v42 = vpack.c.bf16 %v4272_v5, %v4269_v34  ;;  %v4713_v43 = vadd.bf16 %v9477_v18, %v4641_v39 }
 0x3a6   : > { %v7797_v58 = vpop.f32.mrf.mxu1 }
 0x3a7   : > { %v4712_v54 = vadd.bf16 %v9477_v18, %v4640_v42  ;;  %v4777_v55 = vmax.bf16 %v8362_v24, %v4713_v43 }
 0x3a8   : > { %v4285_v3 = vpop.f32.mrf.mxu1 }
 0x3a9   : > { %v4776_v48 = vmax.bf16 %v8362_v24, %v4712_v54 }
 0x3aa   : > { %v7798_v41 = vpop.f32.mrf.mxu1 }
 0x3ab   : > { %v4643_v35 = vpack.c.bf16 %v7798_v41, %v7797_v58  ;;  %7935 = vmatprep.mubr.bf16.mxu0 %v4776_v48 }
 0x3ac   : > { %v4288_v59 = vpop.f32.mrf.mxu1  ;;  %7936 = vmatmul.mubr.bf16.gmra.mxu0 %v4777_v55 }
 0x3ad   : > { %v4642_v31 = vpack.c.bf16 %v4288_v59, %v4285_v3  ;;  %v4715_v25 = vadd.bf16 %v9477_v18, %v4643_v35 }
 0x3ae   : > { %v7801_v4 = vpop.f32.mrf.mxu1 }
 0x3af   : > { %v4714_v27 = vadd.bf16 %v9477_v18, %v4642_v31  ;;  %v4779_v62 = vmax.bf16 %v8362_v24, %v4715_v25 }
 0x3b0   : > { %v4301_v60 = vpop.f32.mrf.mxu1 }
 0x3b1   : > { %v4778_v12 = vmax.bf16 %v8362_v24, %v4714_v27 }
 0x3b2   : > { %v7802_v11 = vpop.f32.mrf.mxu1 }
 0x3b3   : > { %v4645_v10 = vpack.c.bf16 %v7802_v11, %v7801_v4  ;;  %7939 = vmatprep.mubr.bf16.mxu0 %v4778_v12 }
 0x3b4   : > { %v4304_v32 = vpop.f32.mrf.mxu1  ;;  %7940 = vmatmul.mubr.bf16.gmra.mxu0 %v4779_v62 }
 0x3b5   : > { %v4644_v22 = vpack.c.bf16 %v4304_v32, %v4301_v60  ;;  %v4717_v28 = vadd.bf16 %v9477_v18, %v4645_v10 }
 0x3b6   : > { %v7805_v21 = vpop.f32.mrf.mxu1 }
 0x3b7   : > { %v4716_v52 = vadd.bf16 %v9477_v18, %v4644_v22  ;;  %v4781_v51 = vmax.bf16 %v8362_v24, %v4717_v28 }
 0x3b8   : > { %v4317_v23 = vpop.f32.mrf.mxu1 }
 0x3b9   : > { %v4780_v40 = vmax.bf16 %v8362_v24, %v4716_v52 }
 0x3ba   : > { %v7806_v45 = vpop.f32.mrf.mxu1 }
 0x3bb   : > { %v4647_v16 = vpack.c.bf16 %v7806_v45, %v7805_v21  ;;  %7943 = vmatprep.mubr.bf16.mxu0 %v4780_v40 }
 0x3bc   : > { %v4320_v1 = vpop.f32.mrf.mxu1  ;;  %7944 = vmatmul.mubr.bf16.gmra.mxu0 %v4781_v51 }
 0x3bd   : > { %v4646_v46 = vpack.c.bf16 %v4320_v1, %v4317_v23  ;;  %v4719_v36 = vadd.bf16 %v9477_v18, %v4647_v16 }
 0x3be   : > { %v7809_v29 = vpop.f32.mrf.mxu1 }
 0x3bf   : > { %v4718_v7 = vadd.bf16 %v9477_v18, %v4646_v46  ;;  %v4783_v61 = vmax.bf16 %v8362_v24, %v4719_v36 }
 0x3c0   : > { %v4333_v47 = vpop.f32.mrf.mxu1 }
 0x3c1   : > { %v4782_v8 = vmax.bf16 %v8362_v24, %v4718_v7 }
 0x3c2   : > { %v7810_v0 = vpop.f32.mrf.mxu1 }
 0x3c3   : > { %v4649_v37 = vpack.c.bf16 %v7810_v0, %v7809_v29  ;;  %7947 = vmatprep.mubr.bf16.mxu0 %v4782_v8 }
 0x3c4   : > { %v4336_v33 = vpop.f32.mrf.mxu1  ;;  %7948 = vmatmul.mubr.bf16.gmra.mxu0 %v4783_v61 }
 0x3c5   : > { %v4648_v56 = vpack.c.bf16 %v4336_v33, %v4333_v47  ;;  %v4721_v63 = vadd.bf16 %v9477_v18, %v4649_v37 }
 0x3c6   : > { %v7813_v50 = vpop.f32.mrf.mxu1 }
 0x3c7   : > { %v4720_v57 = vadd.bf16 %v9477_v18, %v4648_v56  ;;  %v4785_v38 = vmax.bf16 %v8362_v24, %v4721_v63 }
 0x3c8   : > { %v4349_v2 = vpop.f32.mrf.mxu1 }
 0x3c9   : > { %v4784_v49 = vmax.bf16 %v8362_v24, %v4720_v57 }
 0x3ca   : > { %v7814_v53 = vpop.f32.mrf.mxu1 }
 0x3cb   : > { %v4651_v19 = vpack.c.bf16 %v7814_v53, %v7813_v50  ;;  %7951 = vmatprep.mubr.bf16.mxu0 %v4784_v49 }
 0x3cc   : > { %v4352_v44 = vpop.f32.mrf.mxu1  ;;  %7952 = vmatmul.mubr.bf16.gmra.mxu0 %v4785_v38 }
 0x3cd   : > { %v4650_v26 = vpack.c.bf16 %v4352_v44, %v4349_v2  ;;  %v4723_v20 = vadd.bf16 %v9477_v18, %v4651_v19 }
 0x3ce   : > { %v7817_v30 = vpop.f32.mrf.mxu1 }
 0x3cf   : > { %v4722_v15 = vadd.bf16 %v9477_v18, %v4650_v26  ;;  %v4787_v17 = vmax.bf16 %v8362_v24, %v4723_v20 }
 0x3d0   : > { %v4365_v34 = vpop.f32.mrf.mxu1 }
 0x3d1   : > { %v4786_v6 = vmax.bf16 %v8362_v24, %v4722_v15 }
 0x3d2   : > { %v7818_v14 = vpop.f32.mrf.mxu1 }
 0x3d3   : > { %v4653_v39 = vpack.c.bf16 %v7818_v14, %v7817_v30  ;;  %7955 = vmatprep.mubr.bf16.mxu0 %v4786_v6 }
 0x3d4   : > { %v4368_v5 = vpop.f32.mrf.mxu1  ;;  %7956 = vmatmul.mubr.bf16.gmra.mxu0 %v4787_v17 }
 0x3d5   : > { %v4652_v42 = vpack.c.bf16 %v4368_v5, %v4365_v34  ;;  %v4725_v43 = vadd.bf16 %v9477_v18, %v4653_v39 }
 0x3d6   : > { %v7821_v58 = vpop.f32.mrf.mxu1 }
 0x3d7   : > { %v4724_v54 = vadd.bf16 %v9477_v18, %v4652_v42  ;;  %v4789_v55 = vmax.bf16 %v8362_v24, %v4725_v43 }
 0x3d8   : > { %v4381_v3 = vpop.f32.mrf.mxu1 }
 0x3d9   : > { %v4788_v48 = vmax.bf16 %v8362_v24, %v4724_v54 }
 0x3da   : > { %v7822_v41 = vpop.f32.mrf.mxu1 }
 0x3db   : > { %v4655_v35 = vpack.c.bf16 %v7822_v41, %v7821_v58  ;;  %7959 = vmatprep.mubr.bf16.mxu0 %v4788_v48 }
 0x3dc   : > { %v4384_v59 = vpop.f32.mrf.mxu1  ;;  %7960 = vmatmul.mubr.bf16.gmra.mxu0 %v4789_v55 }
 0x3dd   : > { %v4654_v31 = vpack.c.bf16 %v4384_v59, %v4381_v3  ;;  %v4727_v25 = vadd.bf16 %v9477_v18, %v4655_v35 }
 0x3de   : > { %v7825_v4 = vpop.f32.mrf.mxu1 }
 0x3df   : > { %v4726_v27 = vadd.bf16 %v9477_v18, %v4654_v31  ;;  %v4791_v62 = vmax.bf16 %v8362_v24, %v4727_v25 }
 0x3e0   : > { %v4397_v60 = vpop.f32.mrf.mxu1 }
 0x3e1   : > { %v4790_v12 = vmax.bf16 %v8362_v24, %v4726_v27 }
 0x3e2   : > { %v7826_v11 = vpop.f32.mrf.mxu1 }
 0x3e3   : > { %v4657_v10 = vpack.c.bf16 %v7826_v11, %v7825_v4  ;;  %7963 = vmatprep.mubr.bf16.mxu0 %v4790_v12 }
 0x3e4   : > { %v4400_v32 = vpop.f32.mrf.mxu1  ;;  %7964 = vmatmul.mubr.bf16.gmra.mxu0 %v4791_v62 }
 0x3e5   : > { %v4656_v22 = vpack.c.bf16 %v4400_v32, %v4397_v60  ;;  %v4729_v28 = vadd.bf16 %v9477_v18, %v4657_v10 }
 0x3e6   : > { %v7829_v21 = vpop.f32.mrf.mxu1 }
 0x3e7   : > { %v4728_v52 = vadd.bf16 %v9477_v18, %v4656_v22  ;;  %v4793_v51 = vmax.bf16 %v8362_v24, %v4729_v28 }
 0x3e8   : > { %v4413_v23 = vpop.f32.mrf.mxu1 }
 0x3e9   : > { %v4792_v40 = vmax.bf16 %v8362_v24, %v4728_v52 }
 0x3ea   : > { %v7830_v45 = vpop.f32.mrf.mxu1 }
 0x3eb   : > { %v4659_v16 = vpack.c.bf16 %v7830_v45, %v7829_v21  ;;  %7967 = vmatprep.mubr.bf16.mxu0 %v4792_v40 }
 0x3ec   : > { %v4416_v1 = vpop.f32.mrf.mxu1  ;;  %7968 = vmatmul.mubr.bf16.gmra.mxu0 %v4793_v51 }
 0x3ed   : > { %v4658_v46 = vpack.c.bf16 %v4416_v1, %v4413_v23  ;;  %v4731_v36 = vadd.bf16 %v9477_v18, %v4659_v16 }
 0x3ee   : > { %v7833_v29 = vpop.f32.mrf.mxu1 }
 0x3ef   : > { %v4730_v7 = vadd.bf16 %v9477_v18, %v4658_v46  ;;  %v4795_v61 = vmax.bf16 %v8362_v24, %v4731_v36 }
 0x3f0   : > { %v4429_v47 = vpop.f32.mrf.mxu1 }
 0x3f1   : > { %v4794_v8 = vmax.bf16 %v8362_v24, %v4730_v7 }
 0x3f2   : > { %v7834_v0 = vpop.f32.mrf.mxu1 }
 0x3f3   : > { %v4661_v37 = vpack.c.bf16 %v7834_v0, %v7833_v29  ;;  %7971 = vmatprep.mubr.bf16.mxu0 %v4794_v8 }
 0x3f4   : > { %v4432_v33 = vpop.f32.mrf.mxu1  ;;  %7972 = vmatmul.mubr.bf16.gmra.mxu0 %v4795_v61 }
 0x3f5   : > { %v4660_v56 = vpack.c.bf16 %v4432_v33, %v4429_v47  ;;  %v4733_v63 = vadd.bf16 %v9477_v18, %v4661_v37 }
 0x3f6   : > { %v7837_v50 = vpop.f32.mrf.mxu1 }
 0x3f7   : > { %v4732_v57 = vadd.bf16 %v9477_v18, %v4660_v56  ;;  %v4797_v38 = vmax.bf16 %v8362_v24, %v4733_v63 }
 0x3f8   : > { %v4445_v2 = vpop.f32.mrf.mxu1 }
 0x3f9   : > { %v4796_v49 = vmax.bf16 %v8362_v24, %v4732_v57 }
 0x3fa   : > { %v7838_v53 = vpop.f32.mrf.mxu1 }
 0x3fb   : > { %v4663_v19 = vpack.c.bf16 %v7838_v53, %v7837_v50  ;;  %7975 = vmatprep.mubr.bf16.mxu0 %v4796_v49 }
 0x3fc   : > { %v4448_v44 = vpop.f32.mrf.mxu1  ;;  %7976 = vmatmul.mubr.bf16.gmra.mxu0 %v4797_v38 }
 0x3fd   : > { %v4662_v26 = vpack.c.bf16 %v4448_v44, %v4445_v2  ;;  %v4735_v20 = vadd.bf16 %v9477_v18, %v4663_v19  ;;  %v5493_v19 = vld [vmem:[%s10088_s10] sm:$0x1] }
 0x3fe   : > { %v7841_v30 = vpop.f32.mrf.mxu1 }
 0x3ff   : > { %v4734_v15 = vadd.bf16 %v9477_v18, %v4662_v26  ;;  %v4799_v17 = vmax.bf16 %v8362_v24, %v4735_v20 }
 0x400   : > { %v4461_v34 = vpop.f32.mrf.mxu1 }
 0x401   : > { %v4798_v6 = vmax.bf16 %v8362_v24, %v4734_v15 }
 0x402   : > { %v7842_v14 = vpop.f32.mrf.mxu1 }
 0x403   : > { %v4665_v39 = vpack.c.bf16 %v7842_v14, %v7841_v30  ;;  %7979 = vmatprep.mubr.bf16.mxu0 %v4798_v6  ;;  %v5495_v6 = vpack.i.b16 %v5493_v19, %v5493_v19 }
 0x404   : > { %v4464_v5 = vpop.f32.mrf.mxu1  ;;  %7980 = vmatmul.mubr.bf16.gmra.mxu0 %v4799_v17 }
 0x405   : > { %v4664_v42 = vpack.c.bf16 %v4464_v5, %v4461_v34  ;;  %v4737_v43 = vadd.bf16 %v9477_v18, %v4665_v39 }
 0x406   : > { %v7845_v58 = vpop.f32.mrf.mxu1 }
 0x407   : > { %v4736_v54 = vadd.bf16 %v9477_v18, %v4664_v42  ;;  %v4801_v55 = vmax.bf16 %v8362_v24, %v4737_v43 }
 0x408   : > { %v4477_v3 = vpop.f32.mrf.mxu1 }
 0x409   : > { %v4800_v48 = vmax.bf16 %v8362_v24, %v4736_v54 }
 0x40a   : > { %v7846_v41 = vpop.f32.mrf.mxu1 }
 0x40b   : > { %v4667_v35 = vpack.c.bf16 %v7846_v41, %v7845_v58  ;;  %7983 = vmatprep.mubr.bf16.mxu0 %v4800_v48  ;;  %v9631_v48 = vrot.slane %v5495_v6, %v8686_v13 }
 0x40c   : > { %v4480_v59 = vpop.f32.mrf.mxu1  ;;  %7984 = vmatmul.mubr.bf16.gmra.mxu0 %v4801_v55 }
 0x40d   : > { %v4666_v31 = vpack.c.bf16 %v4480_v59, %v4477_v3  ;;  %v4739_v25 = vadd.bf16 %v9477_v18, %v4667_v35 }
 0x40e   : > { %v7849_v4 = vpop.f32.mrf.mxu1 }
 0x40f   : > { %v4738_v27 = vadd.bf16 %v9477_v18, %v4666_v31  ;;  %v4803_v62 = vmax.bf16 %v8362_v24, %v4739_v25 }
 0x410   : > { %v4493_v60 = vpop.f32.mrf.mxu1 }
 0x411   : > { %v4802_v12 = vmax.bf16 %v8362_v24, %v4738_v27 }
 0x412   : > { %v7850_v11 = vpop.f32.mrf.mxu1 }
 0x413   : > { %v4669_v10 = vpack.c.bf16 %v7850_v11, %v7849_v4  ;;  %7987 = vmatprep.mubr.bf16.mxu0 %v4802_v12 }
 0x414   : > { %v4496_v32 = vpop.f32.mrf.mxu1  ;;  %7988 = vmatmul.mubr.bf16.gmra.mxu0 %v4803_v62 }
 0x415   : > { %v4668_v22 = vpack.c.bf16 %v4496_v32, %v4493_v60  ;;  %v4741_v28 = vadd.bf16 %v9477_v18, %v4669_v10 }
 0x416   : > { %v7853_v21 = vpop.f32.mrf.mxu1 }
 0x417   : > { %v4740_v52 = vadd.bf16 %v9477_v18, %v4668_v22  ;;  %v4805_v51 = vmax.bf16 %v8362_v24, %v4741_v28 }
 0x418   : > { %v4509_v23 = vpop.f32.mrf.mxu1 }
 0x419   : > { %v4804_v40 = vmax.bf16 %v8362_v24, %v4740_v52 }
 0x41a   : > { %v7854_v45 = vpop.f32.mrf.mxu1 }
 0x41b   : > { %v4671_v16 = vpack.c.bf16 %v7854_v45, %v7853_v21  ;;  %7991 = vmatprep.mubr.bf16.mxu0 %v4804_v40 }
 0x41c   : > { %v4512_v1 = vpop.f32.mrf.mxu1  ;;  %v7897_v46 = vpop.f32.mrf.mxu0  ;;  %7992 = vmatmul.mubr.bf16.gmra.mxu0 %v4805_v51 }
 0x41d   : > { %v4670_v36 = vpack.c.bf16 %v4512_v1, %v4509_v23  ;;  %v4743_v29 = vadd.bf16 %v9477_v18, %v4671_v16 }
 0x41e   : > { %v7857_v7 = vpop.f32.mrf.mxu1  ;;  %v4918_v47 = vpop.f32.mrf.mxu0 }
 0x41f   : > { %v4742_v8 = vadd.bf16 %v9477_v18, %v4670_v36  ;;  %v4807_v56 = vmax.bf16 %v8362_v24, %v4743_v29 }
 0x420   : > { %v4525_v61 = vpop.f32.mrf.mxu1  ;;  %v7898_v0 = vpop.f32.mrf.mxu0 }
 0x421   : > { %v5430_v37 = vpack.c.bf16 %v7898_v0, %v7897_v46  ;;  %v4806_v33 = vmax.bf16 %v8362_v24, %v4742_v8 }
 0x422   : > { %v7858_v63 = vpop.f32.mrf.mxu1  ;;  %v4921_v50 = vpop.f32.mrf.mxu0 }
 0x423   : > { %v4673_v57 = vpack.c.bf16 %v7858_v63, %v7857_v7  ;;  %v5429_v2 = vpack.c.bf16 %v4921_v50, %v4918_v47  ;;  %7995 = vmatprep.mubr.bf16.mxu0 %v4806_v33  ;;  %v5502_v27 = vadd.bf16 %v9631_v48, %v5430_v37 }
 0x424   : > { %v4528_v49 = vpop.f32.mrf.mxu1  ;;  %v7901_v38 = vpop.f32.mrf.mxu0  ;;  %7996 = vmatmul.mubr.bf16.gmra.mxu0 %v4807_v56 }
 0x425   : > { %v4672_v53 = vpack.c.bf16 %v4528_v49, %v4525_v61  ;;  %v4745_v44 = vadd.bf16 %v9477_v18, %v4673_v57  ;;  %v5501_v32 = vadd.bf16 %v9631_v48, %v5429_v2  ;;  %v5566_v40 = vmax.bf16 %v8362_v24, %v5502_v27 }
 0x426   : > { %v7861_v26 = vpop.f32.mrf.mxu1  ;;  %v4934_v20 = vpop.f32.mrf.mxu0 }
 0x427   : > { %v4744_v30 = vadd.bf16 %v9477_v18, %v4672_v53  ;;  %v4809_v39 = vmax.bf16 %v8362_v24, %v4745_v44  ;;  %v5565_v29 = vmax.bf16 %v8362_v24, %v5501_v32 }
 0x428   : > { %v4541_v15 = vpop.f32.mrf.mxu1  ;;  %v7902_v34 = vpop.f32.mrf.mxu0 }
 0x429   : > { %v5432_v17 = vpack.c.bf16 %v7902_v34, %v7901_v38  ;;  %v4808_v14 = vmax.bf16 %v8362_v24, %v4744_v30 }
 0x42a   : > { %v7862_v5 = vpop.f32.mrf.mxu1  ;;  %v4937_v42 = vpop.f32.mrf.mxu0 }
 0x42b   : > { %v4675_v43 = vpack.c.bf16 %v7862_v5, %v7861_v26  ;;  %v5431_v58 = vpack.c.bf16 %v4937_v42, %v4934_v20  ;;  %7999 = vmatprep.mubr.bf16.mxu0 %v4808_v14  ;;  %v5504_v37 = vadd.bf16 %v9631_v48, %v5432_v17 }
 0x42c   : > { %v4544_v54 = vpop.f32.mrf.mxu1  ;;  %v7905_v3 = vpop.f32.mrf.mxu0  ;;  %8000 = vmatmul.mubr.bf16.gmra.mxu0 %v4809_v39 }
 0x42d   : > { %v4674_v55 = vpack.c.bf16 %v4544_v54, %v4541_v15  ;;  %v4747_v41 = vadd.bf16 %v9477_v18, %v4675_v43  ;;  %v5503_v49 = vadd.bf16 %v9631_v48, %v5431_v58  ;;  %v5568_v20 = vmax.bf16 %v8362_v24, %v5504_v37 }
 0x42e   : > { %v7865_v35 = vpop.f32.mrf.mxu1  ;;  %v4950_v59 = vpop.f32.mrf.mxu0 }
 0x42f   : > { %v4746_v31 = vadd.bf16 %v9477_v18, %v4674_v55  ;;  %v4811_v62 = vmax.bf16 %v8362_v24, %v4747_v41  ;;  %v5567_v39 = vmax.bf16 %v8362_v24, %v5503_v49 }
 0x430   : > { %v4557_v25 = vpop.f32.mrf.mxu1  ;;  %v7906_v4 = vpop.f32.mrf.mxu0 }
 0x431   : > { %v5434_v60 = vpack.c.bf16 %v7906_v4, %v7905_v3  ;;  %v4810_v12 = vmax.bf16 %v8362_v24, %v4746_v31 }
 0x432   : > { %v7866_v11 = vpop.f32.mrf.mxu1  ;;  %v4953_v10 = vpop.f32.mrf.mxu0 }
 0x433   : > { %v5506_v22 = vadd.bf16 %v9631_v48, %v5434_v60  ;;  %v4677_v28 = vpack.c.bf16 %v7866_v11, %v7865_v35  ;;  %v5433_v21 = vpack.c.bf16 %v4953_v10, %v4950_v59  ;;  %8003 = vmatprep.mubr.bf16.mxu0 %v4810_v12 }
 0x434   : > { %v4560_v52 = vpop.f32.mrf.mxu1  ;;  %v7909_v23 = vpop.f32.mrf.mxu0  ;;  %8004 = vmatmul.mubr.bf16.gmra.mxu0 %v4811_v62 }
 0x435   : > { %v5570_v51 = vmax.bf16 %v8362_v24, %v5506_v22  ;;  %v5505_v45 = vadd.bf16 %v9631_v48, %v5433_v21  ;;  %v4676_v16 = vpack.c.bf16 %v4560_v52, %v4557_v25  ;;  %v4749_v1 = vadd.bf16 %v9477_v18, %v4677_v28 }
 0x436   : > { %v7869_v46 = vpop.f32.mrf.mxu1  ;;  %v4966_v36 = vpop.f32.mrf.mxu0 }
 0x437   : > { %v5630_v7 = vmax.bf16 %v5570_v51, %v5566_v40  ;;  %v5569_v47 = vmax.bf16 %v8362_v24, %v5505_v45  ;;  %v4748_v8 = vadd.bf16 %v9477_v18, %v4676_v16  ;;  %v4813_v50 = vmax.bf16 %v8362_v24, %v4749_v1 }
 0x438   : > { %v4573_v61 = vpop.f32.mrf.mxu1  ;;  %v7910_v0 = vpop.f32.mrf.mxu0 }
 0x439   : > { %v5629_v33 = vmax.bf16 %v5569_v47, %v5565_v29  ;;  %v5436_v56 = vpack.c.bf16 %v7910_v0, %v7909_v23  ;;  %v4812_v63 = vmax.bf16 %v8362_v24, %v4748_v8 }
 0x43a   : > { %v7870_v57 = vpop.f32.mrf.mxu1  ;;  %v4969_v2 = vpop.f32.mrf.mxu0 }
 0x43b   : > { %v5508_v38 = vadd.bf16 %v9631_v48, %v5436_v56  ;;  %v4679_v53 = vpack.c.bf16 %v7870_v57, %v7869_v46  ;;  %v5435_v19 = vpack.c.bf16 %v4969_v2, %v4966_v36  ;;  %8007 = vmatprep.mubr.bf16.mxu0 %v4812_v63 }
 0x43c   : > { %v4576_v44 = vpop.f32.mrf.mxu1  ;;  %v7913_v26 = vpop.f32.mrf.mxu0  ;;  %8008 = vmatmul.mubr.bf16.gmra.mxu0 %v4813_v50 }
 0x43d   : > { %v5572_v30 = vmax.bf16 %v8362_v24, %v5508_v38  ;;  %v5507_v15 = vadd.bf16 %v9631_v48, %v5435_v19  ;;  %v4678_v34 = vpack.c.bf16 %v4576_v44, %v4573_v61  ;;  %v4751_v6 = vadd.bf16 %v9477_v18, %v4679_v53 }
 0x43e   : > { %v7873_v17 = vpop.f32.mrf.mxu1  ;;  %v4982_v14 = vpop.f32.mrf.mxu0 }
 0x43f   : > { %v5632_v5 = vmax.bf16 %v5572_v30, %v5568_v20  ;;  %v5571_v42 = vmax.bf16 %v8362_v24, %v5507_v15  ;;  %v4750_v43 = vadd.bf16 %v9477_v18, %v4678_v34  ;;  %v4815_v35 = vmax.bf16 %v8362_v24, %v4751_v6 }
 0x440   : > { %v4589_v58 = vpop.f32.mrf.mxu1  ;;  %v7914_v54 = vpop.f32.mrf.mxu0 }
 0x441   : > { %v5631_v3 = vmax.bf16 %v5571_v42, %v5567_v39  ;;  %v5438_v55 = vpack.c.bf16 %v7914_v54, %v7913_v26  ;;  %v4814_v41 = vmax.bf16 %v8362_v24, %v4750_v43 }
 0x442   : > { %v7874_v59 = vpop.f32.mrf.mxu1  ;;  %v4985_v31 = vpop.f32.mrf.mxu0 }
 0x443   : > { %v5510_v25 = vadd.bf16 %v9631_v48, %v5438_v55  ;;  %v4681_v4 = vpack.c.bf16 %v7874_v59, %v7873_v17  ;;  %v5437_v27 = vpack.c.bf16 %v4985_v31, %v4982_v14  ;;  %8011 = vmatprep.mubr.bf16.mxu0 %v4814_v41 }
 0x444   : > { %v4592_v60 = vpop.f32.mrf.mxu1  ;;  %v7917_v12 = vpop.f32.mrf.mxu0  ;;  %8012 = vmatmul.mubr.bf16.gmra.mxu0 %v4815_v35 }
 0x445   : > { %v5574_v62 = vmax.bf16 %v8362_v24, %v5510_v25  ;;  %v5509_v11 = vadd.bf16 %v9631_v48, %v5437_v27  ;;  %v4680_v10 = vpack.c.bf16 %v4592_v60, %v4589_v58  ;;  %v4753_v32 = vadd.bf16 %v9477_v18, %v4681_v4 }
 0x446   : > { %v7877_v22 = vpop.f32.mrf.mxu1  ;;  %v4998_v28 = vpop.f32.mrf.mxu0 }
 0x447   : > { %v9665_v21 = vmax.bf16 %v5630_v7, %v5574_v62  ;;  %v5573_v52 = vmax.bf16 %v8362_v24, %v5509_v11  ;;  %v4752_v23 = vadd.bf16 %v9477_v18, %v4680_v10  ;;  %v4817_v46 = vmax.bf16 %v8362_v24, %v4753_v32 }
 0x448   : > { %v4605_v40 = vpop.f32.mrf.mxu1  ;;  %v7918_v51 = vpop.f32.mrf.mxu0 }
 0x449   : > { %v9669_v45 = vmax.bf16 %v5629_v33, %v5573_v52  ;;  %v5440_v16 = vpack.c.bf16 %v7918_v51, %v7917_v12  ;;  %v4816_v1 = vmax.bf16 %v8362_v24, %v4752_v23 }
 0x44a   : > { %v7878_v36 = vpop.f32.mrf.mxu1  ;;  %v5001_v29 = vpop.f32.mrf.mxu0 }
 0x44b   : > { %v5512_v47 = vadd.bf16 %v9631_v48, %v5440_v16  ;;  %v4683_v8 = vpack.c.bf16 %v7878_v36, %v7877_v22  ;;  %v5439_v7 = vpack.c.bf16 %v5001_v29, %v4998_v28  ;;  %8015 = vmatprep.mubr.bf16.mxu0 %v4816_v1 }
 0x44c   : > { %v4608_v61 = vpop.f32.mrf.mxu1  ;;  %v7921_v0 = vpop.f32.mrf.mxu0  ;;  %8016 = vmatmul.mubr.bf16.gmra.mxu0 %v4817_v46 }
 0x44d   : > { %v5576_v37 = vmax.bf16 %v8362_v24, %v5512_v47  ;;  %v5511_v33 = vadd.bf16 %v9631_v48, %v5439_v7  ;;  %v4682_v56 = vpack.c.bf16 %v4608_v61, %v4605_v40  ;;  %v4755_v63 = vadd.bf16 %v9477_v18, %v4683_v8 }
 0x44e   : > { %v5014_v50 = vpop.f32.mrf.mxu0 }
 0x44f   : > { %v5636_v57 = vmax.bf16 %v5632_v5, %v5576_v37  ;;  %v5575_v2 = vmax.bf16 %v8362_v24, %v5511_v33  ;;  %v4754_v49 = vadd.bf16 %v9477_v18, %v4682_v56  ;;  %v4819_v26 = vmax.bf16 %v8362_v24, %v4755_v63 }
 0x450   : > { %v7922_v38 = vpop.f32.mrf.mxu0 }
 0x451   : > { %v5635_v53 = vmax.bf16 %v5631_v3, %v5575_v2  ;;  %v5442_v19 = vpack.c.bf16 %v7922_v38, %v7921_v0  ;;  %v4818_v44 = vmax.bf16 %v8362_v24, %v4754_v49 }
 0x452   : > { %v5017_v20 = vpop.f32.mrf.mxu0 }
 0x453   : > { %v5514_v30 = vadd.bf16 %v9631_v48, %v5442_v19  ;;  %v5441_v15 = vpack.c.bf16 %v5017_v20, %v5014_v50  ;;  %8019 = vmatprep.mubr.bf16.mxu0 %v4818_v44 }
 0x454   : > { %v7925_v34 = vpop.f32.mrf.mxu0  ;;  %8020 = vmatmul.mubr.bf16.gmra.mxu0 %v4819_v26 }
 0x455   : > { %v5578_v6 = vmax.bf16 %v8362_v24, %v5514_v30  ;;  %v5513_v17 = vadd.bf16 %v9631_v48, %v5441_v15 }
 0x456   : > { %v5030_v14 = vpop.f32.mrf.mxu0 }
 0x457   : > { %v5638_v18 = vmax.bf16 %v9665_v21, %v5578_v6  ;;  %v5577_v39 = vmax.bf16 %v8362_v24, %v5513_v17 }
 0x458   : > { %v7926_v5 = vpop.f32.mrf.mxu0 }
 0x459   : > { %v5637_v42 = vmax.bf16 %v9669_v45, %v5577_v39  ;;  %v5444_v43 = vpack.c.bf16 %v7926_v5, %v7925_v34 }
 0x45a   : > { %v5033_v58 = vpop.f32.mrf.mxu0 }
 0x45b   : > { %v5516_v54 = vadd.bf16 %v9631_v48, %v5444_v43  ;;  %v5443_v3 = vpack.c.bf16 %v5033_v58, %v5030_v14 }
 0x45c   : > { %v7929_v55 = vpop.f32.mrf.mxu0 }
 0x45d   : > { %v5580_v41 = vmax.bf16 %v8362_v24, %v5516_v54  ;;  %v5515_v35 = vadd.bf16 %v9631_v48, %v5443_v3 }
 0x45e   : > { %v5046_v59 = vpop.f32.mrf.mxu0 }
 0x45f   : > { %v5640_v31 = vmax.bf16 %v5636_v57, %v5580_v41  ;;  %v5579_v25 = vmax.bf16 %v8362_v24, %v5515_v35 }
 0x460   : > { %v7930_v4 = vpop.f32.mrf.mxu0 }
 0x461   : > { %v5639_v27 = vmax.bf16 %v5635_v53, %v5579_v25  ;;  %v5446_v60 = vpack.c.bf16 %v7930_v4, %v7929_v55 }
 0x462   : > { %v5049_v12 = vpop.f32.mrf.mxu0 }
 0x463   : > { %v5518_v62 = vadd.bf16 %v9631_v48, %v5446_v60  ;;  %v5445_v11 = vpack.c.bf16 %v5049_v12, %v5046_v59 }
 0x464   : > { %v7933_v10 = vpop.f32.mrf.mxu0 }
 0x465   : > { %v5582_v32 = vmax.bf16 %v8362_v24, %v5518_v62  ;;  %v5517_v22 = vadd.bf16 %v9631_v48, %v5445_v11 }
 0x466   : > { %v5062_v28 = vpop.f32.mrf.mxu0 }
 0x467   : > { %v5642_v21 = vmax.bf16 %v5638_v18, %v5582_v32  ;;  %v5581_v52 = vmax.bf16 %v8362_v24, %v5517_v22 }
 0x468   : > { %v7934_v23 = vpop.f32.mrf.mxu0 }
 0x469   : > { %v5641_v40 = vmax.bf16 %v5637_v42, %v5581_v52  ;;  %v5448_v51 = vpack.c.bf16 %v7934_v23, %v7933_v10 }
 0x46a   : > { %v5065_v45 = vpop.f32.mrf.mxu0 }
 0x46b   : > { %v5520_v16 = vadd.bf16 %v9631_v48, %v5448_v51  ;;  %v5447_v1 = vpack.c.bf16 %v5065_v45, %v5062_v28 }
 0x46c   : > { %v7937_v46 = vpop.f32.mrf.mxu0 }
 0x46d   : > { %v5584_v36 = vmax.bf16 %v8362_v24, %v5520_v16  ;;  %v5519_v29 = vadd.bf16 %v9631_v48, %v5447_v1 }
 0x46e   : > { %v5078_v47 = vpop.f32.mrf.mxu0 }
 0x46f   : > { %v5644_v8 = vmax.bf16 %v5640_v31, %v5584_v36  ;;  %v5583_v7 = vmax.bf16 %v8362_v24, %v5519_v29 }
 0x470   : > { %v7938_v61 = vpop.f32.mrf.mxu0 }
 0x471   : > { %v5643_v0 = vmax.bf16 %v5639_v27, %v5583_v7  ;;  %v5450_v37 = vpack.c.bf16 %v7938_v61, %v7937_v46 }
 0x472   : > { %v5081_v33 = vpop.f32.mrf.mxu0 }
 0x473   : > { %v5522_v56 = vadd.bf16 %v9631_v48, %v5450_v37  ;;  %v5449_v63 = vpack.c.bf16 %v5081_v33, %v5078_v47 }
 0x474   : > { %v7941_v50 = vpop.f32.mrf.mxu0 }
 0x475   : > { %v5586_v57 = vmax.bf16 %v8362_v24, %v5522_v56  ;;  %v5521_v2 = vadd.bf16 %v9631_v48, %v5449_v63 }
 0x476   : > { %v5094_v49 = vpop.f32.mrf.mxu0 }
 0x477   : > { %v5646_v38 = vmax.bf16 %v5642_v21, %v5586_v57  ;;  %v5585_v53 = vmax.bf16 %v8362_v24, %v5521_v2 }
 0x478   : > { %v7942_v19 = vpop.f32.mrf.mxu0 }
 0x479   : > { %v5645_v44 = vmax.bf16 %v5641_v40, %v5585_v53  ;;  %v5452_v26 = vpack.c.bf16 %v7942_v19, %v7941_v50 }
 0x47a   : > { %v5097_v20 = vpop.f32.mrf.mxu0 }
 0x47b   : > { %v5524_v30 = vadd.bf16 %v9631_v48, %v5452_v26  ;;  %v5451_v15 = vpack.c.bf16 %v5097_v20, %v5094_v49 }
 0x47c   : > { %v7945_v34 = vpop.f32.mrf.mxu0 }
 0x47d   : > { %v5588_v6 = vmax.bf16 %v8362_v24, %v5524_v30  ;;  %v5523_v17 = vadd.bf16 %v9631_v48, %v5451_v15 }
 0x47e   : > { %v5110_v14 = vpop.f32.mrf.mxu0 }
 0x47f   : > { %v5648_v18 = vmax.bf16 %v5644_v8, %v5588_v6  ;;  %v5587_v39 = vmax.bf16 %v8362_v24, %v5523_v17 }
 0x480   : > { %v7946_v5 = vpop.f32.mrf.mxu0 }
 0x481   : > { %v5647_v42 = vmax.bf16 %v5643_v0, %v5587_v39  ;;  %v5454_v43 = vpack.c.bf16 %v7946_v5, %v7945_v34 }
 0x482   : > { %v5113_v58 = vpop.f32.mrf.mxu0 }
 0x483   : > { %v5526_v54 = vadd.bf16 %v9631_v48, %v5454_v43  ;;  %v5453_v3 = vpack.c.bf16 %v5113_v58, %v5110_v14 }
 0x484   : > { %v7949_v55 = vpop.f32.mrf.mxu0 }
 0x485   : > { %v5590_v41 = vmax.bf16 %v8362_v24, %v5526_v54  ;;  %v5525_v35 = vadd.bf16 %v9631_v48, %v5453_v3 }
 0x486   : > { %v5126_v59 = vpop.f32.mrf.mxu0 }
 0x487   : > { %v5650_v31 = vmax.bf16 %v5646_v38, %v5590_v41  ;;  %v5589_v25 = vmax.bf16 %v8362_v24, %v5525_v35 }
 0x488   : > { %v7950_v4 = vpop.f32.mrf.mxu0 }
 0x489   : > { %v5649_v27 = vmax.bf16 %v5645_v44, %v5589_v25  ;;  %v5456_v60 = vpack.c.bf16 %v7950_v4, %v7949_v55 }
 0x48a   : > { %v5129_v12 = vpop.f32.mrf.mxu0 }
 0x48b   : > { %v5528_v62 = vadd.bf16 %v9631_v48, %v5456_v60  ;;  %v5455_v11 = vpack.c.bf16 %v5129_v12, %v5126_v59 }
 0x48c   : > { %v7953_v10 = vpop.f32.mrf.mxu0 }
 0x48d   : > { %v5592_v32 = vmax.bf16 %v8362_v24, %v5528_v62  ;;  %v5527_v22 = vadd.bf16 %v9631_v48, %v5455_v11 }
 0x48e   : > { %v5142_v28 = vpop.f32.mrf.mxu0 }
 0x48f   : > { %v5652_v21 = vmax.bf16 %v5648_v18, %v5592_v32  ;;  %v5591_v52 = vmax.bf16 %v8362_v24, %v5527_v22 }
 0x490   : > { %v7954_v23 = vpop.f32.mrf.mxu0 }
 0x491   : > { %v5651_v40 = vmax.bf16 %v5647_v42, %v5591_v52  ;;  %v5458_v51 = vpack.c.bf16 %v7954_v23, %v7953_v10 }
 0x492   : > { %v5145_v45 = vpop.f32.mrf.mxu0 }
 0x493   : > { %v5530_v16 = vadd.bf16 %v9631_v48, %v5458_v51  ;;  %v5457_v1 = vpack.c.bf16 %v5145_v45, %v5142_v28 }
 0x494   : > { %v7957_v46 = vpop.f32.mrf.mxu0 }
 0x495   : > { %v5594_v36 = vmax.bf16 %v8362_v24, %v5530_v16  ;;  %v5529_v29 = vadd.bf16 %v9631_v48, %v5457_v1 }
 0x496   : > { %v5158_v47 = vpop.f32.mrf.mxu0 }
 0x497   : > { %v5654_v8 = vmax.bf16 %v5650_v31, %v5594_v36  ;;  %v5593_v7 = vmax.bf16 %v8362_v24, %v5529_v29 }
 0x498   : > { %v7958_v61 = vpop.f32.mrf.mxu0 }
 0x499   : > { %v5653_v0 = vmax.bf16 %v5649_v27, %v5593_v7  ;;  %v5460_v37 = vpack.c.bf16 %v7958_v61, %v7957_v46 }
 0x49a   : > { %v5161_v33 = vpop.f32.mrf.mxu0 }
 0x49b   : > { %v5532_v56 = vadd.bf16 %v9631_v48, %v5460_v37  ;;  %v5459_v63 = vpack.c.bf16 %v5161_v33, %v5158_v47 }
 0x49c   : > { %v7961_v50 = vpop.f32.mrf.mxu0 }
 0x49d   : > { %v5596_v57 = vmax.bf16 %v8362_v24, %v5532_v56  ;;  %v5531_v2 = vadd.bf16 %v9631_v48, %v5459_v63 }
 0x49e   : > { %v5174_v49 = vpop.f32.mrf.mxu0 }
 0x49f   : > { %v5656_v38 = vmax.bf16 %v5652_v21, %v5596_v57  ;;  %v5595_v53 = vmax.bf16 %v8362_v24, %v5531_v2 }
 0x4a0   : > { %v7962_v19 = vpop.f32.mrf.mxu0 }
 0x4a1   : > { %v5655_v44 = vmax.bf16 %v5651_v40, %v5595_v53  ;;  %v5462_v26 = vpack.c.bf16 %v7962_v19, %v7961_v50 }
 0x4a2   : > { %v5177_v20 = vpop.f32.mrf.mxu0 }
 0x4a3   : > { %v5534_v30 = vadd.bf16 %v9631_v48, %v5462_v26  ;;  %v5461_v15 = vpack.c.bf16 %v5177_v20, %v5174_v49 }
 0x4a4   : > { %v7965_v34 = vpop.f32.mrf.mxu0 }
 0x4a5   : > { %v5598_v6 = vmax.bf16 %v8362_v24, %v5534_v30  ;;  %v5533_v17 = vadd.bf16 %v9631_v48, %v5461_v15 }
 0x4a6   : > { %v5190_v14 = vpop.f32.mrf.mxu0 }
 0x4a7   : > { %v5658_v18 = vmax.bf16 %v5654_v8, %v5598_v6  ;;  %v5597_v39 = vmax.bf16 %v8362_v24, %v5533_v17 }
 0x4a8   : > { %v7966_v5 = vpop.f32.mrf.mxu0 }
 0x4a9   : > { %v5657_v42 = vmax.bf16 %v5653_v0, %v5597_v39  ;;  %v5464_v43 = vpack.c.bf16 %v7966_v5, %v7965_v34 }
 0x4aa   : > { %v5193_v58 = vpop.f32.mrf.mxu0 }
 0x4ab   : > { %v5536_v54 = vadd.bf16 %v9631_v48, %v5464_v43  ;;  %v5463_v3 = vpack.c.bf16 %v5193_v58, %v5190_v14 }
 0x4ac   : > { %v7969_v55 = vpop.f32.mrf.mxu0 }
 0x4ad   : > { %v5600_v41 = vmax.bf16 %v8362_v24, %v5536_v54  ;;  %v5535_v35 = vadd.bf16 %v9631_v48, %v5463_v3 }
 0x4ae   : > { %v5206_v59 = vpop.f32.mrf.mxu0 }
 0x4af   : > { %v5660_v31 = vmax.bf16 %v5656_v38, %v5600_v41  ;;  %v5599_v25 = vmax.bf16 %v8362_v24, %v5535_v35 }
 0x4b0   : > { %v7970_v4 = vpop.f32.mrf.mxu0 }
 0x4b1   : > { %v5659_v27 = vmax.bf16 %v5655_v44, %v5599_v25  ;;  %v5466_v60 = vpack.c.bf16 %v7970_v4, %v7969_v55 }
 0x4b2   : > { %v5209_v12 = vpop.f32.mrf.mxu0 }
 0x4b3   : > { %v5538_v62 = vadd.bf16 %v9631_v48, %v5466_v60  ;;  %v5465_v11 = vpack.c.bf16 %v5209_v12, %v5206_v59 }
 0x4b4   : > { %v7973_v10 = vpop.f32.mrf.mxu0 }
 0x4b5   : > { %v5602_v32 = vmax.bf16 %v8362_v24, %v5538_v62  ;;  %v5537_v22 = vadd.bf16 %v9631_v48, %v5465_v11 }
 0x4b6   : > { %v5222_v28 = vpop.f32.mrf.mxu0 }
 0x4b7   : > { %v5662_v21 = vmax.bf16 %v5658_v18, %v5602_v32  ;;  %v5601_v52 = vmax.bf16 %v8362_v24, %v5537_v22 }
 0x4b8   : > { %v7974_v23 = vpop.f32.mrf.mxu0 }
 0x4b9   : > { %v5661_v40 = vmax.bf16 %v5657_v42, %v5601_v52  ;;  %v5468_v51 = vpack.c.bf16 %v7974_v23, %v7973_v10 }
 0x4ba   : > { %v5225_v45 = vpop.f32.mrf.mxu0 }
 0x4bb   : > { %v5540_v16 = vadd.bf16 %v9631_v48, %v5468_v51  ;;  %v5467_v1 = vpack.c.bf16 %v5225_v45, %v5222_v28 }
 0x4bc   : > { %v7977_v46 = vpop.f32.mrf.mxu0 }
 0x4bd   : > { %v5604_v36 = vmax.bf16 %v8362_v24, %v5540_v16  ;;  %v5539_v29 = vadd.bf16 %v9631_v48, %v5467_v1 }
 0x4be   : > { %v5238_v47 = vpop.f32.mrf.mxu0 }
 0x4bf   : > { %v5664_v8 = vmax.bf16 %v5660_v31, %v5604_v36  ;;  %v5603_v7 = vmax.bf16 %v8362_v24, %v5539_v29 }
 0x4c0   : > { %v7978_v61 = vpop.f32.mrf.mxu0 }
 0x4c1   : > { %v5663_v0 = vmax.bf16 %v5659_v27, %v5603_v7  ;;  %v5470_v37 = vpack.c.bf16 %v7978_v61, %v7977_v46 }
 0x4c2   : > { %v5241_v33 = vpop.f32.mrf.mxu0 }
 0x4c3   : > { %v5542_v56 = vadd.bf16 %v9631_v48, %v5470_v37  ;;  %v5469_v63 = vpack.c.bf16 %v5241_v33, %v5238_v47 }
 0x4c4   : > { %v7981_v50 = vpop.f32.mrf.mxu0 }
 0x4c5   : > { %v5606_v57 = vmax.bf16 %v8362_v24, %v5542_v56  ;;  %v5541_v2 = vadd.bf16 %v9631_v48, %v5469_v63 }
 0x4c6   : > { %v5254_v49 = vpop.f32.mrf.mxu0 }
 0x4c7   : > { %v9742_v38 = vmax.bf16 %v5662_v21, %v5606_v57  ;;  %v5605_v53 = vmax.bf16 %v8362_v24, %v5541_v2 }
 0x4c8   : > { %v7982_v19 = vpop.f32.mrf.mxu0 }
 0x4c9   : > { %v9745_v44 = vmax.bf16 %v5661_v40, %v5605_v53  ;;  %v5472_v26 = vpack.c.bf16 %v7982_v19, %v7981_v50 }
 0x4ca   : > { %v5257_v20 = vpop.f32.mrf.mxu0 }
 0x4cb   : > { %v5544_v30 = vadd.bf16 %v9631_v48, %v5472_v26  ;;  %v5471_v15 = vpack.c.bf16 %v5257_v20, %v5254_v49 }
 0x4cc   : > { %v7985_v34 = vpop.f32.mrf.mxu0 }
 0x4cd   : > { %v5608_v6 = vmax.bf16 %v8362_v24, %v5544_v30  ;;  %v5543_v17 = vadd.bf16 %v9631_v48, %v5471_v15 }
 0x4ce   : > { %v5270_v14 = vpop.f32.mrf.mxu0 }
 0x4cf   : > { %v9750_v18 = vmax.bf16 %v5664_v8, %v5608_v6  ;;  %v5607_v39 = vmax.bf16 %v8362_v24, %v5543_v17 }
 0x4d0   : > { %v7986_v5 = vpop.f32.mrf.mxu0 }
 0x4d1   : > { %v9753_v42 = vmax.bf16 %v5663_v0, %v5607_v39  ;;  %v5474_v43 = vpack.c.bf16 %v7986_v5, %v7985_v34 }
 0x4d2   : > { %v5273_v58 = vpop.f32.mrf.mxu0 }
 0x4d3   : > { %v5546_v54 = vadd.bf16 %v9631_v48, %v5474_v43  ;;  %v5473_v3 = vpack.c.bf16 %v5273_v58, %v5270_v14 }
 0x4d4   : > { %v7989_v55 = vpop.f32.mrf.mxu0 }
 0x4d5   : > { %v5610_v41 = vmax.bf16 %v8362_v24, %v5546_v54  ;;  %v5545_v35 = vadd.bf16 %v9631_v48, %v5473_v3 }
 0x4d6   : > { %v5286_v59 = vpop.f32.mrf.mxu0 }
 0x4d7   : > { %v5670_v31 = vmax.bf16 %v9742_v38, %v5610_v41  ;;  %v5609_v25 = vmax.bf16 %v8362_v24, %v5545_v35 }
 0x4d8   : > { %v7990_v4 = vpop.f32.mrf.mxu0 }
 0x4d9   : > { %v5669_v27 = vmax.bf16 %v9745_v44, %v5609_v25  ;;  %v5476_v38 = vpack.c.bf16 %v7990_v4, %v7989_v55 }
 0x4da   : > { %v5289_v60 = vpop.f32.mrf.mxu0 }
 0x4db   : > { %v5475_v19 = vpack.c.bf16 %v5289_v60, %v5286_v59  ;;  %v5548_v39 = vadd.bf16 %v9631_v48, %v5476_v38 }
 0x4dc   : > { %v7993_v12 = vpop.f32.mrf.mxu0 }
 0x4dd   : > { %v5547_v43 = vadd.bf16 %v9631_v48, %v5475_v19 }
 0x4de   : > { %v5302_v62 = vpop.f32.mrf.mxu0 }
 0x4e0   : > { %v7994_v11 = vpop.f32.mrf.mxu0 }
 0x4e1   : > { %v5478_v7 = vpack.c.bf16 %v7994_v11, %v7993_v12 }
 0x4e2   : > { %v5305_v10 = vpop.f32.mrf.mxu0 }
 0x4e3   : > { %v5477_v0 = vpack.c.bf16 %v5305_v10, %v5302_v62  ;;  %v5550_v33 = vadd.bf16 %v9631_v48, %v5478_v7 }
 0x4e4   : > { %v7997_v32 = vpop.f32.mrf.mxu0 }
 0x4e5   : > { %v5549_v50 = vadd.bf16 %v9631_v48, %v5477_v0  ;;  %v5614_v44 = vmax.bf16 %v8362_v24, %v5550_v33 }
 0x4e6   : > { %v5318_v22 = vpop.f32.mrf.mxu0 }
 0x4e7   : > { %v5613_v30 = vmax.bf16 %v8362_v24, %v5549_v50  ;;  %v5674_v58 = vmax.bf16 %v5670_v31, %v5614_v44 }
 0x4e8   : > { %v7998_v28 = vpop.f32.mrf.mxu0 }
 0x4e9   : > { %v5480_v34 = vpack.c.bf16 %v7998_v28, %v7997_v32  ;;  %v5673_v41 = vmax.bf16 %v5669_v27, %v5613_v30  ;;  %v5612_v27 = vmax.bf16 %v8362_v24, %v5548_v39  ;;  %v5611_v28 = vmax.bf16 %v8362_v24, %v5547_v43 }
 0x4ea   : > { %v5321_v21 = vpop.f32.mrf.mxu0 }
 0x4eb   : > { %v5479_v6 = vpack.c.bf16 %v5321_v21, %v5318_v22  ;;  %v5552_v4 = vadd.bf16 %v9631_v48, %v5480_v34  ;;  %v5672_v0 = vmax.bf16 %v9750_v18, %v5612_v27 }
 0x4ec   : > { %v8001_v52 = vpop.f32.mrf.mxu0 }
 0x4ed   : > { %v5551_v60 = vadd.bf16 %v9631_v48, %v5479_v6 }
 0x4ee   : > { %v5334_v23 = vpop.f32.mrf.mxu0 }
 0x4f0   : > { %v8002_v40 = vpop.f32.mrf.mxu0 }
 0x4f1   : > { %v5482_v56 = vpack.c.bf16 %v8002_v40, %v8001_v52 }
 0x4f2   : > { %v5337_v51 = vpop.f32.mrf.mxu0 }
 0x4f3   : > { %v5481_v57 = vpack.c.bf16 %v5337_v51, %v5334_v23  ;;  %v5554_v26 = vadd.bf16 %v9631_v48, %v5482_v56 }
 0x4f4   : > { %v8005_v45 = vpop.f32.mrf.mxu0 }
 0x4f5   : > { %v5553_v15 = vadd.bf16 %v9631_v48, %v5481_v57  ;;  %v5618_v54 = vmax.bf16 %v8362_v24, %v5554_v26 }
 0x4f6   : > { %v5350_v16 = vpop.f32.mrf.mxu0 }
 0x4f7   : > { %v5617_v35 = vmax.bf16 %v8362_v24, %v5553_v15  ;;  %v5678_v21 = vmax.bf16 %v5674_v58, %v5618_v54 }
 0x4f8   : > { %v8006_v1 = vpop.f32.mrf.mxu0 }
 0x4f9   : > { %v5484_v3 = vpack.c.bf16 %v8006_v1, %v8005_v45  ;;  %v5677_v40 = vmax.bf16 %v5673_v41, %v5617_v35  ;;  %v5616_v1 = vmax.bf16 %v8362_v24, %v5552_v4 }
 0x4fa   : > { %v5353_v46 = vpop.f32.mrf.mxu0 }
 0x4fb   : > { %v5483_v59 = vpack.c.bf16 %v5353_v46, %v5350_v16  ;;  %v5556_v52 = vadd.bf16 %v9631_v48, %v5484_v3  ;;  %v5615_v46 = vmax.bf16 %v8362_v24, %v5551_v60 }
 0x4fc   : > { %v8009_v36 = vpop.f32.mrf.mxu0 }
 0x4fd   : > { %v5555_v51 = vadd.bf16 %v9631_v48, %v5483_v59  ;;  %v5620_v33 = vmax.bf16 %v8362_v24, %v5556_v52 }
 0x4fe   : > { %v5366_v29 = vpop.f32.mrf.mxu0 }
 0x500   : > { %v8010_v47 = vpop.f32.mrf.mxu0 }
 0x501   : > { %v5486_v2 = vpack.c.bf16 %v8010_v47, %v8009_v36 }
 0x502   : > { %v5369_v8 = vpop.f32.mrf.mxu0 }
 0x503   : > { %v5485_v53 = vpack.c.bf16 %v5369_v8, %v5366_v29  ;;  %v5558_v17 = vadd.bf16 %v9631_v48, %v5486_v2 }
 0x504   : > { %v8013_v61 = vpop.f32.mrf.mxu0 }
 0x505   : > { %v5557_v5 = vadd.bf16 %v9631_v48, %v5485_v53  ;;  %v5622_v12 = vmax.bf16 %v8362_v24, %v5558_v17 }
 0x506   : > { %v5382_v37 = vpop.f32.mrf.mxu0 }
 0x507   : > { %v5621_v10 = vmax.bf16 %v8362_v24, %v5557_v5  ;;  %v5682_v47 = vmax.bf16 %v5678_v21, %v5622_v12 }
 0x508   : > { %v8014_v63 = vpop.f32.mrf.mxu0 }
 0x509   : > { %v5488_v62 = vpack.c.bf16 %v8014_v63, %v8013_v61  ;;  %v5681_v8 = vmax.bf16 %v5677_v40, %v5621_v10  ;;  %v5619_v63 = vmax.bf16 %v8362_v24, %v5555_v51 }
 0x50a   : > { %v5385_v49 = vpop.f32.mrf.mxu0 }
 0x50b   : > { %v5487_v31 = vpack.c.bf16 %v5385_v49, %v5382_v37  ;;  %v5560_v36 = vadd.bf16 %v9631_v48, %v5488_v62  ;;  %v5671_v37 = vmax.bf16 %v9753_v42, %v5611_v28  ;;  %v5676_v49 = vmax.bf16 %v5672_v0, %v5616_v1 }
 0x50c   : > { %v8017_v20 = vpop.f32.mrf.mxu0 }
 0x50d   : > { %v5559_v7 = vadd.bf16 %v9631_v48, %v5487_v31  ;;  %v5675_v38 = vmax.bf16 %v5671_v37, %v5615_v46  ;;  %v5624_v53 = vmax.bf16 %v8362_v24, %v5560_v36 }
 0x50e   : > { %v5398_v14 = vpop.f32.mrf.mxu0 }
 0x50f   : > { %v5623_v44 = vmax.bf16 %v8362_v24, %v5559_v7  ;;  %v5679_v30 = vmax.bf16 %v5675_v38, %v5619_v63 }
 0x510   : > { %v8018_v55 = vpop.f32.mrf.mxu0 }
 0x511   : > { %v5490_v25 = vpack.c.bf16 %v8018_v55, %v8017_v20  ;;  %v5680_v20 = vmax.bf16 %v5676_v49, %v5620_v33  ;;  %v5683_v17 = vmax.bf16 %v5679_v30, %v5623_v44 }
 0x512   : > { %v5401_v11 = vpop.f32.mrf.mxu0 }
 0x513   : > { %v5562_v32 = vadd.bf16 %v9631_v48, %v5490_v25  ;;  %v5489_v22 = vpack.c.bf16 %v5401_v11, %v5398_v14  ;;  %v5684_v6 = vmax.bf16 %v5680_v20, %v5624_v53 }
 0x514   : > { %v8021_v23 = vpop.f32.mrf.mxu0 }
 0x515   : > { %v5626_v45 = vmax.bf16 %v8362_v24, %v5562_v32  ;;  %v5561_v16 = vadd.bf16 %v9631_v48, %v5489_v22 }
 0x516   : > { %v5414_v29 = vpop.f32.mrf.mxu0 }
 0x517   : > { %v5625_v61 = vmax.bf16 %v8362_v24, %v5561_v16  ;;  %v5686_v50 = vmax.bf16 %v5682_v47, %v5626_v45 }
 0x518   : > { %v8022_v56 = vpop.f32.mrf.mxu0 }
 0x519   : > { %v5685_v57 = vmax.bf16 %v5681_v8, %v5625_v61  ;;  %v5492_v2 = vpack.c.bf16 %v8022_v56, %v8021_v23 }
 0x51a   : > { %v5417_v19 = vpop.f32.mrf.mxu0 }
 0x51b   : > { %v5689_v26 = vmax.bf16 %v5686_v50, %v5685_v57  ;;  %v5564_v18 = vadd.bf16 %v9631_v48, %v5492_v2  ;;  %v5491_v42 = vpack.c.bf16 %v5417_v19, %v5414_v29 }
 0x51d   : > { %v5628_v15 = vmax.bf16 %v8362_v24, %v5564_v18  ;;  %v5563_v34 = vadd.bf16 %v9631_v48, %v5491_v42 }
 0x51f   : > { %v5627_v14 = vmax.bf16 %v8362_v24, %v5563_v34  ;;  %v5688_v39 = vmax.bf16 %v5684_v6, %v5628_v15 }
 0x521   : > { %v5687_v5 = vmax.bf16 %v5683_v17, %v5627_v14  ;;  %5695 = sbr.rel (%p6870_p0) target bundleno = 1322 (0x52a), region = 84 }
 0x523   : > { %v5690_v43 = vmax.bf16 %v5688_v39, %v5687_v5 }
 0x525   : > { %v5691_v58 = vmax.bf16 %v5690_v43, %v5689_v26 }
 0x527   : > { %v6871_v54 = vcombine.low %v5691_v58, %v5691_v58  ;;  %v6872_v3 = vcombine.high %v5691_v58, %v5691_v58 }
 0x529   : > { %5703 = vst [vmem:[#allocation2] sm:$0xf] %v6871_v54  ;;  %5704 = vst [vmem:[#allocation2 + $0x4] sm:$0xf] %v6872_v3 }
 0x52a PF: > { %p6873_p1 = scmp.le.s32.totalorder %s8344_s21, 0 }
 0x52c   : > { %5708 = sbr.rel (%p6873_p1) target bundleno = 1336 (0x538), region = 88 }
 0x531   : > { %v5709_v48 = vld [vmem:[#allocation2] sm:$0xf]  ;;  %v5710_v55 = vld [vmem:[#allocation2 + $0x4] sm:$0xf]  ;;  %v6874_v24 = vcombine.low %v5691_v58, %v5691_v58  ;;  %v6875_v41 = vcombine.high %v5691_v58, %v5691_v58 }
 0x533   : > { %v5718_v35 = vmax.bf16 %v6874_v24, %v5709_v48  ;;  %v5719_v59 = vmax.bf16 %v6875_v41, %v5710_v55 }
 0x535   : > { %v6955_v25 = vcombine.low %v5718_v35, %v5719_v59 }
 0x537   : > { %6954 = vst [vmem:[#allocation2] sm:$0xff] %v6955_v25  }
 0x538 PF: > { %p6876_p2 = scmp.ne.s32.totalorder %s8344_s21, 1 }
 0x53a   : > { %5725 = sbr.rel (%p6876_p2) target bundleno = 1789 (0x6fd), region = 92 }
 0x53f   : > { %v8187_v4 = vld [vmem:[%s10089_s11 + $0xe4] ss:$16 sps:$4 sm:$0xff]   ;;  %v8189_v60 = vld [vmem:[%s10089_s11 + $0xec] ss:$16 sps:$4 sm:$0xff]   ;;  %v8363_v12 = vmov 0  }
 0x540   : > { %5958 = vmatprep.mubr.bf16.mxu0 %v8363_v12  ;;  %6001 = vmatprep.mubr.bf16.mxu1 %v8363_v12  ;;  %v8191_v62 = vld [vmem:[%s10089_s11 + $0xe0] ss:$16 sps:$4 sm:$0xff]   ;;  %v8192_v11 = vld [vmem:[%s10089_s11 + $0xe8] ss:$16 sps:$4 sm:$0xff]   ;;  %v8193_v10 = vld [vmem:[%s10089_s11 + $0xc4] ss:$16 sps:$4 sm:$0xff]  }
 0x541   : > { %5926 = vmatprep.subr.bf16.mxu0 %v8187_v4  ;;  %5969 = vmatprep.subr.bf16.mxu1 %v8189_v60  ;;  %v8195_v31 = vld [vmem:[%s10089_s11 + $0xcc] ss:$16 sps:$4 sm:$0xff]   ;;  %v8197_v32 = vld [vmem:[%s10089_s11 + $0xc0] ss:$16 sps:$4 sm:$0xff]   ;;  %v8198_v22 = vld [vmem:[%s10089_s11 + $0xc8] ss:$16 sps:$4 sm:$0xff]  }
 0x542   : > { %5927 = vmatpush1.bf16.msra.mxu0 %v8191_v62  ;;  %5970 = vmatpush1.bf16.msra.mxu1 %v8192_v11  ;;  %v8199_v27 = vld [vmem:[%s10089_s11 + $0xa4] ss:$16 sps:$4 sm:$0xff]   ;;  %v8201_v28 = vld [vmem:[%s10089_s11 + $0xac] ss:$16 sps:$4 sm:$0xff]   ;;  %v8203_v21 = vld [vmem:[%s10089_s11 + $0xa0] ss:$16 sps:$4 sm:$0xff]  }
 0x543   : > { %5928 = vmatprep.subr.bf16.mxu0 %v8193_v10  ;;  %5971 = vmatprep.subr.bf16.mxu1 %v8195_v31  ;;  %v8204_v52 = vld [vmem:[%s10089_s11 + $0xa8] ss:$16 sps:$4 sm:$0xff]   ;;  %v8205_v23 = vld [vmem:[%s10089_s11 + $0x84] ss:$16 sps:$4 sm:$0xff]   ;;  %v8207_v40 = vld [vmem:[%s10089_s11 + $0x8c] ss:$16 sps:$4 sm:$0xff]  }
 0x544   : > { %v8209_v51 = vld [vmem:[%s10089_s11 + $0x80] ss:$16 sps:$4 sm:$0xff]   ;;  %v8210_v45 = vld [vmem:[%s10089_s11 + $0x88] ss:$16 sps:$4 sm:$0xff]   ;;  %v8211_v16 = vld [vmem:[%s10089_s11 + $0x64] ss:$16 sps:$4 sm:$0xff]  }
 0x545   : > { %v8213_v1 = vld [vmem:[%s10089_s11 + $0x6c] ss:$16 sps:$4 sm:$0xff]   ;;  %v8215_v46 = vld [vmem:[%s10089_s11 + $0x60] ss:$16 sps:$4 sm:$0xff]   ;;  %v8216_v36 = vld [vmem:[%s10089_s11 + $0x68] ss:$16 sps:$4 sm:$0xff]  }
 0x546   : > { %5929 = vmatpush1.bf16.msra.mxu0 %v8197_v32  ;;  %5972 = vmatpush1.bf16.msra.mxu1 %v8198_v22  ;;  %v8217_v29 = vld [vmem:[%s10089_s11 + $0x44] ss:$16 sps:$4 sm:$0xff]   ;;  %v8219_v47 = vld [vmem:[%s10089_s11 + $0x4c] ss:$16 sps:$4 sm:$0xff]   ;;  %v8221_v8 = vld [vmem:[%s10089_s11 + $0x40] ss:$16 sps:$4 sm:$0xff]  }
 0x547   : > { %5930 = vmatprep.subr.bf16.mxu0 %v8199_v27  ;;  %5973 = vmatprep.subr.bf16.mxu1 %v8201_v28  ;;  %v8222_v7 = vld [vmem:[%s10089_s11 + $0x48] ss:$16 sps:$4 sm:$0xff]   ;;  %v8223_v61 = vld [vmem:[%s10089_s11 + $0x24] ss:$16 sps:$4 sm:$0xff]   ;;  %v8225_v0 = vld [vmem:[%s10089_s11 + $0x2c] ss:$16 sps:$4 sm:$0xff]  }
 0x548   : > { %v8227_v37 = vld [vmem:[%s10089_s11 + $0x20] ss:$16 sps:$4 sm:$0xff]   ;;  %v8228_v33 = vld [vmem:[%s10089_s11 + $0x28] ss:$16 sps:$4 sm:$0xff]   ;;  %v8229_v56 = vld [vmem:[%s10089_s11 + $0x4] ss:$16 sps:$4 sm:$0xff]  }
 0x549   : > { %v8231_v63 = vld [vmem:[%s10089_s11 + $0xc] ss:$16 sps:$4 sm:$0xff]   ;;  %v8233_v50 = vld [vmem:[%s10089_s11] ss:$16 sps:$4 sm:$0xff]   ;;  %v8234_v57 = vld [vmem:[%s10089_s11 + $0x8] ss:$16 sps:$4 sm:$0xff]  }
 0x54a   : > { %5931 = vmatpush1.bf16.msra.mxu0 %v8203_v21  ;;  %5974 = vmatpush1.bf16.msra.mxu1 %v8204_v52  ;;  %v8236_v2 = vld [vmem:[%s10091_s13 + $0x78] sm:$0xff]   ;;  %v8235_v49 = vld [vmem:[#allocation2] sm:$0xff]   ;;  %v8240_v44 = vld [vmem:[%s10091_s13 + $0x70] sm:$0xff]   ;;  %v8364_v10 = vmov 1966171168  }
 0x54b   : > { %5932 = vmatprep.subr.bf16.mxu0 %v8205_v23  ;;  %5975 = vmatprep.subr.bf16.mxu1 %v8207_v40  ;;  %v8237_v38 = vld [vmem:[%s10091_s13 + $0xf8] sm:$0xff]   ;;  %v8241_v26 = vld [vmem:[%s10091_s13 + $0xf0] sm:$0xff]   ;;  %v8244_v20 = vld [vmem:[%s10091_s13 + $0x68] sm:$0xff]   ;;  %v6027_v31 = vunpack.c.l.s4 %v8364_v10 }
 0x54c   : > { %v8238_v53 = vld [vmem:[%s10091_s13 + $0x38] sm:$0xff]   ;;  %v8242_v18 = vld [vmem:[%s10091_s13 + $0x30] sm:$0xff]   ;;  %v8245_v30 = vld [vmem:[%s10091_s13 + $0xe8] sm:$0xff]  }
 0x54d   : > { %v8239_v19 = vld [vmem:[%s10091_s13 + $0xb8] sm:$0xff]   ;;  %v8243_v42 = vld [vmem:[%s10091_s13 + $0xb0] sm:$0xff]   ;;  %v8246_v15 = vld [vmem:[%s10091_s13 + $0x28] sm:$0xff]   ;;  %v6028_v32 = vunpack.c.0.s8 %v6027_v31 }
 0x54e   : > { %5933 = vmatpush1.bf16.msra.mxu0 %v8209_v51  ;;  %5976 = vmatpush1.bf16.msra.mxu1 %v8210_v45  ;;  %v8247_v34 = vld [vmem:[%s10091_s13 + $0xa8] sm:$0xff]   ;;  %v8248_v6 = vld [vmem:[%s10091_s13 + $0x60] sm:$0xff]   ;;  %v8252_v5 = vld [vmem:[%s10091_s13 + $0x58] sm:$0xff]  }
 0x54f   : > { %5934 = vmatprep.subr.bf16.mxu0 %v8211_v16  ;;  %5977 = vmatprep.subr.bf16.mxu1 %v8213_v1  ;;  %v8249_v17 = vld [vmem:[%s10091_s13 + $0xe0] sm:$0xff]   ;;  %v8253_v43 = vld [vmem:[%s10091_s13 + $0xd8] sm:$0xff]   ;;  %v8256_v3 = vld [vmem:[%s10091_s13 + $0x50] sm:$0xff]   ;;  %v6031_v27 = vsub.s32 %v6028_v32, %v8680_v9 }
 0x550   : > { %v8250_v14 = vld [vmem:[%s10091_s13 + $0x20] sm:$0xff]   ;;  %v8254_v58 = vld [vmem:[%s10091_s13 + $0x18] sm:$0xff]   ;;  %v8257_v48 = vld [vmem:[%s10091_s13 + $0xd0] sm:$0xff]  }
 0x551   : > { %v8251_v39 = vld [vmem:[%s10091_s13 + $0xa0] sm:$0xff]   ;;  %v8255_v54 = vld [vmem:[%s10091_s13 + $0x98] sm:$0xff]   ;;  %v8258_v55 = vld [vmem:[%s10091_s13 + $0x10] sm:$0xff]  }
 0x552   : > { %5935 = vmatpush1.bf16.msra.mxu0 %v8215_v46  ;;  %5978 = vmatpush1.bf16.msra.mxu1 %v8216_v36  ;;  %v8259_v24 = vld [vmem:[%s10091_s13 + $0x90] sm:$0xff]   ;;  %v8260_v41 = vld [vmem:[%s10091_s13 + $0x48] sm:$0xff]   ;;  %v8264_v4 = vld [vmem:[%s10091_s13 + $0x40] sm:$0xff]  }
 0x553   : > { %5936 = vmatprep.subr.bf16.mxu0 %v8217_v29  ;;  %5979 = vmatprep.subr.bf16.mxu1 %v8219_v47  ;;  %v8261_v35 = vld [vmem:[%s10091_s13 + $0xc8] sm:$0xff]   ;;  %v8265_v60 = vld [vmem:[%s10091_s13 + $0xc0] sm:$0xff]  }
 0x554   : > { %v8262_v59 = vld [vmem:[%s10091_s13 + $0x8] sm:$0xff]   ;;  %v8266_v62 = vld [vmem:[%s10091_s13] sm:$0xff]  }
 0x555   : > { %v8263_v25 = vld [vmem:[%s10091_s13 + $0x88] sm:$0xff]   ;;  %v8267_v11 = vld [vmem:[%s10091_s13 + $0x80] sm:$0xff]  }
 0x556   : > { %5937 = vmatpush1.bf16.msra.mxu0 %v8221_v8  ;;  %5980 = vmatpush1.bf16.msra.mxu1 %v8222_v7  ;;  %v6910_v22 = vld.sshfl [vmem:[%s10090_s12] sm:$0x33 pattern:$0x75316420] }
 0x557   : > { %5938 = vmatprep.subr.bf16.mxu0 %v8223_v61  ;;  %5981 = vmatprep.subr.bf16.mxu1 %v8225_v0  ;;  %v6025_v28 = vcombine.high %v6910_v22, %v6910_v22  ;;  %v6032_v21 = vrot.slane %v6910_v22, %v6031_v27 }
 0x559   : > { %v6039_v52 = vrot.slane %v6025_v28, %v6031_v27  ;;  %v6040_v23 = vcombine.high %v6032_v21, %v6032_v21  ;;  %v6043_v16 = vpack.i.b16 %v6032_v21, %v6032_v21 }
 0x55a   : > { %5939 = vmatpush1.bf16.msra.mxu0 %v8227_v37  ;;  %5982 = vmatpush1.bf16.msra.mxu1 %v8228_v33 }
 0x55b   : > { %5940 = vmatprep.subr.bf16.mxu0 %v8229_v56  ;;  %5983 = vmatprep.subr.bf16.mxu1 %v8231_v63  ;;  %v6041_v40 = vcombine.high %v6039_v52, %v6039_v52  ;;  %v6057_v1 = vpack.i.b16 %v6040_v23, %v6040_v23  ;;  %v6050_v46 = vpack.i.b16 %v6039_v52, %v6039_v52 }
 0x55c   : > { %v6048_v7 = vrot.slane %v6043_v16, %v8686_v13 }
 0x55d   : > { %v6064_v36 = vpack.i.b16 %v6041_v40, %v6041_v40  ;;  %v6062_v0 = vrot.slane %v6057_v1, %v8686_v13  ;;  %v6055_v33 = vrot.slane %v6050_v46, %v8686_v13 }
 0x55e   : > { %5941 = vmatpush1.bf16.msra.mxu0 %v8233_v50  ;;  %5984 = vmatpush1.bf16.msra.mxu1 %v8234_v57 }
 0x55f   : > { %7297 = vmatprep.subr.bf16.mxu0 %v8236_v2  ;;  %7319 = vmatprep.subr.bf16.mxu1 %v8237_v38  ;;  %v6069_v56 = vrot.slane %v6064_v36, %v8686_v13 }
 0x561   : > { %5959 = vmatmul.mubr.bf16.vlgmr.msra.gmra.mxu0 %v8235_v49  ;;  %6002 = vmatmul.mubr.bf16.vlgmr.msra.gmra.mxu1 %v8235_v49 }
 0x562   : > { %7298 = vmatpush3.bf16.msra.mxu0 %v8238_v53  ;;  %7320 = vmatpush3.bf16.msra.mxu1 %v8239_v19 }
 0x563   : > { %7299 = vmatprep.subr.bf16.mxu0 %v8240_v44  ;;  %7321 = vmatprep.subr.bf16.mxu1 %v8241_v26 }
 0x566   : > { %7300 = vmatpush3.bf16.msra.mxu0 %v8242_v18  ;;  %7322 = vmatpush3.bf16.msra.mxu1 %v8243_v42 }
 0x567   : > { %7301 = vmatprep.subr.bf16.mxu0 %v8244_v20  ;;  %7323 = vmatprep.subr.bf16.mxu1 %v8245_v30  ;;  %v6911_v30 = vld [vmem:[%s10092_s14] ss:$0 sm:$0xff] }
 0x56a   : > { %7302 = vmatpush3.bf16.msra.mxu0 %v8246_v15  ;;  %7324 = vmatpush3.bf16.msra.mxu1 %v8247_v34 }
 0x56b   : > { %7303 = vmatprep.subr.bf16.mxu0 %v8248_v6  ;;  %7325 = vmatprep.subr.bf16.mxu1 %v8249_v17 }
 0x56e   : > { %7304 = vmatpush3.bf16.msra.mxu0 %v8250_v14  ;;  %7326 = vmatpush3.bf16.msra.mxu1 %v8251_v39 }
 0x56f   : > { %7305 = vmatprep.subr.bf16.mxu0 %v8252_v5  ;;  %7327 = vmatprep.subr.bf16.mxu1 %v8253_v43 }
 0x572   : > { %7306 = vmatpush3.bf16.msra.mxu0 %v8254_v58  ;;  %7328 = vmatpush3.bf16.msra.mxu1 %v8255_v54 }
 0x573   : > { %7307 = vmatprep.subr.bf16.mxu0 %v8256_v3  ;;  %7329 = vmatprep.subr.bf16.mxu1 %v8257_v48 }
 0x576   : > { %7308 = vmatpush3.bf16.msra.mxu0 %v8258_v55  ;;  %7330 = vmatpush3.bf16.msra.mxu1 %v8259_v24 }
 0x577   : > { %7309 = vmatprep.subr.bf16.mxu0 %v8260_v41  ;;  %7331 = vmatprep.subr.bf16.mxu1 %v8261_v35 }
 0x57a   : > { %7310 = vmatpush3.bf16.msra.mxu0 %v8262_v59  ;;  %7332 = vmatpush3.bf16.msra.mxu1 %v8263_v25 }
 0x57b   : > { %7311 = vmatprep.subr.bf16.mxu0 %v8264_v4  ;;  %7333 = vmatprep.subr.bf16.mxu1 %v8265_v60 }
 0x57e   : > { %7312 = vmatpush3.bf16.msra.mxu0 %v8266_v62  ;;  %7334 = vmatpush3.bf16.msra.mxu1 %v8267_v11 }
 0x621   : > { %v5960_v51 = vpop.f32.mrf.mxu0  ;;  %v6003_v45 = vpop.f32.mrf.mxu1 }
 0x623   : > { %v5962_v29 = vpop.f32.mrf.mxu0  ;;  %v6005_v47 = vpop.f32.mrf.mxu1 }
 0x625   : > { %v5964_v8 = vpop.f32.mrf.mxu0  ;;  %v6007_v61 = vpop.f32.mrf.mxu1 }
 0x626   : > { %v6012_v9 = vpack.c.bf16 %v5964_v8, %v5960_v51  ;;  %v6014_v37 = vpack.c.bf16 %v6007_v61, %v6003_v45 }
 0x627   : > { %v5966_v63 = vpop.f32.mrf.mxu0  ;;  %v6009_v50 = vpop.f32.mrf.mxu1 }
 0x628   : > { %v6013_v57 = vpack.c.bf16 %v5966_v63, %v5962_v29  ;;  %v6015_v2 = vpack.c.bf16 %v6009_v50, %v6005_v47  ;;  %v6070_v49 = vadd.bf16 %v6048_v7, %v6012_v9  ;;  %v6072_v38 = vadd.bf16 %v6062_v0, %v6014_v37 }
 0x62a   : > { %v6071_v53 = vadd.bf16 %v6055_v33, %v6013_v57  ;;  %v6073_v19 = vadd.bf16 %v6069_v56, %v6015_v2  ;;  %v6074_v18 = vmax.bf16 %v8363_v12, %v6070_v49  ;;  %v6076_v42 = vmax.bf16 %v8363_v12, %v6072_v38 }
 0x62c   : > { %v6075_v44 = vmax.bf16 %v8363_v12, %v6071_v53  ;;  %v6077_v26 = vmax.bf16 %v8363_v12, %v6073_v19 }
 0x62e   : > { %6373 = vmatprep.mubr.bf16.mxu0 %v6075_v44  ;;  %6414 = vmatprep.mubr.bf16.mxu1 %v6077_v26 }
 0x62f   : > { %6374 = vmatmul.mubr.bf16.vlgmr.msra.gmra.mxu0 %v6074_v18  ;;  %6415 = vmatmul.mubr.bf16.vlgmr.msra.gmra.mxu1 %v6076_v42 }
 0x6ef   : > { %v7313_v13 = vpop.f32.mrf.mxu0  ;;  %v7335_v20 = vpop.f32.mrf.mxu1 }
 0x6f1   : > { %v7314_v15 = vpop.f32.mrf.mxu0  ;;  %v7336_v34 = vpop.f32.mrf.mxu1 }
 0x6f2   : > { %v7315_v6 = vadd.f32 %v7314_v15, %v7313_v13  ;;  %v7337_v5 = vadd.f32 %v7336_v34, %v7335_v20 }
 0x6f3   : > { %v7316_v17 = vpop.f32.mrf.mxu0  ;;  %v7338_v14 = vpop.f32.mrf.mxu1 }
 0x6f4   : > { %v6376_v39 = vadd.f32 %v7315_v6, %v6911_v30 }
 0x6f5   : > { %v7317_v12 = vpop.f32.mrf.mxu0  ;;  %v7339_v43 = vpop.f32.mrf.mxu1 }
 0x6f6   : > { %v6417_v58 = vadd.f32 %v7337_v5, %v6376_v39  ;;  %v7318_v54 = vadd.f32 %v7317_v12, %v7316_v17  ;;  %v7340_v48 = vadd.f32 %v7339_v43, %v7338_v14 }
 0x6f8   : > { %6423 = vst [vmem:[%s9800_s16] sm:$0xff] %v6417_v58  ;;  %v6379_v3 = vadd.f32 %v7318_v54, %v6911_v30 }
 0x6fa   : > { %v6420_v55 = vadd.f32 %v7340_v48, %v6379_v3 }
 0x6fc   : > { %6424 = vst [vmem:[%s9800_s16 + $0x8] sm:$0xff] %v6420_v55 }
 0x6fd PF: > { %s6949_s29 = sshll.u32 %s8348_s22, 8  ;;  %s6439_s18 = sshll.u32 %s9800_s16, 4  ;;  %s10023_s18 = int_to_ptr.vmem [resolvable:$true] %s6439_s18 }
 0x6fe   : > { %s10020_s26 = scalar_lea.hbm %s10093_s15, %s6949_s29  ;;  %s10116_s23 = sand.u32 1, %s8336_s19  }
 0x6ff   : > { %s10027_s21 = scalar_lea.sflag [#allocation4], %s10116_s23  ;;  %s8268_s1 = scalar_lea.vmem %s10023_s18, 256 }
 0x700   : > { %p8269_p4 = scmp.ne.s32.totalorder %s10023_s18, %s8268_s1  ;;  %s8365_s22 = smov [#allocation3]  }
 0x701   : > { %s8272_s20 = sshll.u32 %s8365_s22, 4  ;;  %s8273_s20 = int_to_ptr.vmem [resolvable:$false] %s8272_s20 }
 0x702   : > { %p8270_p5 = pnand %p8269_p4, %p8497_p3  ;;  %s8274_s25 = scalar_lea.vmem %s8273_s20, 512 }
 0x703   : > { %p8275_p7 = scmp.lt.s32.totalorder %s10023_s18, %s8273_s20  ;;  %p8276_p8 = scmp.lt.s32.totalorder %s8274_s25, %s8268_s1 }
 0x704   : > { %p8271_p6 = pneg %p8270_p5 }
 0x705   : > { %p8277_p10 = por %p8276_p8, %p8275_p7 }
 0x707   : > { %p8278_p11 = pnand %p8277_p10, %p8271_p6 }
 0x709   : > { %8281 = shalt.err (!%p8278_p11)
}
 0x70a   : > { %s8282_s16 = scalar_lea.hbm %s10020_s26, 256  ;;  %s8286_s29 = scalar_lea.hbm %s10093_s15, 512 }
 0x70b   : > { %p8283_p12 = scmp.ne.s32.totalorder %s10020_s26, %s8282_s16  ;;  %p8287_p1 = scmp.lt.s32.totalorder %s10020_s26, %s10093_s15 }
 0x70c   : > { %p8288_p2 = scmp.lt.s32.totalorder %s8286_s29, %s8282_s16 }
 0x70d   : > { %p8284_p13 = pnand %p8283_p12, %p8497_p3 }
 0x70e   : > { %p8289_p4 = por %p8288_p2, %p8287_p1 }
 0x70f   : > { %p8285_p0 = pneg %p8284_p13 }
 0x711   : > { %p8290_p5 = pnand %p8289_p4, %p8285_p0 }
 0x713   : > { %8293 = shalt.err (!%p8290_p5)
}
 0x714   : > { %s8366_s23 = smov 128   ;;  %s8367_s1 = smov 8  }
 0x715   : > { %8027 = dma.vmem_to_hbm [thread:$0]  (%p8497_p3), %s10023_s18, 256, %s10020_s26, %s10027_s21, %s8366_s23, %s8366_s23, %s8367_s1  }
 0x716 PF: > { %s10117_s22 = sld [smem:[#allocation10_spill]] }
 0x717   : > { %s10118_s20 = sld [smem:[#allocation6_spill]] }
 0x71c   : > { %p8033_p6 = scmp.ge.s32.totalorder %s10117_s22, 2 }
 0x71d   : > { %s6454_s24 = sand.u32 1, %s10118_s20  }
 0x71e   : > { %p8030_p7 = pnand %p8033_p6, %p8507_p9  ;;  %s6455_s16 = scalar_lea.sflag [#allocation4], %s6454_s24 }
 0x720   : > { %p8031_p8 = pneg %p8030_p7 }
 0x722   : > { %8327 = dma.done.wait (%p8031_p8), %s6455_s16, 256  }
 0x723   : > { %8329 = vsyncadd (%p8031_p8), %s6455_s16, 4294967040  ;;  %s28_s25 = sadd.s32 1, %s10117_s22   ;;  %s10120_s28 = sld [smem:[#allocation7_spill]] }
 0x724   : > { %p25_p10 = scmp.ge.s32.totalorder %s28_s25, 6   ;;  %s10121_s20 = sld [smem:[#allocation14_spill]] }
 0x725   : > { %s10122_s21 = sld [smem:[#allocation8_spill]]  ;;  %s10126_s18 = smov %s8336_s19 }
 0x726   : > { %s10123_s22 = sld [smem:[#allocation9_spill]]  ;;  %27 = sbr.rel (!%p25_p10) target bundleno = 7 (0x7), region = 127 }
 0x727   : > { %s10124_s23 = sld [smem:[#allocation11_spill]] }
 0x728   : > { %s10125_s24 = sld [smem:[#allocation12_spill]] }
 0x729   : > { %s10127_s19 = smov %s10120_s28 }
 0x72b   :  { %6460 = vsyncpa [#allocation4], 1 }
 0x72c   :  { %6462 = vsyncpa [#allocation4 + $0x1], 1 }

</bundles_post_ra>
